<compile_context>
chip_gen: v7x
topology: tpu7x:2x2x1
jax: 0.10.0
libtpu: 0.0.40
codegen_flags: <defaults>
</compile_context>

<pallas_src>
import jax
import jax.numpy as jnp
from jax.experimental import pallas as pl
from jax.experimental.pallas import tpu as pltpu  # noqa: F401  (TPU backend)

# ----------------------------- configuration --------------------------------
PAD_INDEX = 0
BATCH = 2          # B
SEQ = 8            # S  (src length)
H_LEN = 4          # length of the `hidden` input (zero-padded up to S)
T_DEC = 6          # trg length (decoder steps)
H = 32             # hidden_size
E = 32             # embed_size
V = 50             # vocab_size
GEN_PAD = 64       # vocab padded to 64 logit lanes inside the 128-lane slab
DEC_SLAB = 128     # per-step decoder output slab: [logits(64) | asp(32) | 0(32)]
STATS_SLAB = 256   # [mean0|mean1|std0|std1|coding|0] packed lane-dense
L = 2              # num_layers
RNN_HIDDEN = 32    # opt.rnn_hidden (hidden input feature dim = 2*RNN_HIDDEN)
HIDDEN_DIM = 16    # opt.hidden_dim


# ------------------------------ kernel helpers --------------------------------
def _softplus(x):
    return jnp.maximum(x, 0.0) + jnp.log(1.0 + jnp.exp(-jnp.abs(x)))


def _gru_step(gi, h, whh, bhh):
    """One GRU step with the input-to-hidden term (gi, bias included) precomputed.
    PyTorch gate order (r, z, n); the two sigmoid gates share one EUP dispatch."""
    gh = jnp.dot(h, whh, preferred_element_type=jnp.float32) + bhh
    rz = jax.nn.sigmoid(gi[:, 0:2 * H] + gh[:, 0:2 * H])
    r = rz[:, 0:H]
    z = rz[:, H:2 * H]
    n = jnp.tanh(gi[:, 2 * H:3 * H] + r * gh[:, 2 * H:3 * H])
    return (1.0 - z) * n + z * h


# ------------------------------ fused kernel ----------------------------------
def _textvae_kernel(
    # inputs
    xin_ref, eps_ref,
    lin_w_ref, lin_b_ref,
    e0_wih_ref, e0_whh_ref, e0_bih_ref, e0_bhh_ref,       # encoder layer 0 (dir-stacked)
    e1_wih_ref, e1_whh_ref, e1_bih_ref, e1_bhh_ref,       # encoder layer 1 (dir-stacked)
    ms_w_ref, ms_b_ref,                                    # fused [mean|std] projection
    dec_wih_ref, dec_whh_ref, dec_bih_ref, dec_bhh_ref,    # decoder stacked GRU cells
    op1_w_ref, op1_b_ref, op2_w_ref, op2_b_ref,            # output_projection
    gen_w_ref, gen_b_ref,                                  # generator (V padded to 64)
    proj_w_ref, proj_b_ref,                                # coding projection
    # outputs
    dec_ref,     # (T_DEC*B, DEC_SLAB)   [0:64]=logits, [64:96]=asp, [96:128]=0
    stats_ref,   # (B, STATS_SLAB)       [mean0|mean1|std0|std1|coding|0]
):
    B = BATCH

    # ---- Encoder Lin: one batched matmul over all real timesteps; padded
    #      positions (t >= H_LEN) are zero inputs -> just the Lin bias.
    lin_b = lin_b_ref[...]
    emb_real = jnp.dot(xin_ref[...], lin_w_ref[...],
                       preferred_element_type=jnp.float32) + lin_b           # (H_LEN*B, H)
    emb_pad = lin_b + jnp.zeros(((SEQ - H_LEN) * B, H), jnp.float32)
    emb = jnp.concatenate([emb_real, emb_pad], axis=0)                       # (S*B, H)

    # ---- Encoder GRU layer 0: input-to-hidden terms for ALL steps and both
    #      directions hoisted into two batched matmuls (off the serial chain).
    gi0_f = jnp.dot(emb, e0_wih_ref[0], preferred_element_type=jnp.float32) + e0_bih_ref[0]
    gi0_b = jnp.dot(emb, e0_wih_ref[1], preferred_element_type=jnp.float32) + e0_bih_ref[1]
    whh0_f, bhh0_f = e0_whh_ref[0], e0_bhh_ref[0]
    whh0_b, bhh0_b = e0_whh_ref[1], e0_bhh_ref[1]

    h0f = jnp.zeros((B, H), jnp.float32)
    h0b = jnp.zeros((B, H), jnp.float32)
    out_f = [None] * SEQ
    out_b = [None] * SEQ
    for i in range(SEQ):                         # fwd & bwd chains interleaved
        tf, tb = i, SEQ - 1 - i
        h0f = _gru_step(gi0_f[tf * B:(tf + 1) * B, :], h0f, whh0_f, bhh0_f)
        h0b = _gru_step(gi0_b[tb * B:(tb + 1) * B, :], h0b, whh0_b, bhh0_b)
        out_f[tf] = h0f
        out_b[tb] = h0b

    # ---- Encoder GRU layer 1: pack layer-0 outputs once, hoist gi again.
    x1 = jnp.concatenate([jnp.concatenate(out_f, axis=0),
                          jnp.concatenate(out_b, axis=0)], axis=-1)          # (S*B, 2H)
    gi1_f = jnp.dot(x1, e1_wih_ref[0], preferred_element_type=jnp.float32) + e1_bih_ref[0]
    gi1_b = jnp.dot(x1, e1_wih_ref[1], preferred_element_type=jnp.float32) + e1_bih_ref[1]
    whh1_f, bhh1_f = e1_whh_ref[0], e1_bhh_ref[0]
    whh1_b, bhh1_b = e1_whh_ref[1], e1_bhh_ref[1]

    h1f = jnp.zeros((B, H), jnp.float32)
    h1b = jnp.zeros((B, H), jnp.float32)
    for i in range(SEQ):
        tf, tb = i, SEQ - 1 - i
        h1f = _gru_step(gi1_f[tf * B:(tf + 1) * B, :], h1f, whh1_f, bhh1_f)
        h1b = _gru_step(gi1_b[tb * B:(tb + 1) * B, :], h1b, whh1_b, bhh1_b)

    # ---- final_states = cat(h_n.chunk(2, dim=0), dim=2)
    fs = jnp.concatenate(
        [jnp.concatenate([h0f, h1f], axis=-1),    # row block 0: [layer0_fwd | layer1_fwd]
         jnp.concatenate([h0b, h1b], axis=-1)],   # row block 1: [layer0_bwd | layer1_bwd]
        axis=0)                                   # (L*B, 2H)

    # ---- encode(): fused [mean | std_pre] projection; reparameterize.
    ms = jnp.dot(fs, ms_w_ref[...], preferred_element_type=jnp.float32) + ms_b_ref[...]
    mean = ms[:, 0:H]
    std = _softplus(ms[:, H:2 * H])
    enc = mean + std * eps_ref[...]                                          # (L*B, H)
    enc0 = enc[0:B, :]
    enc1 = enc[B:2 * B, :]
    origin = enc0 + enc1                          # origin_hidden = encoding.sum(0)

    # ---- coding = mean over layers of projection(encoding) = projection(origin/L)
    coding = jnp.dot(origin * (1.0 / L), proj_w_ref[...],
                     preferred_element_type=jnp.float32) + proj_b_ref[...]   # (B, HIDDEN_DIM)

    # ---- one lane-dense stats slab: [mean0 | mean1 | std0 | std1 | coding | 0]
    stats_ref[...] = jnp.concatenate(
        [mean[0:B, :], mean[B:2 * B, :], std[0:B, :], std[B:2 * B, :], coding,
         jnp.zeros((B, STATS_SLAB - 4 * H - HIDDEN_DIM), jnp.float32)], axis=-1)

    # ---- Decoder (decoder_type='self').  Layer-0 cell input is the constant
    #      origin_hidden -> its input-gate term is hoisted out of the loop.
    gi_dec0 = jnp.dot(origin, dec_wih_ref[0],
                      preferred_element_type=jnp.float32) + dec_bih_ref[0]
    dwhh0, dbhh0 = dec_whh_ref[0], dec_bhh_ref[0]
    dwih1, dbih1 = dec_wih_ref[1], dec_bih_ref[1]
    dwhh1, dbhh1 = dec_whh_ref[1], dec_bhh_ref[1]

    hd0, hd1 = enc0, enc1
    tops = [None] * T_DEC
    for t in range(T_DEC):
        hd0 = _gru_step(gi_dec0, hd0, dwhh0, dbhh0)               # layer 0 (constant input)
        gi1 = jnp.dot(hd0, dwih1, preferred_element_type=jnp.float32) + dbih1
        hd1 = _gru_step(gi1, hd1, dwhh1, dbhh1)                   # layer 1
        tops[t] = hd1

    # ---- output projection + generator hoisted out of the time loop (batched)
    top = jnp.concatenate(tops, axis=0)                                       # (T*B, H)
    o1 = jnp.tanh(jnp.dot(top, op1_w_ref[...],
                          preferred_element_type=jnp.float32) + op1_b_ref[...])
    asp = jnp.dot(o1, op2_w_ref[...],
                  preferred_element_type=jnp.float32) + op2_b_ref[...]        # (T*B, E)
    logit = jnp.dot(asp, gen_w_ref[...],
                    preferred_element_type=jnp.float32) + gen_b_ref[...]      # (T*B, GEN_PAD)

    # ---- single lane-dense decoder slab: [logits(64) | asp(32) | 0(32)]
    dec_ref[...] = jnp.concatenate(
        [logit, asp, jnp.zeros((T_DEC * B, DEC_SLAB - GEN_PAD - E), jnp.float32)],
        axis=-1)


# ------------------------------ parameters -----------------------------------
def _init(key, shape, scale=0.1):
    return jax.random.normal(key, shape, jnp.float32) * scale


def init_params(key):
    ks = iter(jax.random.split(key, 64))
    p = {}
    # Encoder.Lin : Linear(2*rnn_hidden, H)   (weights stored pre-transposed)
    p['lin_w'] = _init(next(ks), (2 * RNN_HIDDEN, H))
    p['lin_b'] = _init(next(ks), (1, H))
    # Encoder bidirectional GRU (PyTorch gate order r, z, n)
    gru = []
    for l in range(L):
        in_sz = H if l == 0 else 2 * H
        layer = {}
        for d in ('fwd', 'bwd'):
            layer[d] = dict(
                wih=_init(next(ks), (in_sz, 3 * H)),
                whh=_init(next(ks), (H, 3 * H)),
                bih=_init(next(ks), (1, 3 * H)),
                bhh=_init(next(ks), (1, 3 * H)))
        gru.append(layer)
    p['gru'] = gru
    # VAE projections: Linear(2H, H)
    p['mean_w'] = _init(next(ks), (2 * H, H))
    p['mean_b'] = _init(next(ks), (1, H))
    p['std_w'] = _init(next(ks), (2 * H, H))
    p['std_b'] = _init(next(ks), (1, H))
    # Decoder MultiLayerGRUCell (stacked, input_size == hidden_size)
    p['dec_wih'] = _init(next(ks), (L, H, 3 * H))
    p['dec_whh'] = _init(next(ks), (L, H, 3 * H))
    p['dec_bih'] = _init(next(ks), (L, 1, 3 * H))
    p['dec_bhh'] = _init(next(ks), (L, 1, 3 * H))
    # Decoder output_projection: Linear(H,H) -> Tanh -> Linear(H,E)
    p['op1_w'] = _init(next(ks), (H, H))
    p['op1_b'] = _init(next(ks), (1, H))
    p['op2_w'] = _init(next(ks), (H, E))
    p['op2_b'] = _init(next(ks), (1, E))
    # generator: Linear(E, V)
    p['gen_w'] = _init(next(ks), (E, V))
    p['gen_b'] = _init(next(ks), (1, V))
    # projection: Linear(H, opt.hidden_dim)
    p['proj_w'] = _init(next(ks), (H, HIDDEN_DIM))
    p['proj_b'] = _init(next(ks), (1, HIDDEN_DIM))
    return p


def pack_params(p):
    """One-time parameter prep for the fused kernel (stack dirs, fuse mean|std,
    pad the generator vocab dim to GEN_PAD=64 for the lane-dense decoder slab)."""
    def stack_dir(l, name):
        return jnp.stack([p['gru'][l]['fwd'][name], p['gru'][l]['bwd'][name]], axis=0)

    ms_w = jnp.concatenate([p['mean_w'], p['std_w']], axis=1)   # (2H, 2H)
    ms_b = jnp.concatenate([p['mean_b'], p['std_b']], axis=1)   # (1, 2H)
    gen_w = jnp.zeros((E, GEN_PAD), jnp.float32).at[:, :V].set(p['gen_w'])
    gen_b = jnp.zeros((1, GEN_PAD), jnp.float32).at[:, :V].set(p['gen_b'])
    return (
        p['lin_w'], p['lin_b'],
        stack_dir(0, 'wih'), stack_dir(0, 'whh'), stack_dir(0, 'bih'), stack_dir(0, 'bhh'),
        stack_dir(1, 'wih'), stack_dir(1, 'whh'), stack_dir(1, 'bih'), stack_dir(1, 'bhh'),
        ms_w, ms_b,
        p['dec_wih'], p['dec_whh'], p['dec_bih'], p['dec_bhh'],
        p['op1_w'], p['op1_b'], p['op2_w'], p['op2_b'],
        gen_w, gen_b,
        p['proj_w'], p['proj_b'],
    )


# ------------------------------- forward --------------------------------------
def textvae_forward(packed_params, src, hidden, trg, noise_key):
    B, S = src.shape
    T = trg.shape[1]
    assert S == SEQ and T == T_DEC and hidden.shape[1] == H_LEN and B == BATCH

    # Cheap XLA prep: sort batch by descending token length (the reference keeps
    # the sorted order downstream — no unsort — so we do too).  Lin commutes with
    # the batch gather, so sorting before the kernel is equivalent.
    src_lens = jnp.sum((src != PAD_INDEX).astype(jnp.int32), axis=1)
    sort_index = jnp.argsort(-src_lens)
    hidden_sorted = jnp.take(hidden, sort_index, axis=0)                # (B, H_LEN, 2R)
    xin = jnp.transpose(hidden_sorted, (1, 0, 2)).reshape(H_LEN * B, 2 * RNN_HIDDEN)
    eps = jax.random.normal(noise_key, (L * B, H), jnp.float32)         # (L*B, H)

    out_shapes = (
        jax.ShapeDtypeStruct((T_DEC * B, DEC_SLAB), jnp.float32),       # logits|asp slab
        jax.ShapeDtypeStruct((B, STATS_SLAB), jnp.float32),             # mean|std|coding slab
    )
    dec_slab, stats = pl.pallas_call(
        _textvae_kernel,
        out_shape=out_shapes,
    )(xin, eps, *packed_params)

    dec_slab = dec_slab.reshape(T_DEC, B, DEC_SLAB)
    logit = jnp.transpose(dec_slab[:, :, :V], (1, 0, 2))                # (B, T, V)
    output_asp = jnp.transpose(dec_slab[:, :, GEN_PAD:GEN_PAD + E], (1, 0, 2))  # (B, T, E)
    mean = jnp.stack([stats[:, 0:H], stats[:, H:2 * H]], axis=0)        # (L, B, H)
    std = jnp.stack([stats[:, 2 * H:3 * H], stats[:, 3 * H:4 * H]], axis=0)
    coding = stats[:, 4 * H:4 * H + HIDDEN_DIM]                         # (B, HIDDEN_DIM)
    return logit, output_asp, mean, std, coding


# --------------------------------- main ---------------------------------------
if __name__ == "__main__":
    key = jax.random.PRNGKey(0)
    kp, kh, knoise = jax.random.split(key, 3)
    params = init_params(kp)
    packed = pack_params(params)

    # src token ids (PAD=0), distinct lengths so the descending sort is unambiguous
    src = jnp.array([[5, 7, 3, 9, 2, 4, 6, 8],
                     [1, 4, 2, 7, 3, 0, 0, 0]], dtype=jnp.int32)          # (B, S)
    hidden = jax.random.normal(kh, (BATCH, H_LEN, 2 * RNN_HIDDEN), jnp.float32)
    trg = jnp.ones((BATCH, T_DEC), dtype=jnp.int32)                       # tokens unused in step()

    fwd = jax.jit(textvae_forward)
    outs = fwd(packed, src, hidden, trg, knoise)
    outs = jax.tree_util.tree_map(jax.block_until_ready, outs)

    logit, output_asp, mean, std, coding = outs
    assert logit.shape == (BATCH, T_DEC, V)
    assert output_asp.shape == (BATCH, T_DEC, E)
    assert mean.shape == (L, BATCH, H)
    assert std.shape == (L, BATCH, H)
    assert coding.shape == (BATCH, HIDDEN_DIM)
    assert all(bool(jnp.all(jnp.isfinite(o))) for o in outs)
    print("KERNEL_OK")
</pallas_src>

<mosaic_0001>
module attributes {stable_mosaic.version = 11 : i64} {
  func.func @_textvae_kernel(%arg0: memref<8x64xf32, #tpu.memory_space<vmem>>, %arg1: memref<4x32xf32, #tpu.memory_space<vmem>>, %arg2: memref<64x32xf32, #tpu.memory_space<vmem>>, %arg3: memref<1x32xf32, #tpu.memory_space<vmem>>, %arg4: memref<2x32x96xf32, #tpu.memory_space<vmem>>, %arg5: memref<2x32x96xf32, #tpu.memory_space<vmem>>, %arg6: memref<2x1x96xf32, #tpu.memory_space<vmem>>, %arg7: memref<2x1x96xf32, #tpu.memory_space<vmem>>, %arg8: memref<2x64x96xf32, #tpu.memory_space<vmem>>, %arg9: memref<2x32x96xf32, #tpu.memory_space<vmem>>, %arg10: memref<2x1x96xf32, #tpu.memory_space<vmem>>, %arg11: memref<2x1x96xf32, #tpu.memory_space<vmem>>, %arg12: memref<64x64xf32, #tpu.memory_space<vmem>>, %arg13: memref<1x64xf32, #tpu.memory_space<vmem>>, %arg14: memref<2x32x96xf32, #tpu.memory_space<vmem>>, %arg15: memref<2x32x96xf32, #tpu.memory_space<vmem>>, %arg16: memref<2x1x96xf32, #tpu.memory_space<vmem>>, %arg17: memref<2x1x96xf32, #tpu.memory_space<vmem>>, %arg18: memref<32x32xf32, #tpu.memory_space<vmem>>, %arg19: memref<1x32xf32, #tpu.memory_space<vmem>>, %arg20: memref<32x32xf32, #tpu.memory_space<vmem>>, %arg21: memref<1x32xf32, #tpu.memory_space<vmem>>, %arg22: memref<32x64xf32, #tpu.memory_space<vmem>>, %arg23: memref<1x64xf32, #tpu.memory_space<vmem>>, %arg24: memref<32x16xf32, #tpu.memory_space<vmem>>, %arg25: memref<1x16xf32, #tpu.memory_space<vmem>>, %arg26: memref<12x128xf32, #tpu.memory_space<vmem>>, %arg27: memref<2x256xf32, #tpu.memory_space<vmem>>) attributes {dimension_semantics = [], scalar_prefetch = 0 : i64, scratch_operands = 0 : i64, tpu.core_type = #tpu.core_type<tc>} {
    %c0 = arith.constant 0 : index
    %c0_0 = arith.constant 0 : index
    %0 = vector.load %arg3[%c0, %c0_0] : memref<1x32xf32, #tpu.memory_space<vmem>>, vector<1x32xf32>
    %c0_1 = arith.constant 0 : index
    %c0_2 = arith.constant 0 : index
    %1 = vector.load %arg0[%c0_1, %c0_2] : memref<8x64xf32, #tpu.memory_space<vmem>>, vector<8x64xf32>
    %c0_3 = arith.constant 0 : index
    %c0_4 = arith.constant 0 : index
    %2 = vector.load %arg2[%c0_3, %c0_4] : memref<64x32xf32, #tpu.memory_space<vmem>>, vector<64x32xf32>
    %cst = arith.constant dense<0.000000e+00> : vector<8x32xf32>
    %3 = tpu.matmul %1, %2, %cst {dimension_numbers = #tpu.dot_dimension_numbers<[1], [0], [0], [1], [0, 0, 1, 1], [], []>} : vector<8x64xf32>, vector<64x32xf32>, vector<8x32xf32> -> vector<8x32xf32>
    %4 = vector.broadcast %0 : vector<1x32xf32> to vector<8x32xf32>
    %5 = arith.addf %3, %4 : vector<8x32xf32>
    %cst_5 = arith.constant 0.000000e+00 : f32
    %6 = vector.broadcast %cst_5 : f32 to vector<8x32xf32>
    %7 = vector.broadcast %0 : vector<1x32xf32> to vector<8x32xf32>
    %8 = arith.addf %7, %6 : vector<8x32xf32>
    %9 = tpu.concatenate %5, %8 in 0 : vector<8x32xf32>, vector<8x32xf32> -> vector<16x32xf32>
    %c0_6 = arith.constant 0 : index
    %c0_7 = arith.constant 0 : index
    %c0_8 = arith.constant 0 : index
    %10 = vector.load %arg4[%c0_6, %c0_7, %c0_8] : memref<2x32x96xf32, #tpu.memory_space<vmem>>, vector<1x32x96xf32>
    %11 = vector.shape_cast %10 : vector<1x32x96xf32> to vector<32x96xf32>
    %cst_9 = arith.constant dense<0.000000e+00> : vector<16x96xf32>
    %12 = tpu.matmul %9, %11, %cst_9 {dimension_numbers = #tpu.dot_dimension_numbers<[1], [0], [0], [1], [0, 0, 1, 1], [], []>} : vector<16x32xf32>, vector<32x96xf32>, vector<16x96xf32> -> vector<16x96xf32>
    %c0_10 = arith.constant 0 : index
    %c0_11 = arith.constant 0 : index
    %c0_12 = arith.constant 0 : index
    %13 = vector.load %arg6[%c0_10, %c0_11, %c0_12] : memref<2x1x96xf32, #tpu.memory_space<vmem>>, vector<1x1x96xf32>
    %14 = vector.shape_cast %13 : vector<1x1x96xf32> to vector<1x96xf32>
    %15 = vector.broadcast %14 : vector<1x96xf32> to vector<16x96xf32>
    %16 = arith.addf %12, %15 : vector<16x96xf32>
    %c1 = arith.constant 1 : index
    %c0_13 = arith.constant 0 : index
    %c0_14 = arith.constant 0 : index
    %17 = vector.load %arg4[%c1, %c0_13, %c0_14] : memref<2x32x96xf32, #tpu.memory_space<vmem>>, vector<1x32x96xf32>
    %18 = vector.shape_cast %17 : vector<1x32x96xf32> to vector<32x96xf32>
    %cst_15 = arith.constant dense<0.000000e+00> : vector<16x96xf32>
    %19 = tpu.matmul %9, %18, %cst_15 {dimension_numbers = #tpu.dot_dimension_numbers<[1], [0], [0], [1], [0, 0, 1, 1], [], []>} : vector<16x32xf32>, vector<32x96xf32>, vector<16x96xf32> -> vector<16x96xf32>
    %c1_16 = arith.constant 1 : index
    %c0_17 = arith.constant 0 : index
    %c0_18 = arith.constant 0 : index
    %20 = vector.load %arg6[%c1_16, %c0_17, %c0_18] : memref<2x1x96xf32, #tpu.memory_space<vmem>>, vector<1x1x96xf32>
    %21 = vector.shape_cast %20 : vector<1x1x96xf32> to vector<1x96xf32>
    %22 = vector.broadcast %21 : vector<1x96xf32> to vector<16x96xf32>
    %23 = arith.addf %19, %22 : vector<16x96xf32>
    %c0_19 = arith.constant 0 : index
    %c0_20 = arith.constant 0 : index
    %c0_21 = arith.constant 0 : index
    %24 = vector.load %arg5[%c0_19, %c0_20, %c0_21] : memref<2x32x96xf32, #tpu.memory_space<vmem>>, vector<1x32x96xf32>
    %25 = vector.shape_cast %24 : vector<1x32x96xf32> to vector<32x96xf32>
    %c0_22 = arith.constant 0 : index
    %c0_23 = arith.constant 0 : index
    %c0_24 = arith.constant 0 : index
    %26 = vector.load %arg7[%c0_22, %c0_23, %c0_24] : memref<2x1x96xf32, #tpu.memory_space<vmem>>, vector<1x1x96xf32>
    %27 = vector.shape_cast %26 : vector<1x1x96xf32> to vector<1x96xf32>
    %c1_25 = arith.constant 1 : index
    %c0_26 = arith.constant 0 : index
    %c0_27 = arith.constant 0 : index
    %28 = vector.load %arg5[%c1_25, %c0_26, %c0_27] : memref<2x32x96xf32, #tpu.memory_space<vmem>>, vector<1x32x96xf32>
    %29 = vector.shape_cast %28 : vector<1x32x96xf32> to vector<32x96xf32>
    %c1_28 = arith.constant 1 : index
    %c0_29 = arith.constant 0 : index
    %c0_30 = arith.constant 0 : index
    %30 = vector.load %arg7[%c1_28, %c0_29, %c0_30] : memref<2x1x96xf32, #tpu.memory_space<vmem>>, vector<1x1x96xf32>
    %31 = vector.shape_cast %30 : vector<1x1x96xf32> to vector<1x96xf32>
    %cst_31 = arith.constant 0.000000e+00 : f32
    %32 = vector.broadcast %cst_31 : f32 to vector<2x32xf32>
    %cst_32 = arith.constant 0.000000e+00 : f32
    %33 = vector.broadcast %cst_32 : f32 to vector<2x32xf32>
    %34 = vector.extract_strided_slice %16 {offsets = [0, 0], sizes = [2, 96], strides = [1, 1]} : vector<16x96xf32> to vector<2x96xf32>
    %cst_33 = arith.constant dense<0.000000e+00> : vector<2x96xf32>
    %35 = tpu.matmul %32, %25, %cst_33 {dimension_numbers = #tpu.dot_dimension_numbers<[1], [0], [0], [1], [0, 0, 1, 1], [], []>} : vector<2x32xf32>, vector<32x96xf32>, vector<2x96xf32> -> vector<2x96xf32>
    %36 = vector.broadcast %27 : vector<1x96xf32> to vector<2x96xf32>
    %37 = arith.addf %35, %36 : vector<2x96xf32>
    %38 = vector.extract_strided_slice %34 {offsets = [0, 0], sizes = [2, 64], strides = [1, 1]} : vector<2x96xf32> to vector<2x64xf32>
    %39 = vector.extract_strided_slice %37 {offsets = [0, 0], sizes = [2, 64], strides = [1, 1]} : vector<2x96xf32> to vector<2x64xf32>
    %40 = arith.addf %38, %39 : vector<2x64xf32>
    %41 = arith.negf %40 : vector<2x64xf32>
    %42 = math.exp %41 : vector<2x64xf32>
    %cst_34 = arith.constant 1.000000e+00 : f32
    %43 = vector.broadcast %cst_34 : f32 to vector<2x64xf32>
    %44 = arith.addf %43, %42 : vector<2x64xf32>
    %45 = arith.divf %43, %44 : vector<2x64xf32>
    %46 = vector.extract_strided_slice %45 {offsets = [0, 0], sizes = [2, 32], strides = [1, 1]} : vector<2x64xf32> to vector<2x32xf32>
    %47 = vector.extract_strided_slice %45 {offsets = [0, 32], sizes = [2, 32], strides = [1, 1]} : vector<2x64xf32> to vector<2x32xf32>
    %48 = vector.extract_strided_slice %34 {offsets = [0, 64], sizes = [2, 32], strides = [1, 1]} : vector<2x96xf32> to vector<2x32xf32>
    %49 = vector.extract_strided_slice %37 {offsets = [0, 64], sizes = [2, 32], strides = [1, 1]} : vector<2x96xf32> to vector<2x32xf32>
    %50 = arith.mulf %46, %49 : vector<2x32xf32>
    %51 = arith.addf %48, %50 : vector<2x32xf32>
    %52 = math.tanh %51 : vector<2x32xf32>
    %cst_35 = arith.constant 1.000000e+00 : f32
    %53 = vector.broadcast %cst_35 : f32 to vector<2x32xf32>
    %54 = arith.subf %53, %47 : vector<2x32xf32>
    %55 = arith.mulf %54, %52 : vector<2x32xf32>
    %56 = arith.mulf %47, %32 : vector<2x32xf32>
    %57 = arith.addf %55, %56 : vector<2x32xf32>
    %58 = vector.extract_strided_slice %23 {offsets = [14, 0], sizes = [2, 96], strides = [1, 1]} : vector<16x96xf32> to vector<2x96xf32>
    %cst_36 = arith.constant dense<0.000000e+00> : vector<2x96xf32>
    %59 = tpu.matmul %33, %29, %cst_36 {dimension_numbers = #tpu.dot_dimension_numbers<[1], [0], [0], [1], [0, 0, 1, 1], [], []>} : vector<2x32xf32>, vector<32x96xf32>, vector<2x96xf32> -> vector<2x96xf32>
    %60 = vector.broadcast %31 : vector<1x96xf32> to vector<2x96xf32>
    %61 = arith.addf %59, %60 : vector<2x96xf32>
    %62 = vector.extract_strided_slice %58 {offsets = [0, 0], sizes = [2, 64], strides = [1, 1]} : vector<2x96xf32> to vector<2x64xf32>
    %63 = vector.extract_strided_slice %61 {offsets = [0, 0], sizes = [2, 64], strides = [1, 1]} : vector<2x96xf32> to vector<2x64xf32>
    %64 = arith.addf %62, %63 : vector<2x64xf32>
    %65 = arith.negf %64 : vector<2x64xf32>
    %66 = math.exp %65 : vector<2x64xf32>
    %cst_37 = arith.constant 1.000000e+00 : f32
    %67 = vector.broadcast %cst_37 : f32 to vector<2x64xf32>
    %68 = arith.addf %67, %66 : vector<2x64xf32>
    %69 = arith.divf %67, %68 : vector<2x64xf32>
    %70 = vector.extract_strided_slice %69 {offsets = [0, 0], sizes = [2, 32], strides = [1, 1]} : vector<2x64xf32> to vector<2x32xf32>
    %71 = vector.extract_strided_slice %69 {offsets = [0, 32], sizes = [2, 32], strides = [1, 1]} : vector<2x64xf32> to vector<2x32xf32>
    %72 = vector.extract_strided_slice %58 {offsets = [0, 64], sizes = [2, 32], strides = [1, 1]} : vector<2x96xf32> to vector<2x32xf32>
    %73 = vector.extract_strided_slice %61 {offsets = [0, 64], sizes = [2, 32], strides = [1, 1]} : vector<2x96xf32> to vector<2x32xf32>
    %74 = arith.mulf %70, %73 : vector<2x32xf32>
    %75 = arith.addf %72, %74 : vector<2x32xf32>
    %76 = math.tanh %75 : vector<2x32xf32>
    %cst_38 = arith.constant 1.000000e+00 : f32
    %77 = vector.broadcast %cst_38 : f32 to vector<2x32xf32>
    %78 = arith.subf %77, %71 : vector<2x32xf32>
    %79 = arith.mulf %78, %76 : vector<2x32xf32>
    %80 = arith.mulf %71, %33 : vector<2x32xf32>
    %81 = arith.addf %79, %80 : vector<2x32xf32>
    %82 = vector.extract_strided_slice %16 {offsets = [2, 0], sizes = [2, 96], strides = [1, 1]} : vector<16x96xf32> to vector<2x96xf32>
    %cst_39 = arith.constant dense<0.000000e+00> : vector<2x96xf32>
    %83 = tpu.matmul %57, %25, %cst_39 {dimension_numbers = #tpu.dot_dimension_numbers<[1], [0], [0], [1], [0, 0, 1, 1], [], []>} : vector<2x32xf32>, vector<32x96xf32>, vector<2x96xf32> -> vector<2x96xf32>
    %84 = vector.broadcast %27 : vector<1x96xf32> to vector<2x96xf32>
    %85 = arith.addf %83, %84 : vector<2x96xf32>
    %86 = vector.extract_strided_slice %82 {offsets = [0, 0], sizes = [2, 64], strides = [1, 1]} : vector<2x96xf32> to vector<2x64xf32>
    %87 = vector.extract_strided_slice %85 {offsets = [0, 0], sizes = [2, 64], strides = [1, 1]} : vector<2x96xf32> to vector<2x64xf32>
    %88 = arith.addf %86, %87 : vector<2x64xf32>
    %89 = arith.negf %88 : vector<2x64xf32>
    %90 = math.exp %89 : vector<2x64xf32>
    %cst_40 = arith.constant 1.000000e+00 : f32
    %91 = vector.broadcast %cst_40 : f32 to vector<2x64xf32>
    %92 = arith.addf %91, %90 : vector<2x64xf32>
    %93 = arith.divf %91, %92 : vector<2x64xf32>
    %94 = vector.extract_strided_slice %93 {offsets = [0, 0], sizes = [2, 32], strides = [1, 1]} : vector<2x64xf32> to vector<2x32xf32>
    %95 = vector.extract_strided_slice %93 {offsets = [0, 32], sizes = [2, 32], strides = [1, 1]} : vector<2x64xf32> to vector<2x32xf32>
    %96 = vector.extract_strided_slice %82 {offsets = [0, 64], sizes = [2, 32], strides = [1, 1]} : vector<2x96xf32> to vector<2x32xf32>
    %97 = vector.extract_strided_slice %85 {offsets = [0, 64], sizes = [2, 32], strides = [1, 1]} : vector<2x96xf32> to vector<2x32xf32>
    %98 = arith.mulf %94, %97 : vector<2x32xf32>
    %99 = arith.addf %96, %98 : vector<2x32xf32>
    %100 = math.tanh %99 : vector<2x32xf32>
    %cst_41 = arith.constant 1.000000e+00 : f32
    %101 = vector.broadcast %cst_41 : f32 to vector<2x32xf32>
    %102 = arith.subf %101, %95 : vector<2x32xf32>
    %103 = arith.mulf %102, %100 : vector<2x32xf32>
    %104 = arith.mulf %95, %57 : vector<2x32xf32>
    %105 = arith.addf %103, %104 : vector<2x32xf32>
    %106 = vector.extract_strided_slice %23 {offsets = [12, 0], sizes = [2, 96], strides = [1, 1]} : vector<16x96xf32> to vector<2x96xf32>
    %cst_42 = arith.constant dense<0.000000e+00> : vector<2x96xf32>
    %107 = tpu.matmul %81, %29, %cst_42 {dimension_numbers = #tpu.dot_dimension_numbers<[1], [0], [0], [1], [0, 0, 1, 1], [], []>} : vector<2x32xf32>, vector<32x96xf32>, vector<2x96xf32> -> vector<2x96xf32>
    %108 = vector.broadcast %31 : vector<1x96xf32> to vector<2x96xf32>
    %109 = arith.addf %107, %108 : vector<2x96xf32>
    %110 = vector.extract_strided_slice %106 {offsets = [0, 0], sizes = [2, 64], strides = [1, 1]} : vector<2x96xf32> to vector<2x64xf32>
    %111 = vector.extract_strided_slice %109 {offsets = [0, 0], sizes = [2, 64], strides = [1, 1]} : vector<2x96xf32> to vector<2x64xf32>
    %112 = arith.addf %110, %111 : vector<2x64xf32>
    %113 = arith.negf %112 : vector<2x64xf32>
    %114 = math.exp %113 : vector<2x64xf32>
    %cst_43 = arith.constant 1.000000e+00 : f32
    %115 = vector.broadcast %cst_43 : f32 to vector<2x64xf32>
    %116 = arith.addf %115, %114 : vector<2x64xf32>
    %117 = arith.divf %115, %116 : vector<2x64xf32>
    %118 = vector.extract_strided_slice %117 {offsets = [0, 0], sizes = [2, 32], strides = [1, 1]} : vector<2x64xf32> to vector<2x32xf32>
    %119 = vector.extract_strided_slice %117 {offsets = [0, 32], sizes = [2, 32], strides = [1, 1]} : vector<2x64xf32> to vector<2x32xf32>
    %120 = vector.extract_strided_slice %106 {offsets = [0, 64], sizes = [2, 32], strides = [1, 1]} : vector<2x96xf32> to vector<2x32xf32>
    %121 = vector.extract_strided_slice %109 {offsets = [0, 64], sizes = [2, 32], strides = [1, 1]} : vector<2x96xf32> to vector<2x32xf32>
    %122 = arith.mulf %118, %121 : vector<2x32xf32>
    %123 = arith.addf %120, %122 : vector<2x32xf32>
    %124 = math.tanh %123 : vector<2x32xf32>
    %cst_44 = arith.constant 1.000000e+00 : f32
    %125 = vector.broadcast %cst_44 : f32 to vector<2x32xf32>
    %126 = arith.subf %125, %119 : vector<2x32xf32>
    %127 = arith.mulf %126, %124 : vector<2x32xf32>
    %128 = arith.mulf %119, %81 : vector<2x32xf32>
    %129 = arith.addf %127, %128 : vector<2x32xf32>
    %130 = vector.extract_strided_slice %16 {offsets = [4, 0], sizes = [2, 96], strides = [1, 1]} : vector<16x96xf32> to vector<2x96xf32>
    %cst_45 = arith.constant dense<0.000000e+00> : vector<2x96xf32>
    %131 = tpu.matmul %105, %25, %cst_45 {dimension_numbers = #tpu.dot_dimension_numbers<[1], [0], [0], [1], [0, 0, 1, 1], [], []>} : vector<2x32xf32>, vector<32x96xf32>, vector<2x96xf32> -> vector<2x96xf32>
    %132 = vector.broadcast %27 : vector<1x96xf32> to vector<2x96xf32>
    %133 = arith.addf %131, %132 : vector<2x96xf32>
    %134 = vector.extract_strided_slice %130 {offsets = [0, 0], sizes = [2, 64], strides = [1, 1]} : vector<2x96xf32> to vector<2x64xf32>
    %135 = vector.extract_strided_slice %133 {offsets = [0, 0], sizes = [2, 64], strides = [1, 1]} : vector<2x96xf32> to vector<2x64xf32>
    %136 = arith.addf %134, %135 : vector<2x64xf32>
    %137 = arith.negf %136 : vector<2x64xf32>
    %138 = math.exp %137 : vector<2x64xf32>
    %cst_46 = arith.constant 1.000000e+00 : f32
    %139 = vector.broadcast %cst_46 : f32 to vector<2x64xf32>
    %140 = arith.addf %139, %138 : vector<2x64xf32>
    %141 = arith.divf %139, %140 : vector<2x64xf32>
    %142 = vector.extract_strided_slice %141 {offsets = [0, 0], sizes = [2, 32], strides = [1, 1]} : vector<2x64xf32> to vector<2x32xf32>
    %143 = vector.extract_strided_slice %141 {offsets = [0, 32], sizes = [2, 32], strides = [1, 1]} : vector<2x64xf32> to vector<2x32xf32>
    %144 = vector.extract_strided_slice %130 {offsets = [0, 64], sizes = [2, 32], strides = [1, 1]} : vector<2x96xf32> to vector<2x32xf32>
    %145 = vector.extract_strided_slice %133 {offsets = [0, 64], sizes = [2, 32], strides = [1, 1]} : vector<2x96xf32> to vector<2x32xf32>
    %146 = arith.mulf %142, %145 : vector<2x32xf32>
    %147 = arith.addf %144, %146 : vector<2x32xf32>
    %148 = math.tanh %147 : vector<2x32xf32>
    %cst_47 = arith.constant 1.000000e+00 : f32
    %149 = vector.broadcast %cst_47 : f32 to vector<2x32xf32>
    %150 = arith.subf %149, %143 : vector<2x32xf32>
    %151 = arith.mulf %150, %148 : vector<2x32xf32>
    %152 = arith.mulf %143, %105 : vector<2x32xf32>
    %153 = arith.addf %151, %152 : vector<2x32xf32>
    %154 = vector.extract_strided_slice %23 {offsets = [10, 0], sizes = [2, 96], strides = [1, 1]} : vector<16x96xf32> to vector<2x96xf32>
    %cst_48 = arith.constant dense<0.000000e+00> : vector<2x96xf32>
    %155 = tpu.matmul %129, %29, %cst_48 {dimension_numbers = #tpu.dot_dimension_numbers<[1], [0], [0], [1], [0, 0, 1, 1], [], []>} : vector<2x32xf32>, vector<32x96xf32>, vector<2x96xf32> -> vector<2x96xf32>
    %156 = vector.broadcast %31 : vector<1x96xf32> to vector<2x96xf32>
    %157 = arith.addf %155, %156 : vector<2x96xf32>
    %158 = vector.extract_strided_slice %154 {offsets = [0, 0], sizes = [2, 64], strides = [1, 1]} : vector<2x96xf32> to vector<2x64xf32>
    %159 = vector.extract_strided_slice %157 {offsets = [0, 0], sizes = [2, 64], strides = [1, 1]} : vector<2x96xf32> to vector<2x64xf32>
    %160 = arith.addf %158, %159 : vector<2x64xf32>
    %161 = arith.negf %160 : vector<2x64xf32>
    %162 = math.exp %161 : vector<2x64xf32>
    %cst_49 = arith.constant 1.000000e+00 : f32
    %163 = vector.broadcast %cst_49 : f32 to vector<2x64xf32>
    %164 = arith.addf %163, %162 : vector<2x64xf32>
    %165 = arith.divf %163, %164 : vector<2x64xf32>
    %166 = vector.extract_strided_slice %165 {offsets = [0, 0], sizes = [2, 32], strides = [1, 1]} : vector<2x64xf32> to vector<2x32xf32>
    %167 = vector.extract_strided_slice %165 {offsets = [0, 32], sizes = [2, 32], strides = [1, 1]} : vector<2x64xf32> to vector<2x32xf32>
    %168 = vector.extract_strided_slice %154 {offsets = [0, 64], sizes = [2, 32], strides = [1, 1]} : vector<2x96xf32> to vector<2x32xf32>
    %169 = vector.extract_strided_slice %157 {offsets = [0, 64], sizes = [2, 32], strides = [1, 1]} : vector<2x96xf32> to vector<2x32xf32>
    %170 = arith.mulf %166, %169 : vector<2x32xf32>
    %171 = arith.addf %168, %170 : vector<2x32xf32>
    %172 = math.tanh %171 : vector<2x32xf32>
    %cst_50 = arith.constant 1.000000e+00 : f32
    %173 = vector.broadcast %cst_50 : f32 to vector<2x32xf32>
    %174 = arith.subf %173, %167 : vector<2x32xf32>
    %175 = arith.mulf %174, %172 : vector<2x32xf32>
    %176 = arith.mulf %167, %129 : vector<2x32xf32>
    %177 = arith.addf %175, %176 : vector<2x32xf32>
    %178 = vector.extract_strided_slice %16 {offsets = [6, 0], sizes = [2, 96], strides = [1, 1]} : vector<16x96xf32> to vector<2x96xf32>
    %cst_51 = arith.constant dense<0.000000e+00> : vector<2x96xf32>
    %179 = tpu.matmul %153, %25, %cst_51 {dimension_numbers = #tpu.dot_dimension_numbers<[1], [0], [0], [1], [0, 0, 1, 1], [], []>} : vector<2x32xf32>, vector<32x96xf32>, vector<2x96xf32> -> vector<2x96xf32>
    %180 = vector.broadcast %27 : vector<1x96xf32> to vector<2x96xf32>
    %181 = arith.addf %179, %180 : vector<2x96xf32>
    %182 = vector.extract_strided_slice %178 {offsets = [0, 0], sizes = [2, 64], strides = [1, 1]} : vector<2x96xf32> to vector<2x64xf32>
    %183 = vector.extract_strided_slice %181 {offsets = [0, 0], sizes = [2, 64], strides = [1, 1]} : vector<2x96xf32> to vector<2x64xf32>
    %184 = arith.addf %182, %183 : vector<2x64xf32>
    %185 = arith.negf %184 : vector<2x64xf32>
    %186 = math.exp %185 : vector<2x64xf32>
    %cst_52 = arith.constant 1.000000e+00 : f32
    %187 = vector.broadcast %cst_52 : f32 to vector<2x64xf32>
    %188 = arith.addf %187, %186 : vector<2x64xf32>
    %189 = arith.divf %187, %188 : vector<2x64xf32>
    %190 = vector.extract_strided_slice %189 {offsets = [0, 0], sizes = [2, 32], strides = [1, 1]} : vector<2x64xf32> to vector<2x32xf32>
    %191 = vector.extract_strided_slice %189 {offsets = [0, 32], sizes = [2, 32], strides = [1, 1]} : vector<2x64xf32> to vector<2x32xf32>
    %192 = vector.extract_strided_slice %178 {offsets = [0, 64], sizes = [2, 32], strides = [1, 1]} : vector<2x96xf32> to vector<2x32xf32>
    %193 = vector.extract_strided_slice %181 {offsets = [0, 64], sizes = [2, 32], strides = [1, 1]} : vector<2x96xf32> to vector<2x32xf32>
    %194 = arith.mulf %190, %193 : vector<2x32xf32>
    %195 = arith.addf %192, %194 : vector<2x32xf32>
    %196 = math.tanh %195 : vector<2x32xf32>
    %cst_53 = arith.constant 1.000000e+00 : f32
    %197 = vector.broadcast %cst_53 : f32 to vector<2x32xf32>
    %198 = arith.subf %197, %191 : vector<2x32xf32>
    %199 = arith.mulf %198, %196 : vector<2x32xf32>
    %200 = arith.mulf %191, %153 : vector<2x32xf32>
    %201 = arith.addf %199, %200 : vector<2x32xf32>
    %202 = vector.extract_strided_slice %23 {offsets = [8, 0], sizes = [2, 96], strides = [1, 1]} : vector<16x96xf32> to vector<2x96xf32>
    %cst_54 = arith.constant dense<0.000000e+00> : vector<2x96xf32>
    %203 = tpu.matmul %177, %29, %cst_54 {dimension_numbers = #tpu.dot_dimension_numbers<[1], [0], [0], [1], [0, 0, 1, 1], [], []>} : vector<2x32xf32>, vector<32x96xf32>, vector<2x96xf32> -> vector<2x96xf32>
    %204 = vector.broadcast %31 : vector<1x96xf32> to vector<2x96xf32>
    %205 = arith.addf %203, %204 : vector<2x96xf32>
    %206 = vector.extract_strided_slice %202 {offsets = [0, 0], sizes = [2, 64], strides = [1, 1]} : vector<2x96xf32> to vector<2x64xf32>
    %207 = vector.extract_strided_slice %205 {offsets = [0, 0], sizes = [2, 64], strides = [1, 1]} : vector<2x96xf32> to vector<2x64xf32>
    %208 = arith.addf %206, %207 : vector<2x64xf32>
    %209 = arith.negf %208 : vector<2x64xf32>
    %210 = math.exp %209 : vector<2x64xf32>
    %cst_55 = arith.constant 1.000000e+00 : f32
    %211 = vector.broadcast %cst_55 : f32 to vector<2x64xf32>
    %212 = arith.addf %211, %210 : vector<2x64xf32>
    %213 = arith.divf %211, %212 : vector<2x64xf32>
    %214 = vector.extract_strided_slice %213 {offsets = [0, 0], sizes = [2, 32], strides = [1, 1]} : vector<2x64xf32> to vector<2x32xf32>
    %215 = vector.extract_strided_slice %213 {offsets = [0, 32], sizes = [2, 32], strides = [1, 1]} : vector<2x64xf32> to vector<2x32xf32>
    %216 = vector.extract_strided_slice %202 {offsets = [0, 64], sizes = [2, 32], strides = [1, 1]} : vector<2x96xf32> to vector<2x32xf32>
    %217 = vector.extract_strided_slice %205 {offsets = [0, 64], sizes = [2, 32], strides = [1, 1]} : vector<2x96xf32> to vector<2x32xf32>
    %218 = arith.mulf %214, %217 : vector<2x32xf32>
    %219 = arith.addf %216, %218 : vector<2x32xf32>
    %220 = math.tanh %219 : vector<2x32xf32>
    %cst_56 = arith.constant 1.000000e+00 : f32
    %221 = vector.broadcast %cst_56 : f32 to vector<2x32xf32>
    %222 = arith.subf %221, %215 : vector<2x32xf32>
    %223 = arith.mulf %222, %220 : vector<2x32xf32>
    %224 = arith.mulf %215, %177 : vector<2x32xf32>
    %225 = arith.addf %223, %224 : vector<2x32xf32>
    %226 = vector.extract_strided_slice %16 {offsets = [8, 0], sizes = [2, 96], strides = [1, 1]} : vector<16x96xf32> to vector<2x96xf32>
    %cst_57 = arith.constant dense<0.000000e+00> : vector<2x96xf32>
    %227 = tpu.matmul %201, %25, %cst_57 {dimension_numbers = #tpu.dot_dimension_numbers<[1], [0], [0], [1], [0, 0, 1, 1], [], []>} : vector<2x32xf32>, vector<32x96xf32>, vector<2x96xf32> -> vector<2x96xf32>
    %228 = vector.broadcast %27 : vector<1x96xf32> to vector<2x96xf32>
    %229 = arith.addf %227, %228 : vector<2x96xf32>
    %230 = vector.extract_strided_slice %226 {offsets = [0, 0], sizes = [2, 64], strides = [1, 1]} : vector<2x96xf32> to vector<2x64xf32>
    %231 = vector.extract_strided_slice %229 {offsets = [0, 0], sizes = [2, 64], strides = [1, 1]} : vector<2x96xf32> to vector<2x64xf32>
    %232 = arith.addf %230, %231 : vector<2x64xf32>
    %233 = arith.negf %232 : vector<2x64xf32>
    %234 = math.exp %233 : vector<2x64xf32>
    %cst_58 = arith.constant 1.000000e+00 : f32
    %235 = vector.broadcast %cst_58 : f32 to vector<2x64xf32>
    %236 = arith.addf %235, %234 : vector<2x64xf32>
    %237 = arith.divf %235, %236 : vector<2x64xf32>
    %238 = vector.extract_strided_slice %237 {offsets = [0, 0], sizes = [2, 32], strides = [1, 1]} : vector<2x64xf32> to vector<2x32xf32>
    %239 = vector.extract_strided_slice %237 {offsets = [0, 32], sizes = [2, 32], strides = [1, 1]} : vector<2x64xf32> to vector<2x32xf32>
    %240 = vector.extract_strided_slice %226 {offsets = [0, 64], sizes = [2, 32], strides = [1, 1]} : vector<2x96xf32> to vector<2x32xf32>
    %241 = vector.extract_strided_slice %229 {offsets = [0, 64], sizes = [2, 32], strides = [1, 1]} : vector<2x96xf32> to vector<2x32xf32>
    %242 = arith.mulf %238, %241 : vector<2x32xf32>
    %243 = arith.addf %240, %242 : vector<2x32xf32>
    %244 = math.tanh %243 : vector<2x32xf32>
    %cst_59 = arith.constant 1.000000e+00 : f32
    %245 = vector.broadcast %cst_59 : f32 to vector<2x32xf32>
    %246 = arith.subf %245, %239 : vector<2x32xf32>
    %247 = arith.mulf %246, %244 : vector<2x32xf32>
    %248 = arith.mulf %239, %201 : vector<2x32xf32>
    %249 = arith.addf %247, %248 : vector<2x32xf32>
    %250 = vector.extract_strided_slice %23 {offsets = [6, 0], sizes = [2, 96], strides = [1, 1]} : vector<16x96xf32> to vector<2x96xf32>
    %cst_60 = arith.constant dense<0.000000e+00> : vector<2x96xf32>
    %251 = tpu.matmul %225, %29, %cst_60 {dimension_numbers = #tpu.dot_dimension_numbers<[1], [0], [0], [1], [0, 0, 1, 1], [], []>} : vector<2x32xf32>, vector<32x96xf32>, vector<2x96xf32> -> vector<2x96xf32>
    %252 = vector.broadcast %31 : vector<1x96xf32> to vector<2x96xf32>
    %253 = arith.addf %251, %252 : vector<2x96xf32>
    %254 = vector.extract_strided_slice %250 {offsets = [0, 0], sizes = [2, 64], strides = [1, 1]} : vector<2x96xf32> to vector<2x64xf32>
    %255 = vector.extract_strided_slice %253 {offsets = [0, 0], sizes = [2, 64], strides = [1, 1]} : vector<2x96xf32> to vector<2x64xf32>
    %256 = arith.addf %254, %255 : vector<2x64xf32>
    %257 = arith.negf %256 : vector<2x64xf32>
    %258 = math.exp %257 : vector<2x64xf32>
    %cst_61 = arith.constant 1.000000e+00 : f32
    %259 = vector.broadcast %cst_61 : f32 to vector<2x64xf32>
    %260 = arith.addf %259, %258 : vector<2x64xf32>
    %261 = arith.divf %259, %260 : vector<2x64xf32>
    %262 = vector.extract_strided_slice %261 {offsets = [0, 0], sizes = [2, 32], strides = [1, 1]} : vector<2x64xf32> to vector<2x32xf32>
    %263 = vector.extract_strided_slice %261 {offsets = [0, 32], sizes = [2, 32], strides = [1, 1]} : vector<2x64xf32> to vector<2x32xf32>
    %264 = vector.extract_strided_slice %250 {offsets = [0, 64], sizes = [2, 32], strides = [1, 1]} : vector<2x96xf32> to vector<2x32xf32>
    %265 = vector.extract_strided_slice %253 {offsets = [0, 64], sizes = [2, 32], strides = [1, 1]} : vector<2x96xf32> to vector<2x32xf32>
    %266 = arith.mulf %262, %265 : vector<2x32xf32>
    %267 = arith.addf %264, %266 : vector<2x32xf32>
    %268 = math.tanh %267 : vector<2x32xf32>
    %cst_62 = arith.constant 1.000000e+00 : f32
    %269 = vector.broadcast %cst_62 : f32 to vector<2x32xf32>
    %270 = arith.subf %269, %263 : vector<2x32xf32>
    %271 = arith.mulf %270, %268 : vector<2x32xf32>
    %272 = arith.mulf %263, %225 : vector<2x32xf32>
    %273 = arith.addf %271, %272 : vector<2x32xf32>
    %274 = vector.extract_strided_slice %16 {offsets = [10, 0], sizes = [2, 96], strides = [1, 1]} : vector<16x96xf32> to vector<2x96xf32>
    %cst_63 = arith.constant dense<0.000000e+00> : vector<2x96xf32>
    %275 = tpu.matmul %249, %25, %cst_63 {dimension_numbers = #tpu.dot_dimension_numbers<[1], [0], [0], [1], [0, 0, 1, 1], [], []>} : vector<2x32xf32>, vector<32x96xf32>, vector<2x96xf32> -> vector<2x96xf32>
    %276 = vector.broadcast %27 : vector<1x96xf32> to vector<2x96xf32>
    %277 = arith.addf %275, %276 : vector<2x96xf32>
    %278 = vector.extract_strided_slice %274 {offsets = [0, 0], sizes = [2, 64], strides = [1, 1]} : vector<2x96xf32> to vector<2x64xf32>
    %279 = vector.extract_strided_slice %277 {offsets = [0, 0], sizes = [2, 64], strides = [1, 1]} : vector<2x96xf32> to vector<2x64xf32>
    %280 = arith.addf %278, %279 : vector<2x64xf32>
    %281 = arith.negf %280 : vector<2x64xf32>
    %282 = math.exp %281 : vector<2x64xf32>
    %cst_64 = arith.constant 1.000000e+00 : f32
    %283 = vector.broadcast %cst_64 : f32 to vector<2x64xf32>
    %284 = arith.addf %283, %282 : vector<2x64xf32>
    %285 = arith.divf %283, %284 : vector<2x64xf32>
    %286 = vector.extract_strided_slice %285 {offsets = [0, 0], sizes = [2, 32], strides = [1, 1]} : vector<2x64xf32> to vector<2x32xf32>
    %287 = vector.extract_strided_slice %285 {offsets = [0, 32], sizes = [2, 32], strides = [1, 1]} : vector<2x64xf32> to vector<2x32xf32>
    %288 = vector.extract_strided_slice %274 {offsets = [0, 64], sizes = [2, 32], strides = [1, 1]} : vector<2x96xf32> to vector<2x32xf32>
    %289 = vector.extract_strided_slice %277 {offsets = [0, 64], sizes = [2, 32], strides = [1, 1]} : vector<2x96xf32> to vector<2x32xf32>
    %290 = arith.mulf %286, %289 : vector<2x32xf32>
    %291 = arith.addf %288, %290 : vector<2x32xf32>
    %292 = math.tanh %291 : vector<2x32xf32>
    %cst_65 = arith.constant 1.000000e+00 : f32
    %293 = vector.broadcast %cst_65 : f32 to vector<2x32xf32>
    %294 = arith.subf %293, %287 : vector<2x32xf32>
    %295 = arith.mulf %294, %292 : vector<2x32xf32>
    %296 = arith.mulf %287, %249 : vector<2x32xf32>
    %297 = arith.addf %295, %296 : vector<2x32xf32>
    %298 = vector.extract_strided_slice %23 {offsets = [4, 0], sizes = [2, 96], strides = [1, 1]} : vector<16x96xf32> to vector<2x96xf32>
    %cst_66 = arith.constant dense<0.000000e+00> : vector<2x96xf32>
    %299 = tpu.matmul %273, %29, %cst_66 {dimension_numbers = #tpu.dot_dimension_numbers<[1], [0], [0], [1], [0, 0, 1, 1], [], []>} : vector<2x32xf32>, vector<32x96xf32>, vector<2x96xf32> -> vector<2x96xf32>
    %300 = vector.broadcast %31 : vector<1x96xf32> to vector<2x96xf32>
    %301 = arith.addf %299, %300 : vector<2x96xf32>
    %302 = vector.extract_strided_slice %298 {offsets = [0, 0], sizes = [2, 64], strides = [1, 1]} : vector<2x96xf32> to vector<2x64xf32>
    %303 = vector.extract_strided_slice %301 {offsets = [0, 0], sizes = [2, 64], strides = [1, 1]} : vector<2x96xf32> to vector<2x64xf32>
    %304 = arith.addf %302, %303 : vector<2x64xf32>
    %305 = arith.negf %304 : vector<2x64xf32>
    %306 = math.exp %305 : vector<2x64xf32>
    %cst_67 = arith.constant 1.000000e+00 : f32
    %307 = vector.broadcast %cst_67 : f32 to vector<2x64xf32>
    %308 = arith.addf %307, %306 : vector<2x64xf32>
    %309 = arith.divf %307, %308 : vector<2x64xf32>
    %310 = vector.extract_strided_slice %309 {offsets = [0, 0], sizes = [2, 32], strides = [1, 1]} : vector<2x64xf32> to vector<2x32xf32>
    %311 = vector.extract_strided_slice %309 {offsets = [0, 32], sizes = [2, 32], strides = [1, 1]} : vector<2x64xf32> to vector<2x32xf32>
    %312 = vector.extract_strided_slice %298 {offsets = [0, 64], sizes = [2, 32], strides = [1, 1]} : vector<2x96xf32> to vector<2x32xf32>
    %313 = vector.extract_strided_slice %301 {offsets = [0, 64], sizes = [2, 32], strides = [1, 1]} : vector<2x96xf32> to vector<2x32xf32>
    %314 = arith.mulf %310, %313 : vector<2x32xf32>
    %315 = arith.addf %312, %314 : vector<2x32xf32>
    %316 = math.tanh %315 : vector<2x32xf32>
    %cst_68 = arith.constant 1.000000e+00 : f32
    %317 = vector.broadcast %cst_68 : f32 to vector<2x32xf32>
    %318 = arith.subf %317, %311 : vector<2x32xf32>
    %319 = arith.mulf %318, %316 : vector<2x32xf32>
    %320 = arith.mulf %311, %273 : vector<2x32xf32>
    %321 = arith.addf %319, %320 : vector<2x32xf32>
    %322 = vector.extract_strided_slice %16 {offsets = [12, 0], sizes = [2, 96], strides = [1, 1]} : vector<16x96xf32> to vector<2x96xf32>
    %cst_69 = arith.constant dense<0.000000e+00> : vector<2x96xf32>
    %323 = tpu.matmul %297, %25, %cst_69 {dimension_numbers = #tpu.dot_dimension_numbers<[1], [0], [0], [1], [0, 0, 1, 1], [], []>} : vector<2x32xf32>, vector<32x96xf32>, vector<2x96xf32> -> vector<2x96xf32>
    %324 = vector.broadcast %27 : vector<1x96xf32> to vector<2x96xf32>
    %325 = arith.addf %323, %324 : vector<2x96xf32>
    %326 = vector.extract_strided_slice %322 {offsets = [0, 0], sizes = [2, 64], strides = [1, 1]} : vector<2x96xf32> to vector<2x64xf32>
    %327 = vector.extract_strided_slice %325 {offsets = [0, 0], sizes = [2, 64], strides = [1, 1]} : vector<2x96xf32> to vector<2x64xf32>
    %328 = arith.addf %326, %327 : vector<2x64xf32>
    %329 = arith.negf %328 : vector<2x64xf32>
    %330 = math.exp %329 : vector<2x64xf32>
    %cst_70 = arith.constant 1.000000e+00 : f32
    %331 = vector.broadcast %cst_70 : f32 to vector<2x64xf32>
    %332 = arith.addf %331, %330 : vector<2x64xf32>
    %333 = arith.divf %331, %332 : vector<2x64xf32>
    %334 = vector.extract_strided_slice %333 {offsets = [0, 0], sizes = [2, 32], strides = [1, 1]} : vector<2x64xf32> to vector<2x32xf32>
    %335 = vector.extract_strided_slice %333 {offsets = [0, 32], sizes = [2, 32], strides = [1, 1]} : vector<2x64xf32> to vector<2x32xf32>
    %336 = vector.extract_strided_slice %322 {offsets = [0, 64], sizes = [2, 32], strides = [1, 1]} : vector<2x96xf32> to vector<2x32xf32>
    %337 = vector.extract_strided_slice %325 {offsets = [0, 64], sizes = [2, 32], strides = [1, 1]} : vector<2x96xf32> to vector<2x32xf32>
    %338 = arith.mulf %334, %337 : vector<2x32xf32>
    %339 = arith.addf %336, %338 : vector<2x32xf32>
    %340 = math.tanh %339 : vector<2x32xf32>
    %cst_71 = arith.constant 1.000000e+00 : f32
    %341 = vector.broadcast %cst_71 : f32 to vector<2x32xf32>
    %342 = arith.subf %341, %335 : vector<2x32xf32>
    %343 = arith.mulf %342, %340 : vector<2x32xf32>
    %344 = arith.mulf %335, %297 : vector<2x32xf32>
    %345 = arith.addf %343, %344 : vector<2x32xf32>
    %346 = vector.extract_strided_slice %23 {offsets = [2, 0], sizes = [2, 96], strides = [1, 1]} : vector<16x96xf32> to vector<2x96xf32>
    %cst_72 = arith.constant dense<0.000000e+00> : vector<2x96xf32>
    %347 = tpu.matmul %321, %29, %cst_72 {dimension_numbers = #tpu.dot_dimension_numbers<[1], [0], [0], [1], [0, 0, 1, 1], [], []>} : vector<2x32xf32>, vector<32x96xf32>, vector<2x96xf32> -> vector<2x96xf32>
    %348 = vector.broadcast %31 : vector<1x96xf32> to vector<2x96xf32>
    %349 = arith.addf %347, %348 : vector<2x96xf32>
    %350 = vector.extract_strided_slice %346 {offsets = [0, 0], sizes = [2, 64], strides = [1, 1]} : vector<2x96xf32> to vector<2x64xf32>
    %351 = vector.extract_strided_slice %349 {offsets = [0, 0], sizes = [2, 64], strides = [1, 1]} : vector<2x96xf32> to vector<2x64xf32>
    %352 = arith.addf %350, %351 : vector<2x64xf32>
    %353 = arith.negf %352 : vector<2x64xf32>
    %354 = math.exp %353 : vector<2x64xf32>
    %cst_73 = arith.constant 1.000000e+00 : f32
    %355 = vector.broadcast %cst_73 : f32 to vector<2x64xf32>
    %356 = arith.addf %355, %354 : vector<2x64xf32>
    %357 = arith.divf %355, %356 : vector<2x64xf32>
    %358 = vector.extract_strided_slice %357 {offsets = [0, 0], sizes = [2, 32], strides = [1, 1]} : vector<2x64xf32> to vector<2x32xf32>
    %359 = vector.extract_strided_slice %357 {offsets = [0, 32], sizes = [2, 32], strides = [1, 1]} : vector<2x64xf32> to vector<2x32xf32>
    %360 = vector.extract_strided_slice %346 {offsets = [0, 64], sizes = [2, 32], strides = [1, 1]} : vector<2x96xf32> to vector<2x32xf32>
    %361 = vector.extract_strided_slice %349 {offsets = [0, 64], sizes = [2, 32], strides = [1, 1]} : vector<2x96xf32> to vector<2x32xf32>
    %362 = arith.mulf %358, %361 : vector<2x32xf32>
    %363 = arith.addf %360, %362 : vector<2x32xf32>
    %364 = math.tanh %363 : vector<2x32xf32>
    %cst_74 = arith.constant 1.000000e+00 : f32
    %365 = vector.broadcast %cst_74 : f32 to vector<2x32xf32>
    %366 = arith.subf %365, %359 : vector<2x32xf32>
    %367 = arith.mulf %366, %364 : vector<2x32xf32>
    %368 = arith.mulf %359, %321 : vector<2x32xf32>
    %369 = arith.addf %367, %368 : vector<2x32xf32>
    %370 = vector.extract_strided_slice %16 {offsets = [14, 0], sizes = [2, 96], strides = [1, 1]} : vector<16x96xf32> to vector<2x96xf32>
    %cst_75 = arith.constant dense<0.000000e+00> : vector<2x96xf32>
    %371 = tpu.matmul %345, %25, %cst_75 {dimension_numbers = #tpu.dot_dimension_numbers<[1], [0], [0], [1], [0, 0, 1, 1], [], []>} : vector<2x32xf32>, vector<32x96xf32>, vector<2x96xf32> -> vector<2x96xf32>
    %372 = vector.broadcast %27 : vector<1x96xf32> to vector<2x96xf32>
    %373 = arith.addf %371, %372 : vector<2x96xf32>
    %374 = vector.extract_strided_slice %370 {offsets = [0, 0], sizes = [2, 64], strides = [1, 1]} : vector<2x96xf32> to vector<2x64xf32>
    %375 = vector.extract_strided_slice %373 {offsets = [0, 0], sizes = [2, 64], strides = [1, 1]} : vector<2x96xf32> to vector<2x64xf32>
    %376 = arith.addf %374, %375 : vector<2x64xf32>
    %377 = arith.negf %376 : vector<2x64xf32>
    %378 = math.exp %377 : vector<2x64xf32>
    %cst_76 = arith.constant 1.000000e+00 : f32
    %379 = vector.broadcast %cst_76 : f32 to vector<2x64xf32>
    %380 = arith.addf %379, %378 : vector<2x64xf32>
    %381 = arith.divf %379, %380 : vector<2x64xf32>
    %382 = vector.extract_strided_slice %381 {offsets = [0, 0], sizes = [2, 32], strides = [1, 1]} : vector<2x64xf32> to vector<2x32xf32>
    %383 = vector.extract_strided_slice %381 {offsets = [0, 32], sizes = [2, 32], strides = [1, 1]} : vector<2x64xf32> to vector<2x32xf32>
    %384 = vector.extract_strided_slice %370 {offsets = [0, 64], sizes = [2, 32], strides = [1, 1]} : vector<2x96xf32> to vector<2x32xf32>
    %385 = vector.extract_strided_slice %373 {offsets = [0, 64], sizes = [2, 32], strides = [1, 1]} : vector<2x96xf32> to vector<2x32xf32>
    %386 = arith.mulf %382, %385 : vector<2x32xf32>
    %387 = arith.addf %384, %386 : vector<2x32xf32>
    %388 = math.tanh %387 : vector<2x32xf32>
    %cst_77 = arith.constant 1.000000e+00 : f32
    %389 = vector.broadcast %cst_77 : f32 to vector<2x32xf32>
    %390 = arith.subf %389, %383 : vector<2x32xf32>
    %391 = arith.mulf %390, %388 : vector<2x32xf32>
    %392 = arith.mulf %383, %345 : vector<2x32xf32>
    %393 = arith.addf %391, %392 : vector<2x32xf32>
    %394 = vector.extract_strided_slice %23 {offsets = [0, 0], sizes = [2, 96], strides = [1, 1]} : vector<16x96xf32> to vector<2x96xf32>
    %cst_78 = arith.constant dense<0.000000e+00> : vector<2x96xf32>
    %395 = tpu.matmul %369, %29, %cst_78 {dimension_numbers = #tpu.dot_dimension_numbers<[1], [0], [0], [1], [0, 0, 1, 1], [], []>} : vector<2x32xf32>, vector<32x96xf32>, vector<2x96xf32> -> vector<2x96xf32>
    %396 = vector.broadcast %31 : vector<1x96xf32> to vector<2x96xf32>
    %397 = arith.addf %395, %396 : vector<2x96xf32>
    %398 = vector.extract_strided_slice %394 {offsets = [0, 0], sizes = [2, 64], strides = [1, 1]} : vector<2x96xf32> to vector<2x64xf32>
    %399 = vector.extract_strided_slice %397 {offsets = [0, 0], sizes = [2, 64], strides = [1, 1]} : vector<2x96xf32> to vector<2x64xf32>
    %400 = arith.addf %398, %399 : vector<2x64xf32>
    %401 = arith.negf %400 : vector<2x64xf32>
    %402 = math.exp %401 : vector<2x64xf32>
    %cst_79 = arith.constant 1.000000e+00 : f32
    %403 = vector.broadcast %cst_79 : f32 to vector<2x64xf32>
    %404 = arith.addf %403, %402 : vector<2x64xf32>
    %405 = arith.divf %403, %404 : vector<2x64xf32>
    %406 = vector.extract_strided_slice %405 {offsets = [0, 0], sizes = [2, 32], strides = [1, 1]} : vector<2x64xf32> to vector<2x32xf32>
    %407 = vector.extract_strided_slice %405 {offsets = [0, 32], sizes = [2, 32], strides = [1, 1]} : vector<2x64xf32> to vector<2x32xf32>
    %408 = vector.extract_strided_slice %394 {offsets = [0, 64], sizes = [2, 32], strides = [1, 1]} : vector<2x96xf32> to vector<2x32xf32>
    %409 = vector.extract_strided_slice %397 {offsets = [0, 64], sizes = [2, 32], strides = [1, 1]} : vector<2x96xf32> to vector<2x32xf32>
    %410 = arith.mulf %406, %409 : vector<2x32xf32>
    %411 = arith.addf %408, %410 : vector<2x32xf32>
    %412 = math.tanh %411 : vector<2x32xf32>
    %cst_80 = arith.constant 1.000000e+00 : f32
    %413 = vector.broadcast %cst_80 : f32 to vector<2x32xf32>
    %414 = arith.subf %413, %407 : vector<2x32xf32>
    %415 = arith.mulf %414, %412 : vector<2x32xf32>
    %416 = arith.mulf %407, %369 : vector<2x32xf32>
    %417 = arith.addf %415, %416 : vector<2x32xf32>
    %418 = tpu.concatenate %57, %105, %153, %201, %249, %297, %345, %393 in 0 : vector<2x32xf32>, vector<2x32xf32>, vector<2x32xf32>, vector<2x32xf32>, vector<2x32xf32>, vector<2x32xf32>, vector<2x32xf32>, vector<2x32xf32> -> vector<16x32xf32>
    %419 = tpu.concatenate %417, %369, %321, %273, %225, %177, %129, %81 in 0 : vector<2x32xf32>, vector<2x32xf32>, vector<2x32xf32>, vector<2x32xf32>, vector<2x32xf32>, vector<2x32xf32>, vector<2x32xf32>, vector<2x32xf32> -> vector<16x32xf32>
    %420 = tpu.concatenate %418, %419 in 1 : vector<16x32xf32>, vector<16x32xf32> -> vector<16x64xf32>
    %c0_81 = arith.constant 0 : index
    %c0_82 = arith.constant 0 : index
    %c0_83 = arith.constant 0 : index
    %421 = vector.load %arg8[%c0_81, %c0_82, %c0_83] : memref<2x64x96xf32, #tpu.memory_space<vmem>>, vector<1x64x96xf32>
    %422 = vector.shape_cast %421 : vector<1x64x96xf32> to vector<64x96xf32>
    %cst_84 = arith.constant dense<0.000000e+00> : vector<16x96xf32>
    %423 = tpu.matmul %420, %422, %cst_84 {dimension_numbers = #tpu.dot_dimension_numbers<[1], [0], [0], [1], [0, 0, 1, 1], [], []>} : vector<16x64xf32>, vector<64x96xf32>, vector<16x96xf32> -> vector<16x96xf32>
    %c0_85 = arith.constant 0 : index
    %c0_86 = arith.constant 0 : index
    %c0_87 = arith.constant 0 : index
    %424 = vector.load %arg10[%c0_85, %c0_86, %c0_87] : memref<2x1x96xf32, #tpu.memory_space<vmem>>, vector<1x1x96xf32>
    %425 = vector.shape_cast %424 : vector<1x1x96xf32> to vector<1x96xf32>
    %426 = vector.broadcast %425 : vector<1x96xf32> to vector<16x96xf32>
    %427 = arith.addf %423, %426 : vector<16x96xf32>
    %c1_88 = arith.constant 1 : index
    %c0_89 = arith.constant 0 : index
    %c0_90 = arith.constant 0 : index
    %428 = vector.load %arg8[%c1_88, %c0_89, %c0_90] : memref<2x64x96xf32, #tpu.memory_space<vmem>>, vector<1x64x96xf32>
    %429 = vector.shape_cast %428 : vector<1x64x96xf32> to vector<64x96xf32>
    %cst_91 = arith.constant dense<0.000000e+00> : vector<16x96xf32>
    %430 = tpu.matmul %420, %429, %cst_91 {dimension_numbers = #tpu.dot_dimension_numbers<[1], [0], [0], [1], [0, 0, 1, 1], [], []>} : vector<16x64xf32>, vector<64x96xf32>, vector<16x96xf32> -> vector<16x96xf32>
    %c1_92 = arith.constant 1 : index
    %c0_93 = arith.constant 0 : index
    %c0_94 = arith.constant 0 : index
    %431 = vector.load %arg10[%c1_92, %c0_93, %c0_94] : memref<2x1x96xf32, #tpu.memory_space<vmem>>, vector<1x1x96xf32>
    %432 = vector.shape_cast %431 : vector<1x1x96xf32> to vector<1x96xf32>
    %433 = vector.broadcast %432 : vector<1x96xf32> to vector<16x96xf32>
    %434 = arith.addf %430, %433 : vector<16x96xf32>
    %c0_95 = arith.constant 0 : index
    %c0_96 = arith.constant 0 : index
    %c0_97 = arith.constant 0 : index
    %435 = vector.load %arg9[%c0_95, %c0_96, %c0_97] : memref<2x32x96xf32, #tpu.memory_space<vmem>>, vector<1x32x96xf32>
    %436 = vector.shape_cast %435 : vector<1x32x96xf32> to vector<32x96xf32>
    %c0_98 = arith.constant 0 : index
    %c0_99 = arith.constant 0 : index
    %c0_100 = arith.constant 0 : index
    %437 = vector.load %arg11[%c0_98, %c0_99, %c0_100] : memref<2x1x96xf32, #tpu.memory_space<vmem>>, vector<1x1x96xf32>
    %438 = vector.shape_cast %437 : vector<1x1x96xf32> to vector<1x96xf32>
    %c1_101 = arith.constant 1 : index
    %c0_102 = arith.constant 0 : index
    %c0_103 = arith.constant 0 : index
    %439 = vector.load %arg9[%c1_101, %c0_102, %c0_103] : memref<2x32x96xf32, #tpu.memory_space<vmem>>, vector<1x32x96xf32>
    %440 = vector.shape_cast %439 : vector<1x32x96xf32> to vector<32x96xf32>
    %c1_104 = arith.constant 1 : index
    %c0_105 = arith.constant 0 : index
    %c0_106 = arith.constant 0 : index
    %441 = vector.load %arg11[%c1_104, %c0_105, %c0_106] : memref<2x1x96xf32, #tpu.memory_space<vmem>>, vector<1x1x96xf32>
    %442 = vector.shape_cast %441 : vector<1x1x96xf32> to vector<1x96xf32>
    %cst_107 = arith.constant 0.000000e+00 : f32
    %443 = vector.broadcast %cst_107 : f32 to vector<2x32xf32>
    %cst_108 = arith.constant 0.000000e+00 : f32
    %444 = vector.broadcast %cst_108 : f32 to vector<2x32xf32>
    %445 = vector.extract_strided_slice %427 {offsets = [0, 0], sizes = [2, 96], strides = [1, 1]} : vector<16x96xf32> to vector<2x96xf32>
    %cst_109 = arith.constant dense<0.000000e+00> : vector<2x96xf32>
    %446 = tpu.matmul %443, %436, %cst_109 {dimension_numbers = #tpu.dot_dimension_numbers<[1], [0], [0], [1], [0, 0, 1, 1], [], []>} : vector<2x32xf32>, vector<32x96xf32>, vector<2x96xf32> -> vector<2x96xf32>
    %447 = vector.broadcast %438 : vector<1x96xf32> to vector<2x96xf32>
    %448 = arith.addf %446, %447 : vector<2x96xf32>
    %449 = vector.extract_strided_slice %445 {offsets = [0, 0], sizes = [2, 64], strides = [1, 1]} : vector<2x96xf32> to vector<2x64xf32>
    %450 = vector.extract_strided_slice %448 {offsets = [0, 0], sizes = [2, 64], strides = [1, 1]} : vector<2x96xf32> to vector<2x64xf32>
    %451 = arith.addf %449, %450 : vector<2x64xf32>
    %452 = arith.negf %451 : vector<2x64xf32>
    %453 = math.exp %452 : vector<2x64xf32>
    %cst_110 = arith.constant 1.000000e+00 : f32
    %454 = vector.broadcast %cst_110 : f32 to vector<2x64xf32>
    %455 = arith.addf %454, %453 : vector<2x64xf32>
    %456 = arith.divf %454, %455 : vector<2x64xf32>
    %457 = vector.extract_strided_slice %456 {offsets = [0, 0], sizes = [2, 32], strides = [1, 1]} : vector<2x64xf32> to vector<2x32xf32>
    %458 = vector.extract_strided_slice %456 {offsets = [0, 32], sizes = [2, 32], strides = [1, 1]} : vector<2x64xf32> to vector<2x32xf32>
    %459 = vector.extract_strided_slice %445 {offsets = [0, 64], sizes = [2, 32], strides = [1, 1]} : vector<2x96xf32> to vector<2x32xf32>
    %460 = vector.extract_strided_slice %448 {offsets = [0, 64], sizes = [2, 32], strides = [1, 1]} : vector<2x96xf32> to vector<2x32xf32>
    %461 = arith.mulf %457, %460 : vector<2x32xf32>
    %462 = arith.addf %459, %461 : vector<2x32xf32>
    %463 = math.tanh %462 : vector<2x32xf32>
    %cst_111 = arith.constant 1.000000e+00 : f32
    %464 = vector.broadcast %cst_111 : f32 to vector<2x32xf32>
    %465 = arith.subf %464, %458 : vector<2x32xf32>
    %466 = arith.mulf %465, %463 : vector<2x32xf32>
    %467 = arith.mulf %458, %443 : vector<2x32xf32>
    %468 = arith.addf %466, %467 : vector<2x32xf32>
    %469 = vector.extract_strided_slice %434 {offsets = [14, 0], sizes = [2, 96], strides = [1, 1]} : vector<16x96xf32> to vector<2x96xf32>
    %cst_112 = arith.constant dense<0.000000e+00> : vector<2x96xf32>
    %470 = tpu.matmul %444, %440, %cst_112 {dimension_numbers = #tpu.dot_dimension_numbers<[1], [0], [0], [1], [0, 0, 1, 1], [], []>} : vector<2x32xf32>, vector<32x96xf32>, vector<2x96xf32> -> vector<2x96xf32>
    %471 = vector.broadcast %442 : vector<1x96xf32> to vector<2x96xf32>
    %472 = arith.addf %470, %471 : vector<2x96xf32>
    %473 = vector.extract_strided_slice %469 {offsets = [0, 0], sizes = [2, 64], strides = [1, 1]} : vector<2x96xf32> to vector<2x64xf32>
    %474 = vector.extract_strided_slice %472 {offsets = [0, 0], sizes = [2, 64], strides = [1, 1]} : vector<2x96xf32> to vector<2x64xf32>
    %475 = arith.addf %473, %474 : vector<2x64xf32>
    %476 = arith.negf %475 : vector<2x64xf32>
    %477 = math.exp %476 : vector<2x64xf32>
    %cst_113 = arith.constant 1.000000e+00 : f32
    %478 = vector.broadcast %cst_113 : f32 to vector<2x64xf32>
    %479 = arith.addf %478, %477 : vector<2x64xf32>
    %480 = arith.divf %478, %479 : vector<2x64xf32>
    %481 = vector.extract_strided_slice %480 {offsets = [0, 0], sizes = [2, 32], strides = [1, 1]} : vector<2x64xf32> to vector<2x32xf32>
    %482 = vector.extract_strided_slice %480 {offsets = [0, 32], sizes = [2, 32], strides = [1, 1]} : vector<2x64xf32> to vector<2x32xf32>
    %483 = vector.extract_strided_slice %469 {offsets = [0, 64], sizes = [2, 32], strides = [1, 1]} : vector<2x96xf32> to vector<2x32xf32>
    %484 = vector.extract_strided_slice %472 {offsets = [0, 64], sizes = [2, 32], strides = [1, 1]} : vector<2x96xf32> to vector<2x32xf32>
    %485 = arith.mulf %481, %484 : vector<2x32xf32>
    %486 = arith.addf %483, %485 : vector<2x32xf32>
    %487 = math.tanh %486 : vector<2x32xf32>
    %cst_114 = arith.constant 1.000000e+00 : f32
    %488 = vector.broadcast %cst_114 : f32 to vector<2x32xf32>
    %489 = arith.subf %488, %482 : vector<2x32xf32>
    %490 = arith.mulf %489, %487 : vector<2x32xf32>
    %491 = arith.mulf %482, %444 : vector<2x32xf32>
    %492 = arith.addf %490, %491 : vector<2x32xf32>
    %493 = vector.extract_strided_slice %427 {offsets = [2, 0], sizes = [2, 96], strides = [1, 1]} : vector<16x96xf32> to vector<2x96xf32>
    %cst_115 = arith.constant dense<0.000000e+00> : vector<2x96xf32>
    %494 = tpu.matmul %468, %436, %cst_115 {dimension_numbers = #tpu.dot_dimension_numbers<[1], [0], [0], [1], [0, 0, 1, 1], [], []>} : vector<2x32xf32>, vector<32x96xf32>, vector<2x96xf32> -> vector<2x96xf32>
    %495 = vector.broadcast %438 : vector<1x96xf32> to vector<2x96xf32>
    %496 = arith.addf %494, %495 : vector<2x96xf32>
    %497 = vector.extract_strided_slice %493 {offsets = [0, 0], sizes = [2, 64], strides = [1, 1]} : vector<2x96xf32> to vector<2x64xf32>
    %498 = vector.extract_strided_slice %496 {offsets = [0, 0], sizes = [2, 64], strides = [1, 1]} : vector<2x96xf32> to vector<2x64xf32>
    %499 = arith.addf %497, %498 : vector<2x64xf32>
    %500 = arith.negf %499 : vector<2x64xf32>
    %501 = math.exp %500 : vector<2x64xf32>
    %cst_116 = arith.constant 1.000000e+00 : f32
    %502 = vector.broadcast %cst_116 : f32 to vector<2x64xf32>
    %503 = arith.addf %502, %501 : vector<2x64xf32>
    %504 = arith.divf %502, %503 : vector<2x64xf32>
    %505 = vector.extract_strided_slice %504 {offsets = [0, 0], sizes = [2, 32], strides = [1, 1]} : vector<2x64xf32> to vector<2x32xf32>
    %506 = vector.extract_strided_slice %504 {offsets = [0, 32], sizes = [2, 32], strides = [1, 1]} : vector<2x64xf32> to vector<2x32xf32>
    %507 = vector.extract_strided_slice %493 {offsets = [0, 64], sizes = [2, 32], strides = [1, 1]} : vector<2x96xf32> to vector<2x32xf32>
    %508 = vector.extract_strided_slice %496 {offsets = [0, 64], sizes = [2, 32], strides = [1, 1]} : vector<2x96xf32> to vector<2x32xf32>
    %509 = arith.mulf %505, %508 : vector<2x32xf32>
    %510 = arith.addf %507, %509 : vector<2x32xf32>
    %511 = math.tanh %510 : vector<2x32xf32>
    %cst_117 = arith.constant 1.000000e+00 : f32
    %512 = vector.broadcast %cst_117 : f32 to vector<2x32xf32>
    %513 = arith.subf %512, %506 : vector<2x32xf32>
    %514 = arith.mulf %513, %511 : vector<2x32xf32>
    %515 = arith.mulf %506, %468 : vector<2x32xf32>
    %516 = arith.addf %514, %515 : vector<2x32xf32>
    %517 = vector.extract_strided_slice %434 {offsets = [12, 0], sizes = [2, 96], strides = [1, 1]} : vector<16x96xf32> to vector<2x96xf32>
    %cst_118 = arith.constant dense<0.000000e+00> : vector<2x96xf32>
    %518 = tpu.matmul %492, %440, %cst_118 {dimension_numbers = #tpu.dot_dimension_numbers<[1], [0], [0], [1], [0, 0, 1, 1], [], []>} : vector<2x32xf32>, vector<32x96xf32>, vector<2x96xf32> -> vector<2x96xf32>
    %519 = vector.broadcast %442 : vector<1x96xf32> to vector<2x96xf32>
    %520 = arith.addf %518, %519 : vector<2x96xf32>
    %521 = vector.extract_strided_slice %517 {offsets = [0, 0], sizes = [2, 64], strides = [1, 1]} : vector<2x96xf32> to vector<2x64xf32>
    %522 = vector.extract_strided_slice %520 {offsets = [0, 0], sizes = [2, 64], strides = [1, 1]} : vector<2x96xf32> to vector<2x64xf32>
    %523 = arith.addf %521, %522 : vector<2x64xf32>
    %524 = arith.negf %523 : vector<2x64xf32>
    %525 = math.exp %524 : vector<2x64xf32>
    %cst_119 = arith.constant 1.000000e+00 : f32
    %526 = vector.broadcast %cst_119 : f32 to vector<2x64xf32>
    %527 = arith.addf %526, %525 : vector<2x64xf32>
    %528 = arith.divf %526, %527 : vector<2x64xf32>
    %529 = vector.extract_strided_slice %528 {offsets = [0, 0], sizes = [2, 32], strides = [1, 1]} : vector<2x64xf32> to vector<2x32xf32>
    %530 = vector.extract_strided_slice %528 {offsets = [0, 32], sizes = [2, 32], strides = [1, 1]} : vector<2x64xf32> to vector<2x32xf32>
    %531 = vector.extract_strided_slice %517 {offsets = [0, 64], sizes = [2, 32], strides = [1, 1]} : vector<2x96xf32> to vector<2x32xf32>
    %532 = vector.extract_strided_slice %520 {offsets = [0, 64], sizes = [2, 32], strides = [1, 1]} : vector<2x96xf32> to vector<2x32xf32>
    %533 = arith.mulf %529, %532 : vector<2x32xf32>
    %534 = arith.addf %531, %533 : vector<2x32xf32>
    %535 = math.tanh %534 : vector<2x32xf32>
    %cst_120 = arith.constant 1.000000e+00 : f32
    %536 = vector.broadcast %cst_120 : f32 to vector<2x32xf32>
    %537 = arith.subf %536, %530 : vector<2x32xf32>
    %538 = arith.mulf %537, %535 : vector<2x32xf32>
    %539 = arith.mulf %530, %492 : vector<2x32xf32>
    %540 = arith.addf %538, %539 : vector<2x32xf32>
    %541 = vector.extract_strided_slice %427 {offsets = [4, 0], sizes = [2, 96], strides = [1, 1]} : vector<16x96xf32> to vector<2x96xf32>
    %cst_121 = arith.constant dense<0.000000e+00> : vector<2x96xf32>
    %542 = tpu.matmul %516, %436, %cst_121 {dimension_numbers = #tpu.dot_dimension_numbers<[1], [0], [0], [1], [0, 0, 1, 1], [], []>} : vector<2x32xf32>, vector<32x96xf32>, vector<2x96xf32> -> vector<2x96xf32>
    %543 = vector.broadcast %438 : vector<1x96xf32> to vector<2x96xf32>
    %544 = arith.addf %542, %543 : vector<2x96xf32>
    %545 = vector.extract_strided_slice %541 {offsets = [0, 0], sizes = [2, 64], strides = [1, 1]} : vector<2x96xf32> to vector<2x64xf32>
    %546 = vector.extract_strided_slice %544 {offsets = [0, 0], sizes = [2, 64], strides = [1, 1]} : vector<2x96xf32> to vector<2x64xf32>
    %547 = arith.addf %545, %546 : vector<2x64xf32>
    %548 = arith.negf %547 : vector<2x64xf32>
    %549 = math.exp %548 : vector<2x64xf32>
    %cst_122 = arith.constant 1.000000e+00 : f32
    %550 = vector.broadcast %cst_122 : f32 to vector<2x64xf32>
    %551 = arith.addf %550, %549 : vector<2x64xf32>
    %552 = arith.divf %550, %551 : vector<2x64xf32>
    %553 = vector.extract_strided_slice %552 {offsets = [0, 0], sizes = [2, 32], strides = [1, 1]} : vector<2x64xf32> to vector<2x32xf32>
    %554 = vector.extract_strided_slice %552 {offsets = [0, 32], sizes = [2, 32], strides = [1, 1]} : vector<2x64xf32> to vector<2x32xf32>
    %555 = vector.extract_strided_slice %541 {offsets = [0, 64], sizes = [2, 32], strides = [1, 1]} : vector<2x96xf32> to vector<2x32xf32>
    %556 = vector.extract_strided_slice %544 {offsets = [0, 64], sizes = [2, 32], strides = [1, 1]} : vector<2x96xf32> to vector<2x32xf32>
    %557 = arith.mulf %553, %556 : vector<2x32xf32>
    %558 = arith.addf %555, %557 : vector<2x32xf32>
    %559 = math.tanh %558 : vector<2x32xf32>
    %cst_123 = arith.constant 1.000000e+00 : f32
    %560 = vector.broadcast %cst_123 : f32 to vector<2x32xf32>
    %561 = arith.subf %560, %554 : vector<2x32xf32>
    %562 = arith.mulf %561, %559 : vector<2x32xf32>
    %563 = arith.mulf %554, %516 : vector<2x32xf32>
    %564 = arith.addf %562, %563 : vector<2x32xf32>
    %565 = vector.extract_strided_slice %434 {offsets = [10, 0], sizes = [2, 96], strides = [1, 1]} : vector<16x96xf32> to vector<2x96xf32>
    %cst_124 = arith.constant dense<0.000000e+00> : vector<2x96xf32>
    %566 = tpu.matmul %540, %440, %cst_124 {dimension_numbers = #tpu.dot_dimension_numbers<[1], [0], [0], [1], [0, 0, 1, 1], [], []>} : vector<2x32xf32>, vector<32x96xf32>, vector<2x96xf32> -> vector<2x96xf32>
    %567 = vector.broadcast %442 : vector<1x96xf32> to vector<2x96xf32>
    %568 = arith.addf %566, %567 : vector<2x96xf32>
    %569 = vector.extract_strided_slice %565 {offsets = [0, 0], sizes = [2, 64], strides = [1, 1]} : vector<2x96xf32> to vector<2x64xf32>
    %570 = vector.extract_strided_slice %568 {offsets = [0, 0], sizes = [2, 64], strides = [1, 1]} : vector<2x96xf32> to vector<2x64xf32>
    %571 = arith.addf %569, %570 : vector<2x64xf32>
    %572 = arith.negf %571 : vector<2x64xf32>
    %573 = math.exp %572 : vector<2x64xf32>
    %cst_125 = arith.constant 1.000000e+00 : f32
    %574 = vector.broadcast %cst_125 : f32 to vector<2x64xf32>
    %575 = arith.addf %574, %573 : vector<2x64xf32>
    %576 = arith.divf %574, %575 : vector<2x64xf32>
    %577 = vector.extract_strided_slice %576 {offsets = [0, 0], sizes = [2, 32], strides = [1, 1]} : vector<2x64xf32> to vector<2x32xf32>
    %578 = vector.extract_strided_slice %576 {offsets = [0, 32], sizes = [2, 32], strides = [1, 1]} : vector<2x64xf32> to vector<2x32xf32>
    %579 = vector.extract_strided_slice %565 {offsets = [0, 64], sizes = [2, 32], strides = [1, 1]} : vector<2x96xf32> to vector<2x32xf32>
    %580 = vector.extract_strided_slice %568 {offsets = [0, 64], sizes = [2, 32], strides = [1, 1]} : vector<2x96xf32> to vector<2x32xf32>
    %581 = arith.mulf %577, %580 : vector<2x32xf32>
    %582 = arith.addf %579, %581 : vector<2x32xf32>
    %583 = math.tanh %582 : vector<2x32xf32>
    %cst_126 = arith.constant 1.000000e+00 : f32
    %584 = vector.broadcast %cst_126 : f32 to vector<2x32xf32>
    %585 = arith.subf %584, %578 : vector<2x32xf32>
    %586 = arith.mulf %585, %583 : vector<2x32xf32>
    %587 = arith.mulf %578, %540 : vector<2x32xf32>
    %588 = arith.addf %586, %587 : vector<2x32xf32>
    %589 = vector.extract_strided_slice %427 {offsets = [6, 0], sizes = [2, 96], strides = [1, 1]} : vector<16x96xf32> to vector<2x96xf32>
    %cst_127 = arith.constant dense<0.000000e+00> : vector<2x96xf32>
    %590 = tpu.matmul %564, %436, %cst_127 {dimension_numbers = #tpu.dot_dimension_numbers<[1], [0], [0], [1], [0, 0, 1, 1], [], []>} : vector<2x32xf32>, vector<32x96xf32>, vector<2x96xf32> -> vector<2x96xf32>
    %591 = vector.broadcast %438 : vector<1x96xf32> to vector<2x96xf32>
    %592 = arith.addf %590, %591 : vector<2x96xf32>
    %593 = vector.extract_strided_slice %589 {offsets = [0, 0], sizes = [2, 64], strides = [1, 1]} : vector<2x96xf32> to vector<2x64xf32>
    %594 = vector.extract_strided_slice %592 {offsets = [0, 0], sizes = [2, 64], strides = [1, 1]} : vector<2x96xf32> to vector<2x64xf32>
    %595 = arith.addf %593, %594 : vector<2x64xf32>
    %596 = arith.negf %595 : vector<2x64xf32>
    %597 = math.exp %596 : vector<2x64xf32>
    %cst_128 = arith.constant 1.000000e+00 : f32
    %598 = vector.broadcast %cst_128 : f32 to vector<2x64xf32>
    %599 = arith.addf %598, %597 : vector<2x64xf32>
    %600 = arith.divf %598, %599 : vector<2x64xf32>
    %601 = vector.extract_strided_slice %600 {offsets = [0, 0], sizes = [2, 32], strides = [1, 1]} : vector<2x64xf32> to vector<2x32xf32>
    %602 = vector.extract_strided_slice %600 {offsets = [0, 32], sizes = [2, 32], strides = [1, 1]} : vector<2x64xf32> to vector<2x32xf32>
    %603 = vector.extract_strided_slice %589 {offsets = [0, 64], sizes = [2, 32], strides = [1, 1]} : vector<2x96xf32> to vector<2x32xf32>
    %604 = vector.extract_strided_slice %592 {offsets = [0, 64], sizes = [2, 32], strides = [1, 1]} : vector<2x96xf32> to vector<2x32xf32>
    %605 = arith.mulf %601, %604 : vector<2x32xf32>
    %606 = arith.addf %603, %605 : vector<2x32xf32>
    %607 = math.tanh %606 : vector<2x32xf32>
    %cst_129 = arith.constant 1.000000e+00 : f32
    %608 = vector.broadcast %cst_129 : f32 to vector<2x32xf32>
    %609 = arith.subf %608, %602 : vector<2x32xf32>
    %610 = arith.mulf %609, %607 : vector<2x32xf32>
    %611 = arith.mulf %602, %564 : vector<2x32xf32>
    %612 = arith.addf %610, %611 : vector<2x32xf32>
    %613 = vector.extract_strided_slice %434 {offsets = [8, 0], sizes = [2, 96], strides = [1, 1]} : vector<16x96xf32> to vector<2x96xf32>
    %cst_130 = arith.constant dense<0.000000e+00> : vector<2x96xf32>
    %614 = tpu.matmul %588, %440, %cst_130 {dimension_numbers = #tpu.dot_dimension_numbers<[1], [0], [0], [1], [0, 0, 1, 1], [], []>} : vector<2x32xf32>, vector<32x96xf32>, vector<2x96xf32> -> vector<2x96xf32>
    %615 = vector.broadcast %442 : vector<1x96xf32> to vector<2x96xf32>
    %616 = arith.addf %614, %615 : vector<2x96xf32>
    %617 = vector.extract_strided_slice %613 {offsets = [0, 0], sizes = [2, 64], strides = [1, 1]} : vector<2x96xf32> to vector<2x64xf32>
    %618 = vector.extract_strided_slice %616 {offsets = [0, 0], sizes = [2, 64], strides = [1, 1]} : vector<2x96xf32> to vector<2x64xf32>
    %619 = arith.addf %617, %618 : vector<2x64xf32>
    %620 = arith.negf %619 : vector<2x64xf32>
    %621 = math.exp %620 : vector<2x64xf32>
    %cst_131 = arith.constant 1.000000e+00 : f32
    %622 = vector.broadcast %cst_131 : f32 to vector<2x64xf32>
    %623 = arith.addf %622, %621 : vector<2x64xf32>
    %624 = arith.divf %622, %623 : vector<2x64xf32>
    %625 = vector.extract_strided_slice %624 {offsets = [0, 0], sizes = [2, 32], strides = [1, 1]} : vector<2x64xf32> to vector<2x32xf32>
    %626 = vector.extract_strided_slice %624 {offsets = [0, 32], sizes = [2, 32], strides = [1, 1]} : vector<2x64xf32> to vector<2x32xf32>
    %627 = vector.extract_strided_slice %613 {offsets = [0, 64], sizes = [2, 32], strides = [1, 1]} : vector<2x96xf32> to vector<2x32xf32>
    %628 = vector.extract_strided_slice %616 {offsets = [0, 64], sizes = [2, 32], strides = [1, 1]} : vector<2x96xf32> to vector<2x32xf32>
    %629 = arith.mulf %625, %628 : vector<2x32xf32>
    %630 = arith.addf %627, %629 : vector<2x32xf32>
    %631 = math.tanh %630 : vector<2x32xf32>
    %cst_132 = arith.constant 1.000000e+00 : f32
    %632 = vector.broadcast %cst_132 : f32 to vector<2x32xf32>
    %633 = arith.subf %632, %626 : vector<2x32xf32>
    %634 = arith.mulf %633, %631 : vector<2x32xf32>
    %635 = arith.mulf %626, %588 : vector<2x32xf32>
    %636 = arith.addf %634, %635 : vector<2x32xf32>
    %637 = vector.extract_strided_slice %427 {offsets = [8, 0], sizes = [2, 96], strides = [1, 1]} : vector<16x96xf32> to vector<2x96xf32>
    %cst_133 = arith.constant dense<0.000000e+00> : vector<2x96xf32>
    %638 = tpu.matmul %612, %436, %cst_133 {dimension_numbers = #tpu.dot_dimension_numbers<[1], [0], [0], [1], [0, 0, 1, 1], [], []>} : vector<2x32xf32>, vector<32x96xf32>, vector<2x96xf32> -> vector<2x96xf32>
    %639 = vector.broadcast %438 : vector<1x96xf32> to vector<2x96xf32>
    %640 = arith.addf %638, %639 : vector<2x96xf32>
    %641 = vector.extract_strided_slice %637 {offsets = [0, 0], sizes = [2, 64], strides = [1, 1]} : vector<2x96xf32> to vector<2x64xf32>
    %642 = vector.extract_strided_slice %640 {offsets = [0, 0], sizes = [2, 64], strides = [1, 1]} : vector<2x96xf32> to vector<2x64xf32>
    %643 = arith.addf %641, %642 : vector<2x64xf32>
    %644 = arith.negf %643 : vector<2x64xf32>
    %645 = math.exp %644 : vector<2x64xf32>
    %cst_134 = arith.constant 1.000000e+00 : f32
    %646 = vector.broadcast %cst_134 : f32 to vector<2x64xf32>
    %647 = arith.addf %646, %645 : vector<2x64xf32>
    %648 = arith.divf %646, %647 : vector<2x64xf32>
    %649 = vector.extract_strided_slice %648 {offsets = [0, 0], sizes = [2, 32], strides = [1, 1]} : vector<2x64xf32> to vector<2x32xf32>
    %650 = vector.extract_strided_slice %648 {offsets = [0, 32], sizes = [2, 32], strides = [1, 1]} : vector<2x64xf32> to vector<2x32xf32>
    %651 = vector.extract_strided_slice %637 {offsets = [0, 64], sizes = [2, 32], strides = [1, 1]} : vector<2x96xf32> to vector<2x32xf32>
    %652 = vector.extract_strided_slice %640 {offsets = [0, 64], sizes = [2, 32], strides = [1, 1]} : vector<2x96xf32> to vector<2x32xf32>
    %653 = arith.mulf %649, %652 : vector<2x32xf32>
    %654 = arith.addf %651, %653 : vector<2x32xf32>
    %655 = math.tanh %654 : vector<2x32xf32>
    %cst_135 = arith.constant 1.000000e+00 : f32
    %656 = vector.broadcast %cst_135 : f32 to vector<2x32xf32>
    %657 = arith.subf %656, %650 : vector<2x32xf32>
    %658 = arith.mulf %657, %655 : vector<2x32xf32>
    %659 = arith.mulf %650, %612 : vector<2x32xf32>
    %660 = arith.addf %658, %659 : vector<2x32xf32>
    %661 = vector.extract_strided_slice %434 {offsets = [6, 0], sizes = [2, 96], strides = [1, 1]} : vector<16x96xf32> to vector<2x96xf32>
    %cst_136 = arith.constant dense<0.000000e+00> : vector<2x96xf32>
    %662 = tpu.matmul %636, %440, %cst_136 {dimension_numbers = #tpu.dot_dimension_numbers<[1], [0], [0], [1], [0, 0, 1, 1], [], []>} : vector<2x32xf32>, vector<32x96xf32>, vector<2x96xf32> -> vector<2x96xf32>
    %663 = vector.broadcast %442 : vector<1x96xf32> to vector<2x96xf32>
    %664 = arith.addf %662, %663 : vector<2x96xf32>
    %665 = vector.extract_strided_slice %661 {offsets = [0, 0], sizes = [2, 64], strides = [1, 1]} : vector<2x96xf32> to vector<2x64xf32>
    %666 = vector.extract_strided_slice %664 {offsets = [0, 0], sizes = [2, 64], strides = [1, 1]} : vector<2x96xf32> to vector<2x64xf32>
    %667 = arith.addf %665, %666 : vector<2x64xf32>
    %668 = arith.negf %667 : vector<2x64xf32>
    %669 = math.exp %668 : vector<2x64xf32>
    %cst_137 = arith.constant 1.000000e+00 : f32
    %670 = vector.broadcast %cst_137 : f32 to vector<2x64xf32>
    %671 = arith.addf %670, %669 : vector<2x64xf32>
    %672 = arith.divf %670, %671 : vector<2x64xf32>
    %673 = vector.extract_strided_slice %672 {offsets = [0, 0], sizes = [2, 32], strides = [1, 1]} : vector<2x64xf32> to vector<2x32xf32>
    %674 = vector.extract_strided_slice %672 {offsets = [0, 32], sizes = [2, 32], strides = [1, 1]} : vector<2x64xf32> to vector<2x32xf32>
    %675 = vector.extract_strided_slice %661 {offsets = [0, 64], sizes = [2, 32], strides = [1, 1]} : vector<2x96xf32> to vector<2x32xf32>
    %676 = vector.extract_strided_slice %664 {offsets = [0, 64], sizes = [2, 32], strides = [1, 1]} : vector<2x96xf32> to vector<2x32xf32>
    %677 = arith.mulf %673, %676 : vector<2x32xf32>
    %678 = arith.addf %675, %677 : vector<2x32xf32>
    %679 = math.tanh %678 : vector<2x32xf32>
    %cst_138 = arith.constant 1.000000e+00 : f32
    %680 = vector.broadcast %cst_138 : f32 to vector<2x32xf32>
    %681 = arith.subf %680, %674 : vector<2x32xf32>
    %682 = arith.mulf %681, %679 : vector<2x32xf32>
    %683 = arith.mulf %674, %636 : vector<2x32xf32>
    %684 = arith.addf %682, %683 : vector<2x32xf32>
    %685 = vector.extract_strided_slice %427 {offsets = [10, 0], sizes = [2, 96], strides = [1, 1]} : vector<16x96xf32> to vector<2x96xf32>
    %cst_139 = arith.constant dense<0.000000e+00> : vector<2x96xf32>
    %686 = tpu.matmul %660, %436, %cst_139 {dimension_numbers = #tpu.dot_dimension_numbers<[1], [0], [0], [1], [0, 0, 1, 1], [], []>} : vector<2x32xf32>, vector<32x96xf32>, vector<2x96xf32> -> vector<2x96xf32>
    %687 = vector.broadcast %438 : vector<1x96xf32> to vector<2x96xf32>
    %688 = arith.addf %686, %687 : vector<2x96xf32>
    %689 = vector.extract_strided_slice %685 {offsets = [0, 0], sizes = [2, 64], strides = [1, 1]} : vector<2x96xf32> to vector<2x64xf32>
    %690 = vector.extract_strided_slice %688 {offsets = [0, 0], sizes = [2, 64], strides = [1, 1]} : vector<2x96xf32> to vector<2x64xf32>
    %691 = arith.addf %689, %690 : vector<2x64xf32>
    %692 = arith.negf %691 : vector<2x64xf32>
    %693 = math.exp %692 : vector<2x64xf32>
    %cst_140 = arith.constant 1.000000e+00 : f32
    %694 = vector.broadcast %cst_140 : f32 to vector<2x64xf32>
    %695 = arith.addf %694, %693 : vector<2x64xf32>
    %696 = arith.divf %694, %695 : vector<2x64xf32>
    %697 = vector.extract_strided_slice %696 {offsets = [0, 0], sizes = [2, 32], strides = [1, 1]} : vector<2x64xf32> to vector<2x32xf32>
    %698 = vector.extract_strided_slice %696 {offsets = [0, 32], sizes = [2, 32], strides = [1, 1]} : vector<2x64xf32> to vector<2x32xf32>
    %699 = vector.extract_strided_slice %685 {offsets = [0, 64], sizes = [2, 32], strides = [1, 1]} : vector<2x96xf32> to vector<2x32xf32>
    %700 = vector.extract_strided_slice %688 {offsets = [0, 64], sizes = [2, 32], strides = [1, 1]} : vector<2x96xf32> to vector<2x32xf32>
    %701 = arith.mulf %697, %700 : vector<2x32xf32>
    %702 = arith.addf %699, %701 : vector<2x32xf32>
    %703 = math.tanh %702 : vector<2x32xf32>
    %cst_141 = arith.constant 1.000000e+00 : f32
    %704 = vector.broadcast %cst_141 : f32 to vector<2x32xf32>
    %705 = arith.subf %704, %698 : vector<2x32xf32>
    %706 = arith.mulf %705, %703 : vector<2x32xf32>
    %707 = arith.mulf %698, %660 : vector<2x32xf32>
    %708 = arith.addf %706, %707 : vector<2x32xf32>
    %709 = vector.extract_strided_slice %434 {offsets = [4, 0], sizes = [2, 96], strides = [1, 1]} : vector<16x96xf32> to vector<2x96xf32>
    %cst_142 = arith.constant dense<0.000000e+00> : vector<2x96xf32>
    %710 = tpu.matmul %684, %440, %cst_142 {dimension_numbers = #tpu.dot_dimension_numbers<[1], [0], [0], [1], [0, 0, 1, 1], [], []>} : vector<2x32xf32>, vector<32x96xf32>, vector<2x96xf32> -> vector<2x96xf32>
    %711 = vector.broadcast %442 : vector<1x96xf32> to vector<2x96xf32>
    %712 = arith.addf %710, %711 : vector<2x96xf32>
    %713 = vector.extract_strided_slice %709 {offsets = [0, 0], sizes = [2, 64], strides = [1, 1]} : vector<2x96xf32> to vector<2x64xf32>
    %714 = vector.extract_strided_slice %712 {offsets = [0, 0], sizes = [2, 64], strides = [1, 1]} : vector<2x96xf32> to vector<2x64xf32>
    %715 = arith.addf %713, %714 : vector<2x64xf32>
    %716 = arith.negf %715 : vector<2x64xf32>
    %717 = math.exp %716 : vector<2x64xf32>
    %cst_143 = arith.constant 1.000000e+00 : f32
    %718 = vector.broadcast %cst_143 : f32 to vector<2x64xf32>
    %719 = arith.addf %718, %717 : vector<2x64xf32>
    %720 = arith.divf %718, %719 : vector<2x64xf32>
    %721 = vector.extract_strided_slice %720 {offsets = [0, 0], sizes = [2, 32], strides = [1, 1]} : vector<2x64xf32> to vector<2x32xf32>
    %722 = vector.extract_strided_slice %720 {offsets = [0, 32], sizes = [2, 32], strides = [1, 1]} : vector<2x64xf32> to vector<2x32xf32>
    %723 = vector.extract_strided_slice %709 {offsets = [0, 64], sizes = [2, 32], strides = [1, 1]} : vector<2x96xf32> to vector<2x32xf32>
    %724 = vector.extract_strided_slice %712 {offsets = [0, 64], sizes = [2, 32], strides = [1, 1]} : vector<2x96xf32> to vector<2x32xf32>
    %725 = arith.mulf %721, %724 : vector<2x32xf32>
    %726 = arith.addf %723, %725 : vector<2x32xf32>
    %727 = math.tanh %726 : vector<2x32xf32>
    %cst_144 = arith.constant 1.000000e+00 : f32
    %728 = vector.broadcast %cst_144 : f32 to vector<2x32xf32>
    %729 = arith.subf %728, %722 : vector<2x32xf32>
    %730 = arith.mulf %729, %727 : vector<2x32xf32>
    %731 = arith.mulf %722, %684 : vector<2x32xf32>
    %732 = arith.addf %730, %731 : vector<2x32xf32>
    %733 = vector.extract_strided_slice %427 {offsets = [12, 0], sizes = [2, 96], strides = [1, 1]} : vector<16x96xf32> to vector<2x96xf32>
    %cst_145 = arith.constant dense<0.000000e+00> : vector<2x96xf32>
    %734 = tpu.matmul %708, %436, %cst_145 {dimension_numbers = #tpu.dot_dimension_numbers<[1], [0], [0], [1], [0, 0, 1, 1], [], []>} : vector<2x32xf32>, vector<32x96xf32>, vector<2x96xf32> -> vector<2x96xf32>
    %735 = vector.broadcast %438 : vector<1x96xf32> to vector<2x96xf32>
    %736 = arith.addf %734, %735 : vector<2x96xf32>
    %737 = vector.extract_strided_slice %733 {offsets = [0, 0], sizes = [2, 64], strides = [1, 1]} : vector<2x96xf32> to vector<2x64xf32>
    %738 = vector.extract_strided_slice %736 {offsets = [0, 0], sizes = [2, 64], strides = [1, 1]} : vector<2x96xf32> to vector<2x64xf32>
    %739 = arith.addf %737, %738 : vector<2x64xf32>
    %740 = arith.negf %739 : vector<2x64xf32>
    %741 = math.exp %740 : vector<2x64xf32>
    %cst_146 = arith.constant 1.000000e+00 : f32
    %742 = vector.broadcast %cst_146 : f32 to vector<2x64xf32>
    %743 = arith.addf %742, %741 : vector<2x64xf32>
    %744 = arith.divf %742, %743 : vector<2x64xf32>
    %745 = vector.extract_strided_slice %744 {offsets = [0, 0], sizes = [2, 32], strides = [1, 1]} : vector<2x64xf32> to vector<2x32xf32>
    %746 = vector.extract_strided_slice %744 {offsets = [0, 32], sizes = [2, 32], strides = [1, 1]} : vector<2x64xf32> to vector<2x32xf32>
    %747 = vector.extract_strided_slice %733 {offsets = [0, 64], sizes = [2, 32], strides = [1, 1]} : vector<2x96xf32> to vector<2x32xf32>
    %748 = vector.extract_strided_slice %736 {offsets = [0, 64], sizes = [2, 32], strides = [1, 1]} : vector<2x96xf32> to vector<2x32xf32>
    %749 = arith.mulf %745, %748 : vector<2x32xf32>
    %750 = arith.addf %747, %749 : vector<2x32xf32>
    %751 = math.tanh %750 : vector<2x32xf32>
    %cst_147 = arith.constant 1.000000e+00 : f32
    %752 = vector.broadcast %cst_147 : f32 to vector<2x32xf32>
    %753 = arith.subf %752, %746 : vector<2x32xf32>
    %754 = arith.mulf %753, %751 : vector<2x32xf32>
    %755 = arith.mulf %746, %708 : vector<2x32xf32>
    %756 = arith.addf %754, %755 : vector<2x32xf32>
    %757 = vector.extract_strided_slice %434 {offsets = [2, 0], sizes = [2, 96], strides = [1, 1]} : vector<16x96xf32> to vector<2x96xf32>
    %cst_148 = arith.constant dense<0.000000e+00> : vector<2x96xf32>
    %758 = tpu.matmul %732, %440, %cst_148 {dimension_numbers = #tpu.dot_dimension_numbers<[1], [0], [0], [1], [0, 0, 1, 1], [], []>} : vector<2x32xf32>, vector<32x96xf32>, vector<2x96xf32> -> vector<2x96xf32>
    %759 = vector.broadcast %442 : vector<1x96xf32> to vector<2x96xf32>
    %760 = arith.addf %758, %759 : vector<2x96xf32>
    %761 = vector.extract_strided_slice %757 {offsets = [0, 0], sizes = [2, 64], strides = [1, 1]} : vector<2x96xf32> to vector<2x64xf32>
    %762 = vector.extract_strided_slice %760 {offsets = [0, 0], sizes = [2, 64], strides = [1, 1]} : vector<2x96xf32> to vector<2x64xf32>
    %763 = arith.addf %761, %762 : vector<2x64xf32>
    %764 = arith.negf %763 : vector<2x64xf32>
    %765 = math.exp %764 : vector<2x64xf32>
    %cst_149 = arith.constant 1.000000e+00 : f32
    %766 = vector.broadcast %cst_149 : f32 to vector<2x64xf32>
    %767 = arith.addf %766, %765 : vector<2x64xf32>
    %768 = arith.divf %766, %767 : vector<2x64xf32>
    %769 = vector.extract_strided_slice %768 {offsets = [0, 0], sizes = [2, 32], strides = [1, 1]} : vector<2x64xf32> to vector<2x32xf32>
    %770 = vector.extract_strided_slice %768 {offsets = [0, 32], sizes = [2, 32], strides = [1, 1]} : vector<2x64xf32> to vector<2x32xf32>
    %771 = vector.extract_strided_slice %757 {offsets = [0, 64], sizes = [2, 32], strides = [1, 1]} : vector<2x96xf32> to vector<2x32xf32>
    %772 = vector.extract_strided_slice %760 {offsets = [0, 64], sizes = [2, 32], strides = [1, 1]} : vector<2x96xf32> to vector<2x32xf32>
    %773 = arith.mulf %769, %772 : vector<2x32xf32>
    %774 = arith.addf %771, %773 : vector<2x32xf32>
    %775 = math.tanh %774 : vector<2x32xf32>
    %cst_150 = arith.constant 1.000000e+00 : f32
    %776 = vector.broadcast %cst_150 : f32 to vector<2x32xf32>
    %777 = arith.subf %776, %770 : vector<2x32xf32>
    %778 = arith.mulf %777, %775 : vector<2x32xf32>
    %779 = arith.mulf %770, %732 : vector<2x32xf32>
    %780 = arith.addf %778, %779 : vector<2x32xf32>
    %781 = vector.extract_strided_slice %427 {offsets = [14, 0], sizes = [2, 96], strides = [1, 1]} : vector<16x96xf32> to vector<2x96xf32>
    %cst_151 = arith.constant dense<0.000000e+00> : vector<2x96xf32>
    %782 = tpu.matmul %756, %436, %cst_151 {dimension_numbers = #tpu.dot_dimension_numbers<[1], [0], [0], [1], [0, 0, 1, 1], [], []>} : vector<2x32xf32>, vector<32x96xf32>, vector<2x96xf32> -> vector<2x96xf32>
    %783 = vector.broadcast %438 : vector<1x96xf32> to vector<2x96xf32>
    %784 = arith.addf %782, %783 : vector<2x96xf32>
    %785 = vector.extract_strided_slice %781 {offsets = [0, 0], sizes = [2, 64], strides = [1, 1]} : vector<2x96xf32> to vector<2x64xf32>
    %786 = vector.extract_strided_slice %784 {offsets = [0, 0], sizes = [2, 64], strides = [1, 1]} : vector<2x96xf32> to vector<2x64xf32>
    %787 = arith.addf %785, %786 : vector<2x64xf32>
    %788 = arith.negf %787 : vector<2x64xf32>
    %789 = math.exp %788 : vector<2x64xf32>
    %cst_152 = arith.constant 1.000000e+00 : f32
    %790 = vector.broadcast %cst_152 : f32 to vector<2x64xf32>
    %791 = arith.addf %790, %789 : vector<2x64xf32>
    %792 = arith.divf %790, %791 : vector<2x64xf32>
    %793 = vector.extract_strided_slice %792 {offsets = [0, 0], sizes = [2, 32], strides = [1, 1]} : vector<2x64xf32> to vector<2x32xf32>
    %794 = vector.extract_strided_slice %792 {offsets = [0, 32], sizes = [2, 32], strides = [1, 1]} : vector<2x64xf32> to vector<2x32xf32>
    %795 = vector.extract_strided_slice %781 {offsets = [0, 64], sizes = [2, 32], strides = [1, 1]} : vector<2x96xf32> to vector<2x32xf32>
    %796 = vector.extract_strided_slice %784 {offsets = [0, 64], sizes = [2, 32], strides = [1, 1]} : vector<2x96xf32> to vector<2x32xf32>
    %797 = arith.mulf %793, %796 : vector<2x32xf32>
    %798 = arith.addf %795, %797 : vector<2x32xf32>
    %799 = math.tanh %798 : vector<2x32xf32>
    %cst_153 = arith.constant 1.000000e+00 : f32
    %800 = vector.broadcast %cst_153 : f32 to vector<2x32xf32>
    %801 = arith.subf %800, %794 : vector<2x32xf32>
    %802 = arith.mulf %801, %799 : vector<2x32xf32>
    %803 = arith.mulf %794, %756 : vector<2x32xf32>
    %804 = arith.addf %802, %803 : vector<2x32xf32>
    %805 = vector.extract_strided_slice %434 {offsets = [0, 0], sizes = [2, 96], strides = [1, 1]} : vector<16x96xf32> to vector<2x96xf32>
    %cst_154 = arith.constant dense<0.000000e+00> : vector<2x96xf32>
    %806 = tpu.matmul %780, %440, %cst_154 {dimension_numbers = #tpu.dot_dimension_numbers<[1], [0], [0], [1], [0, 0, 1, 1], [], []>} : vector<2x32xf32>, vector<32x96xf32>, vector<2x96xf32> -> vector<2x96xf32>
    %807 = vector.broadcast %442 : vector<1x96xf32> to vector<2x96xf32>
    %808 = arith.addf %806, %807 : vector<2x96xf32>
    %809 = vector.extract_strided_slice %805 {offsets = [0, 0], sizes = [2, 64], strides = [1, 1]} : vector<2x96xf32> to vector<2x64xf32>
    %810 = vector.extract_strided_slice %808 {offsets = [0, 0], sizes = [2, 64], strides = [1, 1]} : vector<2x96xf32> to vector<2x64xf32>
    %811 = arith.addf %809, %810 : vector<2x64xf32>
    %812 = arith.negf %811 : vector<2x64xf32>
    %813 = math.exp %812 : vector<2x64xf32>
    %cst_155 = arith.constant 1.000000e+00 : f32
    %814 = vector.broadcast %cst_155 : f32 to vector<2x64xf32>
    %815 = arith.addf %814, %813 : vector<2x64xf32>
    %816 = arith.divf %814, %815 : vector<2x64xf32>
    %817 = vector.extract_strided_slice %816 {offsets = [0, 0], sizes = [2, 32], strides = [1, 1]} : vector<2x64xf32> to vector<2x32xf32>
    %818 = vector.extract_strided_slice %816 {offsets = [0, 32], sizes = [2, 32], strides = [1, 1]} : vector<2x64xf32> to vector<2x32xf32>
    %819 = vector.extract_strided_slice %805 {offsets = [0, 64], sizes = [2, 32], strides = [1, 1]} : vector<2x96xf32> to vector<2x32xf32>
    %820 = vector.extract_strided_slice %808 {offsets = [0, 64], sizes = [2, 32], strides = [1, 1]} : vector<2x96xf32> to vector<2x32xf32>
    %821 = arith.mulf %817, %820 : vector<2x32xf32>
    %822 = arith.addf %819, %821 : vector<2x32xf32>
    %823 = math.tanh %822 : vector<2x32xf32>
    %cst_156 = arith.constant 1.000000e+00 : f32
    %824 = vector.broadcast %cst_156 : f32 to vector<2x32xf32>
    %825 = arith.subf %824, %818 : vector<2x32xf32>
    %826 = arith.mulf %825, %823 : vector<2x32xf32>
    %827 = arith.mulf %818, %780 : vector<2x32xf32>
    %828 = arith.addf %826, %827 : vector<2x32xf32>
    %829 = tpu.concatenate %393, %804 in 1 : vector<2x32xf32>, vector<2x32xf32> -> vector<2x64xf32>
    %830 = tpu.concatenate %417, %828 in 1 : vector<2x32xf32>, vector<2x32xf32> -> vector<2x64xf32>
    %831 = tpu.concatenate %829, %830 in 0 : vector<2x64xf32>, vector<2x64xf32> -> vector<4x64xf32>
    %c0_157 = arith.constant 0 : index
    %c0_158 = arith.constant 0 : index
    %832 = vector.load %arg12[%c0_157, %c0_158] : memref<64x64xf32, #tpu.memory_space<vmem>>, vector<64x64xf32>
    %cst_159 = arith.constant dense<0.000000e+00> : vector<4x64xf32>
    %833 = tpu.matmul %831, %832, %cst_159 {dimension_numbers = #tpu.dot_dimension_numbers<[1], [0], [0], [1], [0, 0, 1, 1], [], []>} : vector<4x64xf32>, vector<64x64xf32>, vector<4x64xf32> -> vector<4x64xf32>
    %c0_160 = arith.constant 0 : index
    %c0_161 = arith.constant 0 : index
    %834 = vector.load %arg13[%c0_160, %c0_161] : memref<1x64xf32, #tpu.memory_space<vmem>>, vector<1x64xf32>
    %835 = vector.broadcast %834 : vector<1x64xf32> to vector<4x64xf32>
    %836 = arith.addf %833, %835 : vector<4x64xf32>
    %837 = vector.extract_strided_slice %836 {offsets = [0, 0], sizes = [4, 32], strides = [1, 1]} : vector<4x64xf32> to vector<4x32xf32>
    %838 = vector.extract_strided_slice %836 {offsets = [0, 32], sizes = [4, 32], strides = [1, 1]} : vector<4x64xf32> to vector<4x32xf32>
    %cst_162 = arith.constant 0.000000e+00 : f32
    %839 = vector.broadcast %cst_162 : f32 to vector<4x32xf32>
    %840 = arith.maximumf %838, %839 : vector<4x32xf32>
    %841 = math.absf %838 : vector<4x32xf32>
    %cst_163 = arith.constant 0.000000e+00 : f32
    %842 = vector.broadcast %cst_163 : f32 to vector<4x32xf32>
    %843 = arith.subf %842, %841 : vector<4x32xf32>
    %844 = math.exp %843 : vector<4x32xf32>
    %cst_164 = arith.constant 1.000000e+00 : f32
    %845 = vector.broadcast %cst_164 : f32 to vector<4x32xf32>
    %846 = arith.addf %845, %844 : vector<4x32xf32>
    %847 = math.log %846 : vector<4x32xf32>
    %848 = arith.addf %840, %847 : vector<4x32xf32>
    %c0_165 = arith.constant 0 : index
    %c0_166 = arith.constant 0 : index
    %849 = vector.load %arg1[%c0_165, %c0_166] : memref<4x32xf32, #tpu.memory_space<vmem>>, vector<4x32xf32>
    %850 = arith.mulf %848, %849 : vector<4x32xf32>
    %851 = arith.addf %837, %850 : vector<4x32xf32>
    %852 = vector.extract_strided_slice %851 {offsets = [0, 0], sizes = [2, 32], strides = [1, 1]} : vector<4x32xf32> to vector<2x32xf32>
    %853 = vector.extract_strided_slice %851 {offsets = [2, 0], sizes = [2, 32], strides = [1, 1]} : vector<4x32xf32> to vector<2x32xf32>
    %854 = arith.addf %852, %853 : vector<2x32xf32>
    %cst_167 = arith.constant 5.000000e-01 : f32
    %855 = vector.broadcast %cst_167 : f32 to vector<2x32xf32>
    %856 = arith.mulf %854, %855 : vector<2x32xf32>
    %c0_168 = arith.constant 0 : index
    %c0_169 = arith.constant 0 : index
    %857 = vector.load %arg24[%c0_168, %c0_169] : memref<32x16xf32, #tpu.memory_space<vmem>>, vector<32x16xf32>
    %cst_170 = arith.constant dense<0.000000e+00> : vector<2x16xf32>
    %858 = tpu.matmul %856, %857, %cst_170 {dimension_numbers = #tpu.dot_dimension_numbers<[1], [0], [0], [1], [0, 0, 1, 1], [], []>} : vector<2x32xf32>, vector<32x16xf32>, vector<2x16xf32> -> vector<2x16xf32>
    %c0_171 = arith.constant 0 : index
    %c0_172 = arith.constant 0 : index
    %859 = vector.load %arg25[%c0_171, %c0_172] : memref<1x16xf32, #tpu.memory_space<vmem>>, vector<1x16xf32>
    %860 = vector.broadcast %859 : vector<1x16xf32> to vector<2x16xf32>
    %861 = arith.addf %858, %860 : vector<2x16xf32>
    %862 = vector.extract_strided_slice %837 {offsets = [0, 0], sizes = [2, 32], strides = [1, 1]} : vector<4x32xf32> to vector<2x32xf32>
    %863 = vector.extract_strided_slice %837 {offsets = [2, 0], sizes = [2, 32], strides = [1, 1]} : vector<4x32xf32> to vector<2x32xf32>
    %864 = vector.extract_strided_slice %848 {offsets = [0, 0], sizes = [2, 32], strides = [1, 1]} : vector<4x32xf32> to vector<2x32xf32>
    %865 = vector.extract_strided_slice %848 {offsets = [2, 0], sizes = [2, 32], strides = [1, 1]} : vector<4x32xf32> to vector<2x32xf32>
    %cst_173 = arith.constant 0.000000e+00 : f32
    %866 = vector.broadcast %cst_173 : f32 to vector<2x112xf32>
    %867 = tpu.concatenate %862, %863, %864, %865, %861, %866 in 1 : vector<2x32xf32>, vector<2x32xf32>, vector<2x32xf32>, vector<2x32xf32>, vector<2x16xf32>, vector<2x112xf32> -> vector<2x256xf32>
    %c0_174 = arith.constant 0 : index
    %c0_175 = arith.constant 0 : index
    %868 = vector.load %arg27[%c0_174, %c0_175] : memref<2x256xf32, #tpu.memory_space<vmem>>, vector<2x256xf32>
    tpu.vector_store %arg27[%c0_174, %c0_175], %867 {strides = array<i32>} : memref<2x256xf32, #tpu.memory_space<vmem>>, vector<2x256xf32>,
    %c0_176 = arith.constant 0 : index
    %c0_177 = arith.constant 0 : index
    %c0_178 = arith.constant 0 : index
    %869 = vector.load %arg14[%c0_176, %c0_177, %c0_178] : memref<2x32x96xf32, #tpu.memory_space<vmem>>, vector<1x32x96xf32>
    %870 = vector.shape_cast %869 : vector<1x32x96xf32> to vector<32x96xf32>
    %cst_179 = arith.constant dense<0.000000e+00> : vector<2x96xf32>
    %871 = tpu.matmul %854, %870, %cst_179 {dimension_numbers = #tpu.dot_dimension_numbers<[1], [0], [0], [1], [0, 0, 1, 1], [], []>} : vector<2x32xf32>, vector<32x96xf32>, vector<2x96xf32> -> vector<2x96xf32>
    %c0_180 = arith.constant 0 : index
    %c0_181 = arith.constant 0 : index
    %c0_182 = arith.constant 0 : index
    %872 = vector.load %arg16[%c0_180, %c0_181, %c0_182] : memref<2x1x96xf32, #tpu.memory_space<vmem>>, vector<1x1x96xf32>
    %873 = vector.shape_cast %872 : vector<1x1x96xf32> to vector<1x96xf32>
    %874 = vector.broadcast %873 : vector<1x96xf32> to vector<2x96xf32>
    %875 = arith.addf %871, %874 : vector<2x96xf32>
    %c0_183 = arith.constant 0 : index
    %c0_184 = arith.constant 0 : index
    %c0_185 = arith.constant 0 : index
    %876 = vector.load %arg15[%c0_183, %c0_184, %c0_185] : memref<2x32x96xf32, #tpu.memory_space<vmem>>, vector<1x32x96xf32>
    %877 = vector.shape_cast %876 : vector<1x32x96xf32> to vector<32x96xf32>
    %c0_186 = arith.constant 0 : index
    %c0_187 = arith.constant 0 : index
    %c0_188 = arith.constant 0 : index
    %878 = vector.load %arg17[%c0_186, %c0_187, %c0_188] : memref<2x1x96xf32, #tpu.memory_space<vmem>>, vector<1x1x96xf32>
    %879 = vector.shape_cast %878 : vector<1x1x96xf32> to vector<1x96xf32>
    %c1_189 = arith.constant 1 : index
    %c0_190 = arith.constant 0 : index
    %c0_191 = arith.constant 0 : index
    %880 = vector.load %arg14[%c1_189, %c0_190, %c0_191] : memref<2x32x96xf32, #tpu.memory_space<vmem>>, vector<1x32x96xf32>
    %881 = vector.shape_cast %880 : vector<1x32x96xf32> to vector<32x96xf32>
    %c1_192 = arith.constant 1 : index
    %c0_193 = arith.constant 0 : index
    %c0_194 = arith.constant 0 : index
    %882 = vector.load %arg16[%c1_192, %c0_193, %c0_194] : memref<2x1x96xf32, #tpu.memory_space<vmem>>, vector<1x1x96xf32>
    %883 = vector.shape_cast %882 : vector<1x1x96xf32> to vector<1x96xf32>
    %c1_195 = arith.constant 1 : index
    %c0_196 = arith.constant 0 : index
    %c0_197 = arith.constant 0 : index
    %884 = vector.load %arg15[%c1_195, %c0_196, %c0_197] : memref<2x32x96xf32, #tpu.memory_space<vmem>>, vector<1x32x96xf32>
    %885 = vector.shape_cast %884 : vector<1x32x96xf32> to vector<32x96xf32>
    %c1_198 = arith.constant 1 : index
    %c0_199 = arith.constant 0 : index
    %c0_200 = arith.constant 0 : index
    %886 = vector.load %arg17[%c1_198, %c0_199, %c0_200] : memref<2x1x96xf32, #tpu.memory_space<vmem>>, vector<1x1x96xf32>
    %887 = vector.shape_cast %886 : vector<1x1x96xf32> to vector<1x96xf32>
    %cst_201 = arith.constant dense<0.000000e+00> : vector<2x96xf32>
    %888 = tpu.matmul %852, %877, %cst_201 {dimension_numbers = #tpu.dot_dimension_numbers<[1], [0], [0], [1], [0, 0, 1, 1], [], []>} : vector<2x32xf32>, vector<32x96xf32>, vector<2x96xf32> -> vector<2x96xf32>
    %889 = vector.broadcast %879 : vector<1x96xf32> to vector<2x96xf32>
    %890 = arith.addf %888, %889 : vector<2x96xf32>
    %891 = vector.extract_strided_slice %875 {offsets = [0, 0], sizes = [2, 64], strides = [1, 1]} : vector<2x96xf32> to vector<2x64xf32>
    %892 = vector.extract_strided_slice %890 {offsets = [0, 0], sizes = [2, 64], strides = [1, 1]} : vector<2x96xf32> to vector<2x64xf32>
    %893 = arith.addf %891, %892 : vector<2x64xf32>
    %894 = arith.negf %893 : vector<2x64xf32>
    %895 = math.exp %894 : vector<2x64xf32>
    %cst_202 = arith.constant 1.000000e+00 : f32
    %896 = vector.broadcast %cst_202 : f32 to vector<2x64xf32>
    %897 = arith.addf %896, %895 : vector<2x64xf32>
    %898 = arith.divf %896, %897 : vector<2x64xf32>
    %899 = vector.extract_strided_slice %898 {offsets = [0, 0], sizes = [2, 32], strides = [1, 1]} : vector<2x64xf32> to vector<2x32xf32>
    %900 = vector.extract_strided_slice %898 {offsets = [0, 32], sizes = [2, 32], strides = [1, 1]} : vector<2x64xf32> to vector<2x32xf32>
    %901 = vector.extract_strided_slice %875 {offsets = [0, 64], sizes = [2, 32], strides = [1, 1]} : vector<2x96xf32> to vector<2x32xf32>
    %902 = vector.extract_strided_slice %890 {offsets = [0, 64], sizes = [2, 32], strides = [1, 1]} : vector<2x96xf32> to vector<2x32xf32>
    %903 = arith.mulf %899, %902 : vector<2x32xf32>
    %904 = arith.addf %901, %903 : vector<2x32xf32>
    %905 = math.tanh %904 : vector<2x32xf32>
    %cst_203 = arith.constant 1.000000e+00 : f32
    %906 = vector.broadcast %cst_203 : f32 to vector<2x32xf32>
    %907 = arith.subf %906, %900 : vector<2x32xf32>
    %908 = arith.mulf %907, %905 : vector<2x32xf32>
    %909 = arith.mulf %900, %852 : vector<2x32xf32>
    %910 = arith.addf %908, %909 : vector<2x32xf32>
    %cst_204 = arith.constant dense<0.000000e+00> : vector<2x96xf32>
    %911 = tpu.matmul %910, %881, %cst_204 {dimension_numbers = #tpu.dot_dimension_numbers<[1], [0], [0], [1], [0, 0, 1, 1], [], []>} : vector<2x32xf32>, vector<32x96xf32>, vector<2x96xf32> -> vector<2x96xf32>
    %912 = vector.broadcast %883 : vector<1x96xf32> to vector<2x96xf32>
    %913 = arith.addf %911, %912 : vector<2x96xf32>
    %cst_205 = arith.constant dense<0.000000e+00> : vector<2x96xf32>
    %914 = tpu.matmul %853, %885, %cst_205 {dimension_numbers = #tpu.dot_dimension_numbers<[1], [0], [0], [1], [0, 0, 1, 1], [], []>} : vector<2x32xf32>, vector<32x96xf32>, vector<2x96xf32> -> vector<2x96xf32>
    %915 = vector.broadcast %887 : vector<1x96xf32> to vector<2x96xf32>
    %916 = arith.addf %914, %915 : vector<2x96xf32>
    %917 = vector.extract_strided_slice %913 {offsets = [0, 0], sizes = [2, 64], strides = [1, 1]} : vector<2x96xf32> to vector<2x64xf32>
    %918 = vector.extract_strided_slice %916 {offsets = [0, 0], sizes = [2, 64], strides = [1, 1]} : vector<2x96xf32> to vector<2x64xf32>
    %919 = arith.addf %917, %918 : vector<2x64xf32>
    %920 = arith.negf %919 : vector<2x64xf32>
    %921 = math.exp %920 : vector<2x64xf32>
    %cst_206 = arith.constant 1.000000e+00 : f32
    %922 = vector.broadcast %cst_206 : f32 to vector<2x64xf32>
    %923 = arith.addf %922, %921 : vector<2x64xf32>
    %924 = arith.divf %922, %923 : vector<2x64xf32>
    %925 = vector.extract_strided_slice %924 {offsets = [0, 0], sizes = [2, 32], strides = [1, 1]} : vector<2x64xf32> to vector<2x32xf32>
    %926 = vector.extract_strided_slice %924 {offsets = [0, 32], sizes = [2, 32], strides = [1, 1]} : vector<2x64xf32> to vector<2x32xf32>
    %927 = vector.extract_strided_slice %913 {offsets = [0, 64], sizes = [2, 32], strides = [1, 1]} : vector<2x96xf32> to vector<2x32xf32>
    %928 = vector.extract_strided_slice %916 {offsets = [0, 64], sizes = [2, 32], strides = [1, 1]} : vector<2x96xf32> to vector<2x32xf32>
    %929 = arith.mulf %925, %928 : vector<2x32xf32>
    %930 = arith.addf %927, %929 : vector<2x32xf32>
    %931 = math.tanh %930 : vector<2x32xf32>
    %cst_207 = arith.constant 1.000000e+00 : f32
    %932 = vector.broadcast %cst_207 : f32 to vector<2x32xf32>
    %933 = arith.subf %932, %926 : vector<2x32xf32>
    %934 = arith.mulf %933, %931 : vector<2x32xf32>
    %935 = arith.mulf %926, %853 : vector<2x32xf32>
    %936 = arith.addf %934, %935 : vector<2x32xf32>
    %cst_208 = arith.constant dense<0.000000e+00> : vector<2x96xf32>
    %937 = tpu.matmul %910, %877, %cst_208 {dimension_numbers = #tpu.dot_dimension_numbers<[1], [0], [0], [1], [0, 0, 1, 1], [], []>} : vector<2x32xf32>, vector<32x96xf32>, vector<2x96xf32> -> vector<2x96xf32>
    %938 = vector.broadcast %879 : vector<1x96xf32> to vector<2x96xf32>
    %939 = arith.addf %937, %938 : vector<2x96xf32>
    %940 = vector.extract_strided_slice %875 {offsets = [0, 0], sizes = [2, 64], strides = [1, 1]} : vector<2x96xf32> to vector<2x64xf32>
    %941 = vector.extract_strided_slice %939 {offsets = [0, 0], sizes = [2, 64], strides = [1, 1]} : vector<2x96xf32> to vector<2x64xf32>
    %942 = arith.addf %940, %941 : vector<2x64xf32>
    %943 = arith.negf %942 : vector<2x64xf32>
    %944 = math.exp %943 : vector<2x64xf32>
    %cst_209 = arith.constant 1.000000e+00 : f32
    %945 = vector.broadcast %cst_209 : f32 to vector<2x64xf32>
    %946 = arith.addf %945, %944 : vector<2x64xf32>
    %947 = arith.divf %945, %946 : vector<2x64xf32>
    %948 = vector.extract_strided_slice %947 {offsets = [0, 0], sizes = [2, 32], strides = [1, 1]} : vector<2x64xf32> to vector<2x32xf32>
    %949 = vector.extract_strided_slice %947 {offsets = [0, 32], sizes = [2, 32], strides = [1, 1]} : vector<2x64xf32> to vector<2x32xf32>
    %950 = vector.extract_strided_slice %875 {offsets = [0, 64], sizes = [2, 32], strides = [1, 1]} : vector<2x96xf32> to vector<2x32xf32>
    %951 = vector.extract_strided_slice %939 {offsets = [0, 64], sizes = [2, 32], strides = [1, 1]} : vector<2x96xf32> to vector<2x32xf32>
    %952 = arith.mulf %948, %951 : vector<2x32xf32>
    %953 = arith.addf %950, %952 : vector<2x32xf32>
    %954 = math.tanh %953 : vector<2x32xf32>
    %cst_210 = arith.constant 1.000000e+00 : f32
    %955 = vector.broadcast %cst_210 : f32 to vector<2x32xf32>
    %956 = arith.subf %955, %949 : vector<2x32xf32>
    %957 = arith.mulf %956, %954 : vector<2x32xf32>
    %958 = arith.mulf %949, %910 : vector<2x32xf32>
    %959 = arith.addf %957, %958 : vector<2x32xf32>
    %cst_211 = arith.constant dense<0.000000e+00> : vector<2x96xf32>
    %960 = tpu.matmul %959, %881, %cst_211 {dimension_numbers = #tpu.dot_dimension_numbers<[1], [0], [0], [1], [0, 0, 1, 1], [], []>} : vector<2x32xf32>, vector<32x96xf32>, vector<2x96xf32> -> vector<2x96xf32>
    %961 = vector.broadcast %883 : vector<1x96xf32> to vector<2x96xf32>
    %962 = arith.addf %960, %961 : vector<2x96xf32>
    %cst_212 = arith.constant dense<0.000000e+00> : vector<2x96xf32>
    %963 = tpu.matmul %936, %885, %cst_212 {dimension_numbers = #tpu.dot_dimension_numbers<[1], [0], [0], [1], [0, 0, 1, 1], [], []>} : vector<2x32xf32>, vector<32x96xf32>, vector<2x96xf32> -> vector<2x96xf32>
    %964 = vector.broadcast %887 : vector<1x96xf32> to vector<2x96xf32>
    %965 = arith.addf %963, %964 : vector<2x96xf32>
    %966 = vector.extract_strided_slice %962 {offsets = [0, 0], sizes = [2, 64], strides = [1, 1]} : vector<2x96xf32> to vector<2x64xf32>
    %967 = vector.extract_strided_slice %965 {offsets = [0, 0], sizes = [2, 64], strides = [1, 1]} : vector<2x96xf32> to vector<2x64xf32>
    %968 = arith.addf %966, %967 : vector<2x64xf32>
    %969 = arith.negf %968 : vector<2x64xf32>
    %970 = math.exp %969 : vector<2x64xf32>
    %cst_213 = arith.constant 1.000000e+00 : f32
    %971 = vector.broadcast %cst_213 : f32 to vector<2x64xf32>
    %972 = arith.addf %971, %970 : vector<2x64xf32>
    %973 = arith.divf %971, %972 : vector<2x64xf32>
    %974 = vector.extract_strided_slice %973 {offsets = [0, 0], sizes = [2, 32], strides = [1, 1]} : vector<2x64xf32> to vector<2x32xf32>
    %975 = vector.extract_strided_slice %973 {offsets = [0, 32], sizes = [2, 32], strides = [1, 1]} : vector<2x64xf32> to vector<2x32xf32>
    %976 = vector.extract_strided_slice %962 {offsets = [0, 64], sizes = [2, 32], strides = [1, 1]} : vector<2x96xf32> to vector<2x32xf32>
    %977 = vector.extract_strided_slice %965 {offsets = [0, 64], sizes = [2, 32], strides = [1, 1]} : vector<2x96xf32> to vector<2x32xf32>
    %978 = arith.mulf %974, %977 : vector<2x32xf32>
    %979 = arith.addf %976, %978 : vector<2x32xf32>
    %980 = math.tanh %979 : vector<2x32xf32>
    %cst_214 = arith.constant 1.000000e+00 : f32
    %981 = vector.broadcast %cst_214 : f32 to vector<2x32xf32>
    %982 = arith.subf %981, %975 : vector<2x32xf32>
    %983 = arith.mulf %982, %980 : vector<2x32xf32>
    %984 = arith.mulf %975, %936 : vector<2x32xf32>
    %985 = arith.addf %983, %984 : vector<2x32xf32>
    %cst_215 = arith.constant dense<0.000000e+00> : vector<2x96xf32>
    %986 = tpu.matmul %959, %877, %cst_215 {dimension_numbers = #tpu.dot_dimension_numbers<[1], [0], [0], [1], [0, 0, 1, 1], [], []>} : vector<2x32xf32>, vector<32x96xf32>, vector<2x96xf32> -> vector<2x96xf32>
    %987 = vector.broadcast %879 : vector<1x96xf32> to vector<2x96xf32>
    %988 = arith.addf %986, %987 : vector<2x96xf32>
    %989 = vector.extract_strided_slice %875 {offsets = [0, 0], sizes = [2, 64], strides = [1, 1]} : vector<2x96xf32> to vector<2x64xf32>
    %990 = vector.extract_strided_slice %988 {offsets = [0, 0], sizes = [2, 64], strides = [1, 1]} : vector<2x96xf32> to vector<2x64xf32>
    %991 = arith.addf %989, %990 : vector<2x64xf32>
    %992 = arith.negf %991 : vector<2x64xf32>
    %993 = math.exp %992 : vector<2x64xf32>
    %cst_216 = arith.constant 1.000000e+00 : f32
    %994 = vector.broadcast %cst_216 : f32 to vector<2x64xf32>
    %995 = arith.addf %994, %993 : vector<2x64xf32>
    %996 = arith.divf %994, %995 : vector<2x64xf32>
    %997 = vector.extract_strided_slice %996 {offsets = [0, 0], sizes = [2, 32], strides = [1, 1]} : vector<2x64xf32> to vector<2x32xf32>
    %998 = vector.extract_strided_slice %996 {offsets = [0, 32], sizes = [2, 32], strides = [1, 1]} : vector<2x64xf32> to vector<2x32xf32>
    %999 = vector.extract_strided_slice %875 {offsets = [0, 64], sizes = [2, 32], strides = [1, 1]} : vector<2x96xf32> to vector<2x32xf32>
    %1000 = vector.extract_strided_slice %988 {offsets = [0, 64], sizes = [2, 32], strides = [1, 1]} : vector<2x96xf32> to vector<2x32xf32>
    %1001 = arith.mulf %997, %1000 : vector<2x32xf32>
    %1002 = arith.addf %999, %1001 : vector<2x32xf32>
    %1003 = math.tanh %1002 : vector<2x32xf32>
    %cst_217 = arith.constant 1.000000e+00 : f32
    %1004 = vector.broadcast %cst_217 : f32 to vector<2x32xf32>
    %1005 = arith.subf %1004, %998 : vector<2x32xf32>
    %1006 = arith.mulf %1005, %1003 : vector<2x32xf32>
    %1007 = arith.mulf %998, %959 : vector<2x32xf32>
    %1008 = arith.addf %1006, %1007 : vector<2x32xf32>
    %cst_218 = arith.constant dense<0.000000e+00> : vector<2x96xf32>
    %1009 = tpu.matmul %1008, %881, %cst_218 {dimension_numbers = #tpu.dot_dimension_numbers<[1], [0], [0], [1], [0, 0, 1, 1], [], []>} : vector<2x32xf32>, vector<32x96xf32>, vector<2x96xf32> -> vector<2x96xf32>
    %1010 = vector.broadcast %883 : vector<1x96xf32> to vector<2x96xf32>
    %1011 = arith.addf %1009, %1010 : vector<2x96xf32>
    %cst_219 = arith.constant dense<0.000000e+00> : vector<2x96xf32>
    %1012 = tpu.matmul %985, %885, %cst_219 {dimension_numbers = #tpu.dot_dimension_numbers<[1], [0], [0], [1], [0, 0, 1, 1], [], []>} : vector<2x32xf32>, vector<32x96xf32>, vector<2x96xf32> -> vector<2x96xf32>
    %1013 = vector.broadcast %887 : vector<1x96xf32> to vector<2x96xf32>
    %1014 = arith.addf %1012, %1013 : vector<2x96xf32>
    %1015 = vector.extract_strided_slice %1011 {offsets = [0, 0], sizes = [2, 64], strides = [1, 1]} : vector<2x96xf32> to vector<2x64xf32>
    %1016 = vector.extract_strided_slice %1014 {offsets = [0, 0], sizes = [2, 64], strides = [1, 1]} : vector<2x96xf32> to vector<2x64xf32>
    %1017 = arith.addf %1015, %1016 : vector<2x64xf32>
    %1018 = arith.negf %1017 : vector<2x64xf32>
    %1019 = math.exp %1018 : vector<2x64xf32>
    %cst_220 = arith.constant 1.000000e+00 : f32
    %1020 = vector.broadcast %cst_220 : f32 to vector<2x64xf32>
    %1021 = arith.addf %1020, %1019 : vector<2x64xf32>
    %1022 = arith.divf %1020, %1021 : vector<2x64xf32>
    %1023 = vector.extract_strided_slice %1022 {offsets = [0, 0], sizes = [2, 32], strides = [1, 1]} : vector<2x64xf32> to vector<2x32xf32>
    %1024 = vector.extract_strided_slice %1022 {offsets = [0, 32], sizes = [2, 32], strides = [1, 1]} : vector<2x64xf32> to vector<2x32xf32>
    %1025 = vector.extract_strided_slice %1011 {offsets = [0, 64], sizes = [2, 32], strides = [1, 1]} : vector<2x96xf32> to vector<2x32xf32>
    %1026 = vector.extract_strided_slice %1014 {offsets = [0, 64], sizes = [2, 32], strides = [1, 1]} : vector<2x96xf32> to vector<2x32xf32>
    %1027 = arith.mulf %1023, %1026 : vector<2x32xf32>
    %1028 = arith.addf %1025, %1027 : vector<2x32xf32>
    %1029 = math.tanh %1028 : vector<2x32xf32>
    %cst_221 = arith.constant 1.000000e+00 : f32
    %1030 = vector.broadcast %cst_221 : f32 to vector<2x32xf32>
    %1031 = arith.subf %1030, %1024 : vector<2x32xf32>
    %1032 = arith.mulf %1031, %1029 : vector<2x32xf32>
    %1033 = arith.mulf %1024, %985 : vector<2x32xf32>
    %1034 = arith.addf %1032, %1033 : vector<2x32xf32>
    %cst_222 = arith.constant dense<0.000000e+00> : vector<2x96xf32>
    %1035 = tpu.matmul %1008, %877, %cst_222 {dimension_numbers = #tpu.dot_dimension_numbers<[1], [0], [0], [1], [0, 0, 1, 1], [], []>} : vector<2x32xf32>, vector<32x96xf32>, vector<2x96xf32> -> vector<2x96xf32>
    %1036 = vector.broadcast %879 : vector<1x96xf32> to vector<2x96xf32>
    %1037 = arith.addf %1035, %1036 : vector<2x96xf32>
    %1038 = vector.extract_strided_slice %875 {offsets = [0, 0], sizes = [2, 64], strides = [1, 1]} : vector<2x96xf32> to vector<2x64xf32>
    %1039 = vector.extract_strided_slice %1037 {offsets = [0, 0], sizes = [2, 64], strides = [1, 1]} : vector<2x96xf32> to vector<2x64xf32>
    %1040 = arith.addf %1038, %1039 : vector<2x64xf32>
    %1041 = arith.negf %1040 : vector<2x64xf32>
    %1042 = math.exp %1041 : vector<2x64xf32>
    %cst_223 = arith.constant 1.000000e+00 : f32
    %1043 = vector.broadcast %cst_223 : f32 to vector<2x64xf32>
    %1044 = arith.addf %1043, %1042 : vector<2x64xf32>
    %1045 = arith.divf %1043, %1044 : vector<2x64xf32>
    %1046 = vector.extract_strided_slice %1045 {offsets = [0, 0], sizes = [2, 32], strides = [1, 1]} : vector<2x64xf32> to vector<2x32xf32>
    %1047 = vector.extract_strided_slice %1045 {offsets = [0, 32], sizes = [2, 32], strides = [1, 1]} : vector<2x64xf32> to vector<2x32xf32>
    %1048 = vector.extract_strided_slice %875 {offsets = [0, 64], sizes = [2, 32], strides = [1, 1]} : vector<2x96xf32> to vector<2x32xf32>
    %1049 = vector.extract_strided_slice %1037 {offsets = [0, 64], sizes = [2, 32], strides = [1, 1]} : vector<2x96xf32> to vector<2x32xf32>
    %1050 = arith.mulf %1046, %1049 : vector<2x32xf32>
    %1051 = arith.addf %1048, %1050 : vector<2x32xf32>
    %1052 = math.tanh %1051 : vector<2x32xf32>
    %cst_224 = arith.constant 1.000000e+00 : f32
    %1053 = vector.broadcast %cst_224 : f32 to vector<2x32xf32>
    %1054 = arith.subf %1053, %1047 : vector<2x32xf32>
    %1055 = arith.mulf %1054, %1052 : vector<2x32xf32>
    %1056 = arith.mulf %1047, %1008 : vector<2x32xf32>
    %1057 = arith.addf %1055, %1056 : vector<2x32xf32>
    %cst_225 = arith.constant dense<0.000000e+00> : vector<2x96xf32>
    %1058 = tpu.matmul %1057, %881, %cst_225 {dimension_numbers = #tpu.dot_dimension_numbers<[1], [0], [0], [1], [0, 0, 1, 1], [], []>} : vector<2x32xf32>, vector<32x96xf32>, vector<2x96xf32> -> vector<2x96xf32>
    %1059 = vector.broadcast %883 : vector<1x96xf32> to vector<2x96xf32>
    %1060 = arith.addf %1058, %1059 : vector<2x96xf32>
    %cst_226 = arith.constant dense<0.000000e+00> : vector<2x96xf32>
    %1061 = tpu.matmul %1034, %885, %cst_226 {dimension_numbers = #tpu.dot_dimension_numbers<[1], [0], [0], [1], [0, 0, 1, 1], [], []>} : vector<2x32xf32>, vector<32x96xf32>, vector<2x96xf32> -> vector<2x96xf32>
    %1062 = vector.broadcast %887 : vector<1x96xf32> to vector<2x96xf32>
    %1063 = arith.addf %1061, %1062 : vector<2x96xf32>
    %1064 = vector.extract_strided_slice %1060 {offsets = [0, 0], sizes = [2, 64], strides = [1, 1]} : vector<2x96xf32> to vector<2x64xf32>
    %1065 = vector.extract_strided_slice %1063 {offsets = [0, 0], sizes = [2, 64], strides = [1, 1]} : vector<2x96xf32> to vector<2x64xf32>
    %1066 = arith.addf %1064, %1065 : vector<2x64xf32>
    %1067 = arith.negf %1066 : vector<2x64xf32>
    %1068 = math.exp %1067 : vector<2x64xf32>
    %cst_227 = arith.constant 1.000000e+00 : f32
    %1069 = vector.broadcast %cst_227 : f32 to vector<2x64xf32>
    %1070 = arith.addf %1069, %1068 : vector<2x64xf32>
    %1071 = arith.divf %1069, %1070 : vector<2x64xf32>
    %1072 = vector.extract_strided_slice %1071 {offsets = [0, 0], sizes = [2, 32], strides = [1, 1]} : vector<2x64xf32> to vector<2x32xf32>
    %1073 = vector.extract_strided_slice %1071 {offsets = [0, 32], sizes = [2, 32], strides = [1, 1]} : vector<2x64xf32> to vector<2x32xf32>
    %1074 = vector.extract_strided_slice %1060 {offsets = [0, 64], sizes = [2, 32], strides = [1, 1]} : vector<2x96xf32> to vector<2x32xf32>
    %1075 = vector.extract_strided_slice %1063 {offsets = [0, 64], sizes = [2, 32], strides = [1, 1]} : vector<2x96xf32> to vector<2x32xf32>
    %1076 = arith.mulf %1072, %1075 : vector<2x32xf32>
    %1077 = arith.addf %1074, %1076 : vector<2x32xf32>
    %1078 = math.tanh %1077 : vector<2x32xf32>
    %cst_228 = arith.constant 1.000000e+00 : f32
    %1079 = vector.broadcast %cst_228 : f32 to vector<2x32xf32>
    %1080 = arith.subf %1079, %1073 : vector<2x32xf32>
    %1081 = arith.mulf %1080, %1078 : vector<2x32xf32>
    %1082 = arith.mulf %1073, %1034 : vector<2x32xf32>
    %1083 = arith.addf %1081, %1082 : vector<2x32xf32>
    %cst_229 = arith.constant dense<0.000000e+00> : vector<2x96xf32>
    %1084 = tpu.matmul %1057, %877, %cst_229 {dimension_numbers = #tpu.dot_dimension_numbers<[1], [0], [0], [1], [0, 0, 1, 1], [], []>} : vector<2x32xf32>, vector<32x96xf32>, vector<2x96xf32> -> vector<2x96xf32>
    %1085 = vector.broadcast %879 : vector<1x96xf32> to vector<2x96xf32>
    %1086 = arith.addf %1084, %1085 : vector<2x96xf32>
    %1087 = vector.extract_strided_slice %875 {offsets = [0, 0], sizes = [2, 64], strides = [1, 1]} : vector<2x96xf32> to vector<2x64xf32>
    %1088 = vector.extract_strided_slice %1086 {offsets = [0, 0], sizes = [2, 64], strides = [1, 1]} : vector<2x96xf32> to vector<2x64xf32>
    %1089 = arith.addf %1087, %1088 : vector<2x64xf32>
    %1090 = arith.negf %1089 : vector<2x64xf32>
    %1091 = math.exp %1090 : vector<2x64xf32>
    %cst_230 = arith.constant 1.000000e+00 : f32
    %1092 = vector.broadcast %cst_230 : f32 to vector<2x64xf32>
    %1093 = arith.addf %1092, %1091 : vector<2x64xf32>
    %1094 = arith.divf %1092, %1093 : vector<2x64xf32>
    %1095 = vector.extract_strided_slice %1094 {offsets = [0, 0], sizes = [2, 32], strides = [1, 1]} : vector<2x64xf32> to vector<2x32xf32>
    %1096 = vector.extract_strided_slice %1094 {offsets = [0, 32], sizes = [2, 32], strides = [1, 1]} : vector<2x64xf32> to vector<2x32xf32>
    %1097 = vector.extract_strided_slice %875 {offsets = [0, 64], sizes = [2, 32], strides = [1, 1]} : vector<2x96xf32> to vector<2x32xf32>
    %1098 = vector.extract_strided_slice %1086 {offsets = [0, 64], sizes = [2, 32], strides = [1, 1]} : vector<2x96xf32> to vector<2x32xf32>
    %1099 = arith.mulf %1095, %1098 : vector<2x32xf32>
    %1100 = arith.addf %1097, %1099 : vector<2x32xf32>
    %1101 = math.tanh %1100 : vector<2x32xf32>
    %cst_231 = arith.constant 1.000000e+00 : f32
    %1102 = vector.broadcast %cst_231 : f32 to vector<2x32xf32>
    %1103 = arith.subf %1102, %1096 : vector<2x32xf32>
    %1104 = arith.mulf %1103, %1101 : vector<2x32xf32>
    %1105 = arith.mulf %1096, %1057 : vector<2x32xf32>
    %1106 = arith.addf %1104, %1105 : vector<2x32xf32>
    %cst_232 = arith.constant dense<0.000000e+00> : vector<2x96xf32>
    %1107 = tpu.matmul %1106, %881, %cst_232 {dimension_numbers = #tpu.dot_dimension_numbers<[1], [0], [0], [1], [0, 0, 1, 1], [], []>} : vector<2x32xf32>, vector<32x96xf32>, vector<2x96xf32> -> vector<2x96xf32>
    %1108 = vector.broadcast %883 : vector<1x96xf32> to vector<2x96xf32>
    %1109 = arith.addf %1107, %1108 : vector<2x96xf32>
    %cst_233 = arith.constant dense<0.000000e+00> : vector<2x96xf32>
    %1110 = tpu.matmul %1083, %885, %cst_233 {dimension_numbers = #tpu.dot_dimension_numbers<[1], [0], [0], [1], [0, 0, 1, 1], [], []>} : vector<2x32xf32>, vector<32x96xf32>, vector<2x96xf32> -> vector<2x96xf32>
    %1111 = vector.broadcast %887 : vector<1x96xf32> to vector<2x96xf32>
    %1112 = arith.addf %1110, %1111 : vector<2x96xf32>
    %1113 = vector.extract_strided_slice %1109 {offsets = [0, 0], sizes = [2, 64], strides = [1, 1]} : vector<2x96xf32> to vector<2x64xf32>
    %1114 = vector.extract_strided_slice %1112 {offsets = [0, 0], sizes = [2, 64], strides = [1, 1]} : vector<2x96xf32> to vector<2x64xf32>
    %1115 = arith.addf %1113, %1114 : vector<2x64xf32>
    %1116 = arith.negf %1115 : vector<2x64xf32>
    %1117 = math.exp %1116 : vector<2x64xf32>
    %cst_234 = arith.constant 1.000000e+00 : f32
    %1118 = vector.broadcast %cst_234 : f32 to vector<2x64xf32>
    %1119 = arith.addf %1118, %1117 : vector<2x64xf32>
    %1120 = arith.divf %1118, %1119 : vector<2x64xf32>
    %1121 = vector.extract_strided_slice %1120 {offsets = [0, 0], sizes = [2, 32], strides = [1, 1]} : vector<2x64xf32> to vector<2x32xf32>
    %1122 = vector.extract_strided_slice %1120 {offsets = [0, 32], sizes = [2, 32], strides = [1, 1]} : vector<2x64xf32> to vector<2x32xf32>
    %1123 = vector.extract_strided_slice %1109 {offsets = [0, 64], sizes = [2, 32], strides = [1, 1]} : vector<2x96xf32> to vector<2x32xf32>
    %1124 = vector.extract_strided_slice %1112 {offsets = [0, 64], sizes = [2, 32], strides = [1, 1]} : vector<2x96xf32> to vector<2x32xf32>
    %1125 = arith.mulf %1121, %1124 : vector<2x32xf32>
    %1126 = arith.addf %1123, %1125 : vector<2x32xf32>
    %1127 = math.tanh %1126 : vector<2x32xf32>
    %cst_235 = arith.constant 1.000000e+00 : f32
    %1128 = vector.broadcast %cst_235 : f32 to vector<2x32xf32>
    %1129 = arith.subf %1128, %1122 : vector<2x32xf32>
    %1130 = arith.mulf %1129, %1127 : vector<2x32xf32>
    %1131 = arith.mulf %1122, %1083 : vector<2x32xf32>
    %1132 = arith.addf %1130, %1131 : vector<2x32xf32>
    %cst_236 = arith.constant dense<0.000000e+00> : vector<2x96xf32>
    %1133 = tpu.matmul %1106, %877, %cst_236 {dimension_numbers = #tpu.dot_dimension_numbers<[1], [0], [0], [1], [0, 0, 1, 1], [], []>} : vector<2x32xf32>, vector<32x96xf32>, vector<2x96xf32> -> vector<2x96xf32>
    %1134 = vector.broadcast %879 : vector<1x96xf32> to vector<2x96xf32>
    %1135 = arith.addf %1133, %1134 : vector<2x96xf32>
    %1136 = vector.extract_strided_slice %875 {offsets = [0, 0], sizes = [2, 64], strides = [1, 1]} : vector<2x96xf32> to vector<2x64xf32>
    %1137 = vector.extract_strided_slice %1135 {offsets = [0, 0], sizes = [2, 64], strides = [1, 1]} : vector<2x96xf32> to vector<2x64xf32>
    %1138 = arith.addf %1136, %1137 : vector<2x64xf32>
    %1139 = arith.negf %1138 : vector<2x64xf32>
    %1140 = math.exp %1139 : vector<2x64xf32>
    %cst_237 = arith.constant 1.000000e+00 : f32
    %1141 = vector.broadcast %cst_237 : f32 to vector<2x64xf32>
    %1142 = arith.addf %1141, %1140 : vector<2x64xf32>
    %1143 = arith.divf %1141, %1142 : vector<2x64xf32>
    %1144 = vector.extract_strided_slice %1143 {offsets = [0, 0], sizes = [2, 32], strides = [1, 1]} : vector<2x64xf32> to vector<2x32xf32>
    %1145 = vector.extract_strided_slice %1143 {offsets = [0, 32], sizes = [2, 32], strides = [1, 1]} : vector<2x64xf32> to vector<2x32xf32>
    %1146 = vector.extract_strided_slice %875 {offsets = [0, 64], sizes = [2, 32], strides = [1, 1]} : vector<2x96xf32> to vector<2x32xf32>
    %1147 = vector.extract_strided_slice %1135 {offsets = [0, 64], sizes = [2, 32], strides = [1, 1]} : vector<2x96xf32> to vector<2x32xf32>
    %1148 = arith.mulf %1144, %1147 : vector<2x32xf32>
    %1149 = arith.addf %1146, %1148 : vector<2x32xf32>
    %1150 = math.tanh %1149 : vector<2x32xf32>
    %cst_238 = arith.constant 1.000000e+00 : f32
    %1151 = vector.broadcast %cst_238 : f32 to vector<2x32xf32>
    %1152 = arith.subf %1151, %1145 : vector<2x32xf32>
    %1153 = arith.mulf %1152, %1150 : vector<2x32xf32>
    %1154 = arith.mulf %1145, %1106 : vector<2x32xf32>
    %1155 = arith.addf %1153, %1154 : vector<2x32xf32>
    %cst_239 = arith.constant dense<0.000000e+00> : vector<2x96xf32>
    %1156 = tpu.matmul %1155, %881, %cst_239 {dimension_numbers = #tpu.dot_dimension_numbers<[1], [0], [0], [1], [0, 0, 1, 1], [], []>} : vector<2x32xf32>, vector<32x96xf32>, vector<2x96xf32> -> vector<2x96xf32>
    %1157 = vector.broadcast %883 : vector<1x96xf32> to vector<2x96xf32>
    %1158 = arith.addf %1156, %1157 : vector<2x96xf32>
    %cst_240 = arith.constant dense<0.000000e+00> : vector<2x96xf32>
    %1159 = tpu.matmul %1132, %885, %cst_240 {dimension_numbers = #tpu.dot_dimension_numbers<[1], [0], [0], [1], [0, 0, 1, 1], [], []>} : vector<2x32xf32>, vector<32x96xf32>, vector<2x96xf32> -> vector<2x96xf32>
    %1160 = vector.broadcast %887 : vector<1x96xf32> to vector<2x96xf32>
    %1161 = arith.addf %1159, %1160 : vector<2x96xf32>
    %1162 = vector.extract_strided_slice %1158 {offsets = [0, 0], sizes = [2, 64], strides = [1, 1]} : vector<2x96xf32> to vector<2x64xf32>
    %1163 = vector.extract_strided_slice %1161 {offsets = [0, 0], sizes = [2, 64], strides = [1, 1]} : vector<2x96xf32> to vector<2x64xf32>
    %1164 = arith.addf %1162, %1163 : vector<2x64xf32>
    %1165 = arith.negf %1164 : vector<2x64xf32>
    %1166 = math.exp %1165 : vector<2x64xf32>
    %cst_241 = arith.constant 1.000000e+00 : f32
    %1167 = vector.broadcast %cst_241 : f32 to vector<2x64xf32>
    %1168 = arith.addf %1167, %1166 : vector<2x64xf32>
    %1169 = arith.divf %1167, %1168 : vector<2x64xf32>
    %1170 = vector.extract_strided_slice %1169 {offsets = [0, 0], sizes = [2, 32], strides = [1, 1]} : vector<2x64xf32> to vector<2x32xf32>
    %1171 = vector.extract_strided_slice %1169 {offsets = [0, 32], sizes = [2, 32], strides = [1, 1]} : vector<2x64xf32> to vector<2x32xf32>
    %1172 = vector.extract_strided_slice %1158 {offsets = [0, 64], sizes = [2, 32], strides = [1, 1]} : vector<2x96xf32> to vector<2x32xf32>
    %1173 = vector.extract_strided_slice %1161 {offsets = [0, 64], sizes = [2, 32], strides = [1, 1]} : vector<2x96xf32> to vector<2x32xf32>
    %1174 = arith.mulf %1170, %1173 : vector<2x32xf32>
    %1175 = arith.addf %1172, %1174 : vector<2x32xf32>
    %1176 = math.tanh %1175 : vector<2x32xf32>
    %cst_242 = arith.constant 1.000000e+00 : f32
    %1177 = vector.broadcast %cst_242 : f32 to vector<2x32xf32>
    %1178 = arith.subf %1177, %1171 : vector<2x32xf32>
    %1179 = arith.mulf %1178, %1176 : vector<2x32xf32>
    %1180 = arith.mulf %1171, %1132 : vector<2x32xf32>
    %1181 = arith.addf %1179, %1180 : vector<2x32xf32>
    %1182 = tpu.concatenate %936, %985, %1034, %1083, %1132, %1181 in 0 : vector<2x32xf32>, vector<2x32xf32>, vector<2x32xf32>, vector<2x32xf32>, vector<2x32xf32>, vector<2x32xf32> -> vector<12x32xf32>
    %c0_243 = arith.constant 0 : index
    %c0_244 = arith.constant 0 : index
    %1183 = vector.load %arg18[%c0_243, %c0_244] : memref<32x32xf32, #tpu.memory_space<vmem>>, vector<32x32xf32>
    %cst_245 = arith.constant dense<0.000000e+00> : vector<12x32xf32>
    %1184 = tpu.matmul %1182, %1183, %cst_245 {dimension_numbers = #tpu.dot_dimension_numbers<[1], [0], [0], [1], [0, 0, 1, 1], [], []>} : vector<12x32xf32>, vector<32x32xf32>, vector<12x32xf32> -> vector<12x32xf32>
    %c0_246 = arith.constant 0 : index
    %c0_247 = arith.constant 0 : index
    %1185 = vector.load %arg19[%c0_246, %c0_247] : memref<1x32xf32, #tpu.memory_space<vmem>>, vector<1x32xf32>
    %1186 = vector.broadcast %1185 : vector<1x32xf32> to vector<12x32xf32>
    %1187 = arith.addf %1184, %1186 : vector<12x32xf32>
    %1188 = math.tanh %1187 : vector<12x32xf32>
    %c0_248 = arith.constant 0 : index
    %c0_249 = arith.constant 0 : index
    %1189 = vector.load %arg20[%c0_248, %c0_249] : memref<32x32xf32, #tpu.memory_space<vmem>>, vector<32x32xf32>
    %cst_250 = arith.constant dense<0.000000e+00> : vector<12x32xf32>
    %1190 = tpu.matmul %1188, %1189, %cst_250 {dimension_numbers = #tpu.dot_dimension_numbers<[1], [0], [0], [1], [0, 0, 1, 1], [], []>} : vector<12x32xf32>, vector<32x32xf32>, vector<12x32xf32> -> vector<12x32xf32>
    %c0_251 = arith.constant 0 : index
    %c0_252 = arith.constant 0 : index
    %1191 = vector.load %arg21[%c0_251, %c0_252] : memref<1x32xf32, #tpu.memory_space<vmem>>, vector<1x32xf32>
    %1192 = vector.broadcast %1191 : vector<1x32xf32> to vector<12x32xf32>
    %1193 = arith.addf %1190, %1192 : vector<12x32xf32>
    %c0_253 = arith.constant 0 : index
    %c0_254 = arith.constant 0 : index
    %1194 = vector.load %arg22[%c0_253, %c0_254] : memref<32x64xf32, #tpu.memory_space<vmem>>, vector<32x64xf32>
    %cst_255 = arith.constant dense<0.000000e+00> : vector<12x64xf32>
    %1195 = tpu.matmul %1193, %1194, %cst_255 {dimension_numbers = #tpu.dot_dimension_numbers<[1], [0], [0], [1], [0, 0, 1, 1], [], []>} : vector<12x32xf32>, vector<32x64xf32>, vector<12x64xf32> -> vector<12x64xf32>
    %c0_256 = arith.constant 0 : index
    %c0_257 = arith.constant 0 : index
    %1196 = vector.load %arg23[%c0_256, %c0_257] : memref<1x64xf32, #tpu.memory_space<vmem>>, vector<1x64xf32>
    %1197 = vector.broadcast %1196 : vector<1x64xf32> to vector<12x64xf32>
    %1198 = arith.addf %1195, %1197 : vector<12x64xf32>
    %cst_258 = arith.constant 0.000000e+00 : f32
    %1199 = vector.broadcast %cst_258 : f32 to vector<12x32xf32>
    %1200 = tpu.concatenate %1198, %1193, %1199 in 1 : vector<12x64xf32>, vector<12x32xf32>, vector<12x32xf32> -> vector<12x128xf32>
    %c0_259 = arith.constant 0 : index
    %c0_260 = arith.constant 0 : index
    %1201 = vector.load %arg26[%c0_259, %c0_260] : memref<12x128xf32, #tpu.memory_space<vmem>>, vector<12x128xf32>
    tpu.vector_store %arg26[%c0_259, %c0_260], %1200 {strides = array<i32>} : memref<12x128xf32, #tpu.memory_space<vmem>>, vector<12x128xf32>,
    return
  }
}

</mosaic_0001>

<bundles_post_ra>
// kernel: neg.1
= control target key start
LH: loop header
LB: loop body
LE: loop exit
PB: predicated region body
PF: predicated region fallthrough
CT: control target
= control target key end

     0   :  { %s24_s0 = inlined_call_operand.vmem [shape: s32[2], index: 0, kind: input, shape index: {}]   ;;  %s25_s1 = inlined_call_operand.vmem [shape: s32[2], index: 1, kind: output, shape index: {}]  }
   0x1   :  { %v2_v0 = vld [vmem:[%s24_s0] sm:$0x1] }
   0x2   :  { %v5_v1 = vsub.s32 0, %v2_v0 }
   0x4   :  { %7 = vst [vmem:[%s25_s1] sm:$0x1] %v5_v1 }

// kernel: textvae_forward.1
= control target key start
LH: loop header
LB: loop body
LE: loop exit
PB: predicated region body
PF: predicated region fallthrough
CT: control target
= control target key end

     0   :  { %s10290_s0 = inlined_call_operand.vmem [shape: f32[8,64], index: 0, kind: input, shape index: {}]   ;;  %s10291_s1 = inlined_call_operand.vmem [shape: f32[4,32], index: 1, kind: input, shape index: {}]   ;;  %s10292_s2 = inlined_call_operand.vmem [shape: f32[64,32], index: 2, kind: input, shape index: {}]   ;;  %s10293_s3 = inlined_call_operand.hbm [shape: f32[1,32], index: 3, kind: input, shape index: {}]   ;;  %s10294_s4 = inlined_call_operand.vmem [shape: f32[2,32,96], index: 4, kind: input, shape index: {}]   ;;  %s10295_s5 = inlined_call_operand.vmem [shape: f32[2,32,96], index: 5, kind: input, shape index: {}]   ;;  %s10296_s6 = inlined_call_operand.hbm [shape: f32[2,1,96], index: 6, kind: input, shape index: {}]   ;;  %s10297_s7 = inlined_call_operand.hbm [shape: f32[2,1,96], index: 7, kind: input, shape index: {}]   ;;  %s10298_s8 = inlined_call_operand.vmem [shape: f32[2,64,96], index: 8, kind: input, shape index: {}]   ;;  %s10299_s9 = inlined_call_operand.vmem [shape: f32[2,32,96], index: 9, kind: input, shape index: {}]   ;;  %s10300_s10 = inlined_call_operand.hbm [shape: f32[2,1,96], index: 10, kind: input, shape index: {}]   ;;  %s10301_s11 = inlined_call_operand.hbm [shape: f32[2,1,96], index: 11, kind: input, shape index: {}]   ;;  %s10302_s12 = inlined_call_operand.hbm [shape: f32[64,64], index: 12, kind: input, shape index: {}]   ;;  %s10303_s13 = inlined_call_operand.hbm [shape: f32[1,64], index: 13, kind: input, shape index: {}]   ;;  %s10304_s14 = inlined_call_operand.hbm [shape: f32[2,32,96], index: 14, kind: input, shape index: {}]   ;;  %s10305_s15 = inlined_call_operand.hbm [shape: f32[2,32,96], index: 15, kind: input, shape index: {}]   ;;  %s10306_s16 = inlined_call_operand.hbm [shape: f32[2,1,96], index: 16, kind: input, shape index: {}]   ;;  %s10307_s17 = inlined_call_operand.hbm [shape: f32[2,1,96], index: 17, kind: input, shape index: {}]   ;;  %s10308_s18 = inlined_call_operand.vmem [shape: f32[32,32], index: 18, kind: input, shape index: {}]   ;;  %s10309_s19 = inlined_call_operand.hbm [shape: f32[1,32], index: 19, kind: input, shape index: {}]   ;;  %s10310_s20 = inlined_call_operand.hbm [shape: f32[32,32], index: 20, kind: input, shape index: {}]   ;;  %s10311_s21 = inlined_call_operand.hbm [shape: f32[1,32], index: 21, kind: input, shape index: {}]   ;;  %s10312_s22 = inlined_call_operand.hbm [shape: f32[32,64], index: 22, kind: input, shape index: {}]   ;;  %s10313_s23 = inlined_call_operand.vmem [shape: f32[1,64], index: 23, kind: input, shape index: {}]   ;;  %s10314_s24 = inlined_call_operand.vmem [shape: f32[32,16], index: 24, kind: input, shape index: {}]   ;;  %s10315_s25 = inlined_call_operand.vmem [shape: f32[1,16], index: 25, kind: input, shape index: {}]   ;;  %s10316_s26 = inlined_call_operand.vmem [shape: f32[12,128], index: 26, kind: output, shape index: {0}]   ;;  %s10317_s27 = inlined_call_operand.vmem [shape: f32[2,256], index: 27, kind: output, shape index: {1}]  }
   0x1   :  { %10329 = sst [smem:[#allocation33_spill]] %s10290_s0 }
   0x2   :  { %10330 = sst [smem:[#allocation34_spill]] %s10291_s1 }
   0x3   :  { %10331 = sst [smem:[#allocation35_spill]] %s10292_s2 }
   0x4   :  { %10332 = sst [smem:[#allocation36_spill]] %s10293_s3 }
   0x5   :  { %10333 = sst [smem:[#allocation37_spill]] %s10294_s4 }
   0x6   :  { %10334 = sst [smem:[#allocation38_spill]] %s10295_s5 }
   0x7   :  { %10335 = sst [smem:[#allocation39_spill]] %s10296_s6 }
   0x8   :  { %10336 = sst [smem:[#allocation40_spill]] %s10297_s7 }
   0x9   :  { %10337 = sst [smem:[#allocation41_spill]] %s10298_s8 }
   0xa   :  { %10338 = sst [smem:[#allocation42_spill]] %s10299_s9 }
   0xb   :  { %10339 = sst [smem:[#allocation43_spill]] %s10300_s10 }
   0xc   :  { %10340 = sst [smem:[#allocation44_spill]] %s10301_s11 }
   0xd   :  { %10341 = sst [smem:[#allocation45_spill]] %s10313_s23 }
   0xe   :  { %10342 = sst [smem:[#allocation46_spill]] %s10316_s26 }
   0xf   :  { %10343 = sst [smem:[#allocation47_spill]] %s10317_s27 }
  0x10   :  { %33 = vsyncpa [#allocation3], 0 }
  0x11   :  { %34 = vsyncpa [#allocation5], 0 }
  0x12   :  { %35 = vsyncpa [#allocation8], 0 }
  0x13   :  { %36 = vsyncpa [#allocation11], 0 }
  0x14   :  { %37 = vsyncpa [#allocation14], 0 }
  0x15   :  { %38 = vsyncpa [#allocation17], 0 }
  0x16   :  { %39 = vsyncpa [#allocation20], 0 }
  0x17   :  { %40 = vsyncpa [#allocation23], 0  ;;  %s8703_s7 = smov [#allocation4]   ;;  %s10344_s9 = sld [smem:[#allocation39_spill]] }
  0x18   :  { %s66_s4 = sshll.u32 %s8703_s7, 4  ;;  %s67_s4 = int_to_ptr.vmem [resolvable:$true] %s66_s4 }
  0x1d   :  { %s8357_s5 = scalar_lea.hbm %s10344_s9, 32 }
  0x1e   :  { %p8358_p0 = scmp.ne.s32.totalorder %s10344_s9, %s8357_s5  ;;  %p8361_p1 = scmp.lt.u32.totalorder %s8357_s5, %s10344_s9 }
  0x20   :  { %p8363_p2 = pnand %p8361_p1, %p8358_p0 }
  0x22   :  { %8366 = shalt.err (!%p8363_p2)
}
  0x23   :  { %s8367_s1 = scalar_lea.vmem %s67_s4, 32  ;;  %p8372_p4 = scmp.lt.s32.totalorder %s67_s4, %s67_s4 }
  0x24   :  { %p8368_p3 = scmp.ne.s32.totalorder %s67_s4, %s8367_s1  ;;  %p8373_p5 = scmp.lt.s32.totalorder %s8367_s1, %s8367_s1 }
  0x26   :  { %p8374_p6 = por %p8373_p5, %p8372_p4 }
  0x28   :  { %p8375_p7 = pnand %p8374_p6, %p8368_p3 }
  0x2a   :  { %8378 = shalt.err (!%p8375_p7)
}
  0x2b   :  { %s8704_s6 = smov 16   ;;  %s8705_s11 = smov 1  }
  0x2c   :  { %72 = dma.hbm_to_vmem [thread:$0]  %s10344_s9, 32, %s67_s4, [#allocation5], %s8704_s6, %s8704_s6, %s8705_s11  }
  0x2d   :  { %s8706_s7 = smov [#allocation7]   ;;  %s8707_s30 = smov [#allocation10]  }
  0x2e   :  { %s94_s8 = sshll.u32 %s8706_s7, 4  ;;  %s118_s5 = sshll.u32 %s8707_s30, 4  ;;  %s95_s8 = int_to_ptr.vmem [resolvable:$true] %s94_s8  ;;  %s119_s5 = int_to_ptr.vmem [resolvable:$true] %s118_s5 }
  0x2f   :  { %s10345_s10 = sld [smem:[#allocation43_spill]] }
  0x35   :  { %s8379_s29 = scalar_lea.hbm %s10345_s10, 32 }
  0x36   :  { %p8380_p8 = scmp.ne.s32.totalorder %s10345_s10, %s8379_s29  ;;  %p8383_p9 = scmp.lt.u32.totalorder %s8379_s29, %s10345_s10 }
  0x38   :  { %p8385_p10 = pnand %p8383_p9, %p8380_p8 }
  0x3a   :  { %8388 = shalt.err (!%p8385_p10)
}
  0x3b   :  { %s8389_s4 = scalar_lea.vmem %s95_s8, 32  ;;  %p8394_p12 = scmp.lt.s32.totalorder %s95_s8, %s95_s8 }
  0x3c   :  { %p8390_p11 = scmp.ne.s32.totalorder %s95_s8, %s8389_s4  ;;  %p8395_p13 = scmp.lt.s32.totalorder %s8389_s4, %s8389_s4 }
  0x3e   :  { %p8396_p0 = por %p8395_p13, %p8394_p12 }
  0x40   :  { %p8397_p1 = pnand %p8396_p0, %p8390_p11 }
  0x42   :  { %8400 = shalt.err (!%p8397_p1)
}
  0x43   :  { %100 = dma.hbm_to_vmem [thread:$0]  %s10345_s10, 32, %s95_s8, [#allocation8], %s8704_s6, %s8704_s6, %s8705_s11  }
  0x44   :  { %s8401_s27 = scalar_lea.hbm %s10302_s12, 1024 }
  0x45   :  { %p8402_p2 = scmp.ne.s32.totalorder %s10302_s12, %s8401_s27  ;;  %p8405_p3 = scmp.lt.u32.totalorder %s8401_s27, %s10302_s12 }
  0x47   :  { %p8407_p4 = pnand %p8405_p3, %p8402_p2 }
  0x49   :  { %8410 = shalt.err (!%p8407_p4)
}
  0x4a   :  { %s8411_s0 = scalar_lea.vmem %s119_s5, 1024  ;;  %p8416_p6 = scmp.lt.s32.totalorder %s119_s5, %s119_s5 }
  0x4b   :  { %p8412_p5 = scmp.ne.s32.totalorder %s119_s5, %s8411_s0  ;;  %p8417_p7 = scmp.lt.s32.totalorder %s8411_s0, %s8411_s0 }
  0x4d   :  { %p8418_p8 = por %p8417_p7, %p8416_p6 }
  0x4f   :  { %p8419_p9 = pnand %p8418_p8, %p8412_p5 }
  0x51   :  { %8422 = shalt.err (!%p8419_p9)
}
  0x52   :  { %s8708_s8 = smov 128   ;;  %s8709_s10 = smov 8  }
  0x53   :  { %124 = dma.hbm_to_vmem [thread:$0]  %s10302_s12, 1024, %s119_s5, [#allocation11], %s8708_s8, %s8708_s8, %s8709_s10  }
  0x54   :  { %s8710_s4 = smov [#allocation13]   ;;  %s8711_s2 = smov [#allocation16]  }
  0x55   :  { %s140_s9 = sshll.u32 %s8710_s4, 4  ;;  %s164_s26 = sshll.u32 %s8711_s2, 4  ;;  %s141_s9 = int_to_ptr.vmem [resolvable:$true] %s140_s9  ;;  %s165_s26 = int_to_ptr.vmem [resolvable:$true] %s164_s26 }
  0x56   :  { %s8423_s3 = scalar_lea.hbm %s10304_s14, 1024 }
  0x57   :  { %p8424_p10 = scmp.ne.s32.totalorder %s10304_s14, %s8423_s3  ;;  %p8427_p11 = scmp.lt.u32.totalorder %s8423_s3, %s10304_s14 }
  0x59   :  { %p8429_p12 = pnand %p8427_p11, %p8424_p10 }
  0x5b   :  { %8432 = shalt.err (!%p8429_p12)
}
  0x5c   :  { %s8433_s12 = scalar_lea.vmem %s141_s9, 1024  ;;  %p8438_p0 = scmp.lt.s32.totalorder %s141_s9, %s141_s9 }
  0x5d   :  { %p8434_p13 = scmp.ne.s32.totalorder %s141_s9, %s8433_s12  ;;  %p8439_p1 = scmp.lt.s32.totalorder %s8433_s12, %s8433_s12 }
  0x5f   :  { %p8440_p2 = por %p8439_p1, %p8438_p0 }
  0x61   :  { %p8441_p3 = pnand %p8440_p2, %p8434_p13 }
  0x63   :  { %8444 = shalt.err (!%p8441_p3)
}
  0x64   :  { %146 = dma.hbm_to_vmem [thread:$0]  %s10304_s14, 1024, %s141_s9, [#allocation14], %s8708_s8, %s8708_s8, %s8709_s10  }
  0x65   :  { %s8445_s2 = scalar_lea.hbm %s10306_s16, 32 }
  0x66   :  { %p8446_p4 = scmp.ne.s32.totalorder %s10306_s16, %s8445_s2  ;;  %p8449_p5 = scmp.lt.u32.totalorder %s8445_s2, %s10306_s16 }
  0x68   :  { %p8451_p6 = pnand %p8449_p5, %p8446_p4 }
  0x6a   :  { %8454 = shalt.err (!%p8451_p6)
}
  0x6b   :  { %s8455_s30 = scalar_lea.vmem %s165_s26, 32  ;;  %p8460_p8 = scmp.lt.s32.totalorder %s165_s26, %s165_s26 }
  0x6c   :  { %p8456_p7 = scmp.ne.s32.totalorder %s165_s26, %s8455_s30  ;;  %p8461_p9 = scmp.lt.s32.totalorder %s8455_s30, %s8455_s30 }
  0x6e   :  { %p8462_p10 = por %p8461_p9, %p8460_p8 }
  0x70   :  { %p8463_p11 = pnand %p8462_p10, %p8456_p7 }
  0x72   :  { %8466 = shalt.err (!%p8463_p11)
}
  0x73   :  { %170 = dma.hbm_to_vmem [thread:$0]  %s10306_s16, 32, %s165_s26, [#allocation17], %s8704_s6, %s8704_s6, %s8705_s11  }
  0x74   :  { %s8712_s28 = smov [#allocation19]   ;;  %s8713_s12 = smov [#allocation22]  }
  0x75   :  { %s191_s0 = sshll.u32 %s8712_s28, 4  ;;  %s213_s5 = sshll.u32 %s8713_s12, 4  ;;  %s192_s0 = int_to_ptr.vmem [resolvable:$true] %s191_s0  ;;  %s214_s5 = int_to_ptr.vmem [resolvable:$true] %s213_s5 }
  0x76   :  { %s8467_s4 = scalar_lea.hbm %s10309_s19, 16 }
  0x77   :  { %p8468_p12 = scmp.ne.s32.totalorder %s10309_s19, %s8467_s4  ;;  %p8471_p13 = scmp.lt.u32.totalorder %s8467_s4, %s10309_s19 }
  0x79   :  { %p8473_p0 = pnand %p8471_p13, %p8468_p12 }
  0x7b   :  { %8476 = shalt.err (!%p8473_p0)
}
  0x7c   :  { %s8477_s16 = scalar_lea.vmem %s192_s0, 16  ;;  %s8481_s26 = scalar_lea.vmem %s192_s0, 32 }
  0x7d   :  { %p8478_p1 = scmp.ne.s32.totalorder %s192_s0, %s8477_s16  ;;  %p8482_p2 = scmp.lt.s32.totalorder %s192_s0, %s192_s0 }
  0x7e   :  { %p8483_p3 = scmp.lt.s32.totalorder %s8481_s26, %s8477_s16 }
  0x80   :  { %p8484_p4 = por %p8483_p3, %p8482_p2 }
  0x82   :  { %p8485_p5 = pnand %p8484_p4, %p8478_p1 }
  0x84   :  { %8488 = shalt.err (!%p8485_p5)
}
  0x85   :  { %194 = dma.hbm_to_vmem [thread:$0]  %s10309_s19, 16, %s192_s0, [#allocation20]  }
  0x86   :  { %s8489_s28 = scalar_lea.hbm %s10311_s21, 16 }
  0x87   :  { %p8490_p6 = scmp.ne.s32.totalorder %s10311_s21, %s8489_s28  ;;  %p8493_p7 = scmp.lt.u32.totalorder %s8489_s28, %s10311_s21 }
  0x89   :  { %p8495_p8 = pnand %p8493_p7, %p8490_p6 }
  0x8b   :  { %8498 = shalt.err (!%p8495_p8)
}
  0x8c   :  { %s8499_s2 = scalar_lea.vmem %s214_s5, 16  ;;  %s8503_s23 = scalar_lea.vmem %s214_s5, 32 }
  0x8d   :  { %p8500_p9 = scmp.ne.s32.totalorder %s214_s5, %s8499_s2  ;;  %p8504_p10 = scmp.lt.s32.totalorder %s214_s5, %s214_s5 }
  0x8e   :  { %p8505_p11 = scmp.lt.s32.totalorder %s8503_s23, %s8499_s2 }
  0x90   :  { %p8506_p12 = por %p8505_p11, %p8504_p10 }
  0x92   :  { %p8507_p13 = pnand %p8506_p12, %p8500_p9 }
  0x94   :  { %8510 = shalt.err (!%p8507_p13)
}
  0x95   :  { %216 = dma.hbm_to_vmem [thread:$0]  %s10311_s21, 16, %s214_s5, [#allocation23]  }
  0x96   :  { %s8714_s27 = smov [#allocation2]   ;;  %s8715_s16 = smov [#allocation6]  }
  0x97   :  { %s53_s3 = sshll.u32 %s8714_s27, 4  ;;  %s78_s26 = sshll.u32 %s8715_s16, 4  ;;  %s54_s3 = int_to_ptr.vmem [resolvable:$true] %s53_s3  ;;  %s79_s26 = int_to_ptr.vmem [resolvable:$true] %s78_s26 }
  0x98   :  { %s10346_s14 = sld [smem:[#allocation36_spill]] }
  0x9e   :  { %s8511_s9 = scalar_lea.hbm %s10346_s14, 16 }
  0x9f   :  { %p8512_p0 = scmp.ne.s32.totalorder %s10346_s14, %s8511_s9  ;;  %p8515_p1 = scmp.lt.u32.totalorder %s8511_s9, %s10346_s14 }
  0xa1   :  { %p8517_p2 = pnand %p8515_p1, %p8512_p0 }
  0xa3   :  { %8520 = shalt.err (!%p8517_p2)
}
  0xa4   :  { %s8521_s21 = scalar_lea.vmem %s54_s3, 16  ;;  %s8525_s5 = scalar_lea.vmem %s54_s3, 32 }
  0xa5   :  { %p8522_p3 = scmp.ne.s32.totalorder %s54_s3, %s8521_s21  ;;  %p8526_p4 = scmp.lt.s32.totalorder %s54_s3, %s54_s3 }
  0xa6   :  { %p8527_p5 = scmp.lt.s32.totalorder %s8525_s5, %s8521_s21 }
  0xa8   :  { %p8528_p6 = por %p8527_p5, %p8526_p4 }
  0xaa   :  { %p8529_p7 = pnand %p8528_p6, %p8522_p3 }
  0xac   :  { %8532 = shalt.err (!%p8529_p7)
}
  0xad   :  { %56 = dma.hbm_to_vmem [thread:$0]  %s10346_s14, 16, %s54_s3, [#allocation3]  }
  0xae   :  { %s10347_s0 = sld [smem:[#allocation40_spill]] }
  0xb4   :  { %s8533_s27 = scalar_lea.hbm %s10347_s0, 32 }
  0xb5   :  { %p8534_p8 = scmp.ne.s32.totalorder %s10347_s0, %s8533_s27  ;;  %p8537_p9 = scmp.lt.u32.totalorder %s8533_s27, %s10347_s0 }
  0xb7   :  { %p8539_p10 = pnand %p8537_p9, %p8534_p8 }
  0xb9   :  { %8542 = shalt.err (!%p8539_p10)
}
  0xba   :  { %s8543_s28 = scalar_lea.vmem %s79_s26, 32  ;;  %p8548_p12 = scmp.lt.s32.totalorder %s79_s26, %s79_s26 }
  0xbb   :  { %p8544_p11 = scmp.ne.s32.totalorder %s79_s26, %s8543_s28  ;;  %p8549_p13 = scmp.lt.s32.totalorder %s8543_s28, %s8543_s28 }
  0xbd   :  { %p8550_p0 = por %p8549_p13, %p8548_p12 }
  0xbf   :  { %p8551_p1 = pnand %p8550_p0, %p8544_p11 }
  0xc1   :  { %8554 = shalt.err (!%p8551_p1)
}
  0xc2   :  { %84 = dma.hbm_to_vmem [thread:$0]  %s10347_s0, 32, %s79_s26, [#allocation5], %s8704_s6, %s8704_s6, %s8705_s11  }
  0xc3   :  { %s8716_s12 = smov [#allocation9]   ;;  %s8717_s1 = smov [#allocation12]  }
  0xc4   :  { %s106_s29 = sshll.u32 %s8716_s12, 4  ;;  %s131_s21 = sshll.u32 %s8717_s1, 4  ;;  %s107_s29 = int_to_ptr.vmem [resolvable:$true] %s106_s29  ;;  %s132_s21 = int_to_ptr.vmem [resolvable:$true] %s131_s21 }
  0xc5   :  { %s10348_s2 = sld [smem:[#allocation44_spill]] }
  0xcb   :  { %s8555_s23 = scalar_lea.hbm %s10348_s2, 32 }
  0xcc   :  { %p8556_p2 = scmp.ne.s32.totalorder %s10348_s2, %s8555_s23  ;;  %p8559_p3 = scmp.lt.u32.totalorder %s8555_s23, %s10348_s2 }
  0xce   :  { %p8561_p4 = pnand %p8559_p3, %p8556_p2 }
  0xd0   :  { %8564 = shalt.err (!%p8561_p4)
}
  0xd1   :  { %s8565_s26 = scalar_lea.vmem %s107_s29, 32  ;;  %p8570_p6 = scmp.lt.s32.totalorder %s107_s29, %s107_s29 }
  0xd2   :  { %p8566_p5 = scmp.ne.s32.totalorder %s107_s29, %s8565_s26  ;;  %p8571_p7 = scmp.lt.s32.totalorder %s8565_s26, %s8565_s26 }
  0xd4   :  { %p8572_p8 = por %p8571_p7, %p8570_p6 }
  0xd6   :  { %p8573_p9 = pnand %p8572_p8, %p8566_p5 }
  0xd8   :  { %8576 = shalt.err (!%p8573_p9)
}
  0xd9   :  { %112 = dma.hbm_to_vmem [thread:$0]  %s10348_s2, 32, %s107_s29, [#allocation8], %s8704_s6, %s8704_s6, %s8705_s11  }
  0xda   :  { %s8577_s3 = scalar_lea.hbm %s10303_s13, 16 }
  0xdb   :  { %p8578_p10 = scmp.ne.s32.totalorder %s10303_s13, %s8577_s3  ;;  %p8581_p11 = scmp.lt.u32.totalorder %s8577_s3, %s10303_s13 }
  0xdd   :  { %p8583_p12 = pnand %p8581_p11, %p8578_p10 }
  0xdf   :  { %8586 = shalt.err (!%p8583_p12)
}
  0xe0   :  { %s8587_s4 = scalar_lea.vmem %s132_s21, 16  ;;  %s8591_s23 = scalar_lea.vmem %s132_s21, 32 }
  0xe1   :  { %p8588_p13 = scmp.ne.s32.totalorder %s132_s21, %s8587_s4  ;;  %p8592_p0 = scmp.lt.s32.totalorder %s132_s21, %s132_s21 }
  0xe2   :  { %p8593_p1 = scmp.lt.s32.totalorder %s8591_s23, %s8587_s4 }
  0xe4   :  { %p8594_p2 = por %p8593_p1, %p8592_p0 }
  0xe6   :  { %p8595_p3 = pnand %p8594_p2, %p8588_p13 }
  0xe8   :  { %8598 = shalt.err (!%p8595_p3)
}
  0xe9   :  { %134 = dma.hbm_to_vmem [thread:$0]  %s10303_s13, 16, %s132_s21, [#allocation11]  }
  0xea   :  { %s8718_s19 = smov [#allocation15]   ;;  %s8719_s16 = smov [#allocation18]  }
  0xeb   :  { %s152_s27 = sshll.u32 %s8718_s19, 4  ;;  %s176_s7 = sshll.u32 %s8719_s16, 4  ;;  %s153_s27 = int_to_ptr.vmem [resolvable:$true] %s152_s27  ;;  %s177_s7 = int_to_ptr.vmem [resolvable:$true] %s176_s7 }
  0xec   :  { %s8599_s30 = scalar_lea.hbm %s10305_s15, 1024 }
  0xed   :  { %p8600_p4 = scmp.ne.s32.totalorder %s10305_s15, %s8599_s30  ;;  %p8603_p5 = scmp.lt.u32.totalorder %s8599_s30, %s10305_s15 }
  0xef   :  { %p8605_p6 = pnand %p8603_p5, %p8600_p4 }
  0xf1   :  { %8608 = shalt.err (!%p8605_p6)
}
  0xf2   :  { %s8609_s13 = scalar_lea.vmem %s153_s27, 1024  ;;  %p8614_p8 = scmp.lt.s32.totalorder %s153_s27, %s153_s27 }
  0xf3   :  { %p8610_p7 = scmp.ne.s32.totalorder %s153_s27, %s8609_s13  ;;  %p8615_p9 = scmp.lt.s32.totalorder %s8609_s13, %s8609_s13 }
  0xf5   :  { %p8616_p10 = por %p8615_p9, %p8614_p8 }
  0xf7   :  { %p8617_p11 = pnand %p8616_p10, %p8610_p7 }
  0xf9   :  { %8620 = shalt.err (!%p8617_p11)
}
  0xfa   :  { %158 = dma.hbm_to_vmem [thread:$0]  %s10305_s15, 1024, %s153_s27, [#allocation14], %s8708_s8, %s8708_s8, %s8709_s10  }
  0xfb   :  { %s8621_s4 = scalar_lea.hbm %s10307_s17, 32 }
  0xfc   :  { %p8622_p12 = scmp.ne.s32.totalorder %s10307_s17, %s8621_s4  ;;  %p8625_p13 = scmp.lt.u32.totalorder %s8621_s4, %s10307_s17 }
  0xfe   :  { %p8627_p0 = pnand %p8625_p13, %p8622_p12 }
 0x100   :  { %8630 = shalt.err (!%p8627_p0)
}
 0x101   :  { %s8631_s16 = scalar_lea.vmem %s177_s7, 32  ;;  %p8636_p2 = scmp.lt.s32.totalorder %s177_s7, %s177_s7 }
 0x102   :  { %p8632_p1 = scmp.ne.s32.totalorder %s177_s7, %s8631_s16  ;;  %p8637_p3 = scmp.lt.s32.totalorder %s8631_s16, %s8631_s16 }
 0x104   :  { %p8638_p4 = por %p8637_p3, %p8636_p2 }
 0x106   :  { %p8639_p5 = pnand %p8638_p4, %p8632_p1 }
 0x108   :  { %8642 = shalt.err (!%p8639_p5)
}
 0x109   :  { %182 = dma.hbm_to_vmem [thread:$0]  %s10307_s17, 32, %s177_s7, [#allocation17], %s8704_s6, %s8704_s6, %s8705_s11  }
 0x10a   :  { %s8720_s26 = smov [#allocation21]   ;;  %s8721_s30 = smov [#allocation24]  }
 0x10b   :  { %s200_s0 = sshll.u32 %s8720_s26, 4  ;;  %s222_s9 = sshll.u32 %s8721_s30, 4  ;;  %s201_s0 = int_to_ptr.vmem [resolvable:$true] %s200_s0  ;;  %s223_s9 = int_to_ptr.vmem [resolvable:$true] %s222_s9 }
 0x10c   :  { %s8643_s14 = scalar_lea.hbm %s10310_s20, 512 }
 0x10d   :  { %p8644_p6 = scmp.ne.s32.totalorder %s10310_s20, %s8643_s14  ;;  %p8647_p7 = scmp.lt.u32.totalorder %s8643_s14, %s10310_s20 }
 0x10f   :  { %p8649_p8 = pnand %p8647_p7, %p8644_p6 }
 0x111   :  { %8652 = shalt.err (!%p8649_p8)
}
 0x112   :  { %s8653_s17 = scalar_lea.vmem %s201_s0, 512  ;;  %p8658_p10 = scmp.lt.s32.totalorder %s201_s0, %s201_s0 }
 0x113   :  { %p8654_p9 = scmp.ne.s32.totalorder %s201_s0, %s8653_s17  ;;  %p8659_p11 = scmp.lt.s32.totalorder %s8653_s17, %s8653_s17 }
 0x115   :  { %p8660_p12 = por %p8659_p11, %p8658_p10 }
 0x117   :  { %p8661_p13 = pnand %p8660_p12, %p8654_p9 }
 0x119   :  { %8664 = shalt.err (!%p8661_p13)
}
 0x11a   :  { %206 = dma.hbm_to_vmem [thread:$0]  %s10310_s20, 512, %s201_s0, [#allocation20], %s8708_s8, %s8708_s8, %s8709_s10  }
 0x11b   :  { %s8665_s4 = scalar_lea.hbm %s10312_s22, 512 }
 0x11c   :  { %p8666_p0 = scmp.ne.s32.totalorder %s10312_s22, %s8665_s4  ;;  %p8669_p1 = scmp.lt.u32.totalorder %s8665_s4, %s10312_s22 }
 0x11e   :  { %p8671_p2 = pnand %p8669_p1, %p8666_p0 }
 0x120   :  { %8674 = shalt.err (!%p8671_p2)
}
 0x121   :  { %s8675_s16 = scalar_lea.vmem %s223_s9, 512  ;;  %p8680_p4 = scmp.lt.s32.totalorder %s223_s9, %s223_s9 }
 0x122   :  { %p8676_p3 = scmp.ne.s32.totalorder %s223_s9, %s8675_s16  ;;  %p8681_p5 = scmp.lt.s32.totalorder %s8675_s16, %s8675_s16 }
 0x124   :  { %p8682_p6 = por %p8681_p5, %p8680_p4 }
 0x126   :  { %p8683_p7 = pnand %p8682_p6, %p8676_p3 }
 0x128   :  { %8686 = shalt.err (!%p8683_p7)
}
 0x129   :  { %228 = dma.hbm_to_vmem [thread:$0]  %s10312_s22, 512, %s223_s9, [#allocation23], %s8708_s8, %s8708_s8, %s8709_s10  }
 0x12a   :  { %8687 = dma.done.wait [#allocation3], 16  }
 0x12b   :  { %8688 = vsyncadd [#allocation3], 4294967280 }
 0x12c   :  { %8689 = dma.done.wait [#allocation5], 64  }
 0x12d   :  { %8690 = vsyncadd [#allocation5], 4294967232 }
 0x12e   :  { %8691 = dma.done.wait [#allocation8], 64  }
 0x12f   :  { %8692 = vsyncadd [#allocation8], 4294967232 }
 0x130   :  { %8693 = dma.done.wait [#allocation11], 1040  }
 0x131   :  { %8694 = vsyncadd [#allocation11], 4294966256 }
 0x132   :  { %8695 = dma.done.wait [#allocation14], 2048  }
 0x133   :  { %8696 = vsyncadd [#allocation14], 4294965248 }
 0x134   :  { %8697 = dma.done.wait [#allocation17], 64  }
 0x135   :  { %8698 = vsyncadd [#allocation17], 4294967232 }
 0x136   :  { %8699 = dma.done.wait [#allocation20], 528  }
 0x137   :  { %8700 = vsyncadd [#allocation20], 4294966768 }
 0x138   :  { %8701 = dma.done.wait [#allocation23], 528  }
 0x139   :  { %8702 = vsyncadd [#allocation23], 4294966768  ;;  %v8722_v0 = vmov 0.0|0.0   ;;  %vm8723_vm0 = vmmov 0   ;;  %v8724_v1 = vmov 0.0   ;;  %s10349_s10 = sld [smem:[#allocation35_spill]] }
 0x13a   :  { %7652 = vmatprep.subr.bf16.mxu0 %v8722_v0  ;;  %6965 = vmatprep.mubr.msk.f32.mxu0 %vm8723_vm0, %v8724_v1  ;;  %s10350_s17 = sld [smem:[#allocation37_spill]]  ;;  %s10351_s22 = sld [smem:[#allocation38_spill]]  ;;  %vm296_vm1 = vcmask 523264   ;;  %v6474_v30 = vld [vmem:[#allocation2] ss:$0 sm:$0xff]  ;;  %vm382_vm2 = vcmask 261120  }
 0x13b   :  { %s10352_s30 = sld [smem:[#allocation33_spill]]  ;;  %v9178_v39 = vld [vmem:[#allocation6] ss:$0 sm:$0xff]  ;;  %s8725_s20 = smov 64   ;;  %v6476_v47 = vld [vmem:[#allocation4] ss:$0 sm:$0xff] }
 0x13c   :  { %v6483_v54 = vld [vmem:[#allocation4 + $0x1] ss:$0 sm:$0xff]  ;;  %v9214_v58 = vld [vmem:[#allocation6 + $0x1] ss:$0 sm:$0xff]  ;;  %s8726_s15 = smov 96   ;;  %vm2245_vm3 = vcmask 1041408  }
 0x13d   :  { %vm2247_vm4 = vcmask 1043456   ;;  %vm2249_vm5 = vcmask 1045504   ;;  %s10353_s27 = sld [smem:[#allocation41_spill]]  ;;  %s10354_s3 = sld [smem:[#allocation42_spill]]  ;;  %vm4379_vm6 = vcmask 130048   ;;  %vm4377_vm7 = vcmask 785408  }
 0x13e   :  { %s8727_s8 = smov 32   ;;  %s10356_s5 = sld [smem:[#allocation47_spill]] }
 0x13f   :  { %v282_v2 = vld [vmem:[%s10349_s10] sm:$0xff]  ;;  %v283_v3 = vld [vmem:[%s10349_s10 + $0x8] sm:$0xff]  ;;  %v284_v4 = vld [vmem:[%s10349_s10 + $0x10] sm:$0xff]  ;;  %s10357_s29 = sld [smem:[#allocation45_spill]]  ;;  %s10358_s2 = sld [smem:[#allocation46_spill]] }
 0x140   :  { %v7653_v5 = vpack.c.bf16 %v283_v3, %v282_v2  ;;  %v285_v6 = vld [vmem:[%s10349_s10 + $0x18] sm:$0xff]  ;;  %v286_v8 = vld [vmem:[%s10349_s10 + $0x20] sm:$0xff]  ;;  %v287_v9 = vld [vmem:[%s10349_s10 + $0x28] sm:$0xff] }
 0x141   :  { %v7656_v7 = vpack.c.bf16 %v285_v6, %v284_v4  ;;  %v371_v10 = vld [vmem:[%s10350_s17] sm:$0xff]  ;;  %v372_v11 = vld [vmem:[%s10350_s17 + $0x8] sm:$0xff]  ;;  %v373_v13 = vld [vmem:[%s10350_s17 + $0x10] sm:$0xff]  ;;  %v7659_v16 = vpack.c.bf16 %v287_v9, %v286_v8 }
 0x142   :  { %7654 = vmatpush3.bf16.msra.mxu0 %v7653_v5  ;;  %v7664_v12 = vpack.c.bf16 %v372_v11, %v371_v10  ;;  %v374_v14 = vld [vmem:[%s10350_s17 + $0x18] sm:$0xff]  ;;  %v288_v17 = vld [vmem:[%s10349_s10 + $0x30] sm:$0xff]  ;;  %v552_v20 = vld [vmem:[%s10351_s22] sm:$0xff] }
 0x143   :  { %7655 = vmatprep.subr.bf16.mxu0 %v8722_v0  ;;  %v7668_v15 = vpack.c.bf16 %v374_v14, %v373_v13  ;;  %v289_v18 = vld [vmem:[%s10349_s10 + $0x38] sm:$0xff]  ;;  %v553_v21 = vld [vmem:[%s10351_s22 + $0x8] sm:$0xff]  ;;  %v281_v22 = vld [vmem:[%s10352_s30] sm:$0xff] }
 0x144   :  { %7665 = vmatprep.subr.bf16.mxu1 %v7664_v12  ;;  %v7662_v19 = vpack.c.bf16 %v289_v18, %v288_v17  ;;  %v9132_v23 = vpack.c.bf16 %v553_v21, %v552_v20  ;;  %v554_v24 = vld [vmem:[%s10351_s22 + $0x10] sm:$0xff]  ;;  %v555_v25 = vld [vmem:[%s10351_s22 + $0x18] sm:$0xff]  ;;  %v6479_v27 = vld [vmem:[%s10350_s17 + $0x20] sm:$0xff] }
 0x145   :  { %7667 = vmatpush3.bf16.msra.mxu1 %v7664_v12  ;;  %v9143_v26 = vpack.c.bf16 %v555_v25, %v554_v24  ;;  %v6480_v28 = vld [vmem:[%s10350_s17 + $0x28] sm:$0xff]  ;;  %v6481_v31 = vld [vmem:[%s10350_s17 + $0x30] sm:$0xff]  ;;  %v6482_v32 = vld [vmem:[%s10350_s17 + $0x38] sm:$0xff] }
 0x146   :  { %7657 = vmatpush3.bf16.msra.mxu0 %v7656_v7  ;;  %7669 = vmatprep.subr.bf16.mxu1 %v7668_v15  ;;  %v7672_v29 = vpack.c.bf16 %v6480_v28, %v6479_v27  ;;  %v7676_v36 = vpack.c.bf16 %v6482_v32, %v6481_v31  ;;  %v6486_v37 = vld [vmem:[%s10351_s22 + $0x20] sm:$0xff]  ;;  %v6487_v38 = vld [vmem:[%s10351_s22 + $0x28] sm:$0xff]  ;;  %v6488_v44 = vld [vmem:[%s10351_s22 + $0x30] sm:$0xff] }
 0x147   :  { %7658 = vmatprep.subr.bf16.mxu0 %v8722_v0  ;;  %v9180_v41 = vpack.c.bf16 %v6487_v38, %v6486_v37  ;;  %v6489_v45 = vld [vmem:[%s10351_s22 + $0x38] sm:$0xff]  ;;  %s10355_s22 = sld [smem:[#allocation34_spill]] }
 0x148   :  { %v9193_v46 = vpack.c.bf16 %v6489_v45, %v6488_v44 }
 0x149   :  { %7671 = vmatpush3.bf16.msra.mxu1 %v7668_v15 }
 0x14a   :  { %7660 = vmatpush3.bf16.msra.mxu0 %v7659_v16  ;;  %7673 = vmatprep.subr.bf16.mxu1 %v7672_v29 }
 0x14b   :  { %7661 = vmatprep.subr.bf16.mxu0 %v8722_v0 }
 0x14e   :  { %7663 = vmatpush3.bf16.msra.mxu0 %v7662_v19 }
 0x14f   :  { %7680 = vmatprep.subr.bf16.mxu0 %v8722_v0 }
 0x151   :  { %6966 = vmatmul.mubr.msk.f32.vlgmr.msra.gmra.mrb[0].mxu0 %vm296_vm1, %v281_v22 }
 0x152   :  { %7682 = vmatpush3.bf16.msra.mxu0 %v9132_v23  ;;  %6998 = vmatprep.mubr.msk.f32.mxu0 %vm8723_vm0, %v8724_v1 }
 0x153   :  { %7683 = vmatprep.subr.bf16.mxu0 %v8722_v0 }
 0x156   :  { %7685 = vmatpush3.bf16.msra.mxu0 %v9143_v26 }
 0x157   :  { %7692 = vmatprep.subr.bf16.mxu0 %v8722_v0 }
 0x159   :  { %6999 = vmatmul.mubr.f32.vlgmr.msra.gmra.mrb[2].mxu0 %v8724_v1 }
 0x15a   :  { %7694 = vmatpush3.bf16.msra.mxu0 %v9132_v23  ;;  %7020 = vmatprep.mubr.msk.f32.mxu0 %vm8723_vm0, %v8724_v1 }
 0x15b   :  { %7695 = vmatprep.subr.bf16.mxu0 %v8722_v0 }
 0x15e   :  { %7697 = vmatpush3.bf16.msra.mxu0 %v9143_v26 }
 0x15f   :  { %7704 = vmatprep.subr.bf16.mxu0 %v8722_v0 }
 0x224   :  { %v366_v33 = vpop.f32.mrb[0].mxu0 }
 0x225   :  { %v367_v34 = vadd.f32 %v6474_v30, %v366_v33  ;;  %v6967_v35 = vpop.f32.mrb[1].mxu0 }
 0x227   :  { %6976 = vmatprep.mubr.msk.f32.mxu1 %vm382_vm2, %v367_v34 }
 0x228   :  { %6977 = vmatmul.mubr.msk.f32.vlgmr.msra.gmra.mrb[0].mxu1 %vm382_vm2, %v6474_v30 }
 0x229   :  { %7675 = vmatpush3.bf16.msra.mxu1 %v7672_v29  ;;  %6987 = vmatprep.mubr.msk.f32.mxu1 %vm382_vm2, %v367_v34 }
 0x22a   :  { %7677 = vmatprep.subr.bf16.mxu1 %v7676_v36 }
 0x22c   :  { %v639_v40 = vpop.f32.mrb[2].mxu0 }
 0x22d   :  { %7679 = vmatpush3.bf16.msra.mxu1 %v7676_v36  ;;  %v640_v42 = vadd.f32 %v9178_v39, %v639_v40  ;;  %v7000_v43 = vpop.f32.mrb[3].mxu0 }
 0x22e   :  { %7686 = vmatprep.subr.bf16.mxu1 %v8722_v0 }
 0x22f   :  { %651 = vrot.lane.b32.xlu0 %v640_v42, %s8725_s20 }
 0x230   :  { %6988 = vmatmul.mubr.msk.f32.vlgmr.msra.gmra.mrb[2].mxu1 %vm382_vm2, %v6474_v30 }
 0x231   :  { %7688 = vmatpush3.bf16.msra.mxu1 %v9180_v41  ;;  %7009 = vmatprep.mubr.msk.f32.mxu1 %vm8723_vm0, %v8724_v1 }
 0x232   :  { %7689 = vmatprep.subr.bf16.mxu1 %v8722_v0 }
 0x235   :  { %7691 = vmatpush3.bf16.msra.mxu1 %v9193_v46 }
 0x236   :  { %7698 = vmatprep.subr.bf16.mxu1 %v8722_v0 }
 0x238   :  { %7010 = vmatmul.mubr.f32.vlgmr.msra.gmra.mrb[4].mxu1 %v8724_v1 }
 0x239   :  { %7700 = vmatpush3.bf16.msra.mxu1 %v9180_v41  ;;  %7031 = vmatprep.mubr.msk.f32.mxu1 %vm8723_vm0, %v8724_v1 }
 0x23a   :  { %7701 = vmatprep.subr.bf16.mxu1 %v8722_v0 }
 0x23d   :  { %7703 = vmatpush3.bf16.msra.mxu1 %v9193_v46 }
 0x23e   :  { %7710 = vmatprep.subr.bf16.mxu1 %v8722_v0 }
 0x2a1   :  { %v652_v3 = vpop.permute.xlu0 %651 }
 0x2fb   :  { %v6978_v48 = vpop.f32.mrb[0].mxu1 }
 0x2fc   :  { %v9207_v49 = vadd.f32 %v6978_v48, %v6476_v47  ;;  %v455_v50 = vpop.f32.mrb[1].mxu1 }
 0x2fd   :  { %v9209_v51 = vadd.f32 %v6476_v47, %v455_v50 }
 0x2ff   :  { %v643_v52 = vadd.f32 %v640_v42, %v9209_v51 }
 0x301   :  { %v6491_v53 = vmul.f32 -1.442695, %v643_v52 }
 0x303   :  { %v6989_v55 = vpop.f32.mrb[2].mxu1  ;;  %8085 = vpow2.f32 %v6491_v53 }
 0x304   :  { %v543_v56 = vpop.f32.mrb[3].mxu1  ;;  %v9219_v6 = vadd.f32 %v6989_v55, %v6483_v54 }
 0x305   :  { %v9212_v57 = vadd.f32 %v6483_v54, %v543_v56 }
 0x30b   :  { %v741_v59 = vpop.f32.mrb[4].mxu1 }
 0x30c   :  { %v742_v60 = vadd.f32 %v9214_v58, %v741_v59  ;;  %v7011_v61 = vpop.f32.mrb[5].mxu1 }
 0x30d   :  { %v8086_v62 = vpop.eup %8085 }
 0x30e   :  { %v746_v63 = vrot.slane %v742_v60, 2  ;;  %v647_v2 = vadd.f32 1.0, %v8086_v62 }
 0x310   :  { %755 = vrot.lane.b32.xlu0 %v746_v63, %s8725_s20  ;;  %8087 = vrcp.f32 %v647_v2  ;;  %v748_v7 = vadd.f32 %v746_v63, %v9219_v6 }
 0x312   :  { %v6493_v8 = vmul.f32 -1.442695, %v748_v7 }
 0x314   :  { %8089 = vpow2.f32 %v6493_v8 }
 0x31a   :  { %v8088_v4 = vpop.eup %8087 }
 0x31b   :  { %v654_v5 = vmul.f32 %v8088_v4, %v652_v3  ;;  %v661_v20 = vsub.f32 1.0, %v8088_v4  ;;  %v667_v22 = vmul.f32 0.0, %v8088_v4 }
 0x31d   :  { %656 = vrot.lane.b32.xlu1 %v654_v5, %s8725_s20 }
 0x31e   :  { %v8090_v9 = vpop.eup %8089 }
 0x31f   :  { %v752_v10 = vadd.f32 1.0, %v8090_v9 }
 0x321   :  { %8091 = vrcp.f32 %v752_v10 }
 0x32b   :  { %v8092_v11 = vpop.eup %8091 }
 0x32c   :  { %v765_v27 = vsub.f32 1.0, %v8092_v11  ;;  %v771_v29 = vmul.f32 0.0, %v8092_v11 }
 0x382   :  { %v756_v12 = vpop.permute.xlu0 %755 }
 0x383   :  { %v758_v13 = vmul.f32 %v8092_v11, %v756_v12 }
 0x385   :  { %760 = vrot.lane.b32.xlu1 %v758_v13, %s8725_s20 }
 0x38f   :  { %v657_v14 = vpop.permute.xlu1 %656 }
 0x390   :  { %v659_v15 = vadd.f32 %v657_v14, %v9209_v51 }
 0x392   :  { %8093 = vtanh.f32 %v659_v15 }
 0x39c   :  { %v8094_v16 = vpop.eup %8093 }
 0x39d   :  { %663 = vrot.lane.b32.xlu0 %v8094_v16, %s8726_s15 }
 0x3f7   :  { %v761_v17 = vpop.permute.xlu1 %760 }
 0x3f8   :  { %v763_v18 = vadd.f32 %v761_v17, %v9219_v6 }
 0x3fa   :  { %8095 = vtanh.f32 %v763_v18 }
 0x404   :  { %v8096_v19 = vpop.eup %8095 }
 0x405   :  { %767 = vrot.lane.b32.xlu1 %v8096_v19, %s8726_s15 }
 0x40f   :  { %v664_v21 = vpop.permute.xlu0 %663 }
 0x410   :  { %v666_v24 = vmul.f32 %v664_v21, %v661_v20 }
 0x412   :  { %v9227_v25 = vadd.f32 %v667_v22, %v666_v24 }
 0x414   :  { %774 = vrot.lane.b32.xlu0 %v9227_v25, %s8726_s15  ;;  %v874_v10 = vrot.slane %v9227_v25, 6 }
 0x477   :  { %v768_v28 = vpop.permute.xlu1 %767 }
 0x478   :  { %v770_v30 = vmul.f32 %v768_v28, %v765_v27 }
 0x47a   :  { %v9231_v31 = vadd.f32 %v771_v29, %v770_v30 }
 0x47c   :  { %v879_v32 = vrot.slane %v9231_v31, 6  ;;  %v980_v17 = vrot.slane %v9231_v31, 2 }
 0x47e   :  { %880 = vrot.lane.b32.xlu1 %v879_v32, %s8726_s15 }
 0x486   :  { %v775_v33 = vpop.permute.xlu0 %774 }
 0x487   :  { %7021 = vmatmul.mubr.msk.f32.vlgmr.msra.gmra.mrb[4].mxu0 %vm382_vm2, %v775_v33 }
 0x488   :  { %7706 = vmatpush3.bf16.msra.mxu0 %v9132_v23  ;;  %7042 = vmatprep.mubr.msk.f32.mxu0 %vm8723_vm0, %v8724_v1 }
 0x489   :  { %7707 = vmatprep.subr.bf16.mxu0 %v8722_v0 }
 0x48c   :  { %7709 = vmatpush3.bf16.msra.mxu0 %v9143_v26 }
 0x48d   :  { %7716 = vmatprep.subr.bf16.mxu0 %v8722_v0 }
 0x4f0   :  { %v881_v34 = vpop.permute.xlu1 %880 }
 0x4f1   :  { %7032 = vmatmul.mubr.msk.f32.vlgmr.msra.gmra.mrb[6].mxu1 %vm382_vm2, %v881_v34 }
 0x4f2   :  { %7712 = vmatpush3.bf16.msra.mxu1 %v9180_v41  ;;  %7053 = vmatprep.mubr.msk.f32.mxu1 %vm8723_vm0, %v8724_v1 }
 0x4f3   :  { %7713 = vmatprep.subr.bf16.mxu1 %v8722_v0 }
 0x4f6   :  { %7715 = vmatpush3.bf16.msra.mxu1 %v9193_v46 }
 0x4f7   :  { %7722 = vmatprep.subr.bf16.mxu1 %v8722_v0 }
 0x55a   :  { %v844_v35 = vpop.f32.mrb[4].mxu0 }
 0x55b   :  { %v845_v36 = vadd.f32 %v9178_v39, %v844_v35  ;;  %v7022_v37 = vpop.f32.mrb[5].mxu0 }
 0x55d   :  { %v849_v38 = vrot.slane %v845_v36, 6 }
 0x55f   :  { %858 = vrot.lane.b32.xlu0 %v849_v38, %s8725_s20  ;;  %v851_v40 = vadd.f32 %v849_v38, %v9209_v51 }
 0x561   :  { %v6495_v42 = vmul.f32 -1.442695, %v851_v40 }
 0x563   :  { %8097 = vpow2.f32 %v6495_v42 }
 0x56d   :  { %v8098_v43 = vpop.eup %8097 }
 0x56e   :  { %v855_v44 = vadd.f32 1.0, %v8098_v43 }
 0x570   :  { %8099 = vrcp.f32 %v855_v44 }
 0x57a   :  { %v8100_v52 = vpop.eup %8099 }
 0x57b   :  { %v868_v9 = vsub.f32 1.0, %v8100_v52  ;;  %v876_v13 = vmul.f32 %v8100_v52, %v874_v10 }
 0x5c4   :  { %v950_v45 = vpop.f32.mrb[6].mxu1 }
 0x5c5   :  { %v951_v47 = vadd.f32 %v9214_v58, %v950_v45  ;;  %v7033_v48 = vpop.f32.mrb[7].mxu1 }
 0x5c7   :  { %v955_v50 = vrot.slane %v951_v47, 4 }
 0x5c9   :  { %964 = vrot.lane.b32.xlu1 %v955_v50, %s8725_s20  ;;  %v957_v55 = vadd.f32 %v955_v50, %v9219_v6 }
 0x5cb   :  { %v6497_v56 = vmul.f32 -1.442695, %v957_v55 }
 0x5cd   :  { %8101 = vpow2.f32 %v6497_v56 }
 0x5d1   :  { %v859_v53 = vpop.permute.xlu0 %858 }
 0x5d2   :  { %v861_v54 = vmul.f32 %v8100_v52, %v859_v53 }
 0x5d4   :  { %863 = vrot.lane.b32.xlu0 %v861_v54, %s8725_s20 }
 0x5d7   :  { %v8102_v59 = vpop.eup %8101 }
 0x5d8   :  { %v961_v60 = vadd.f32 1.0, %v8102_v59 }
 0x5da   :  { %8103 = vrcp.f32 %v961_v60 }
 0x5e4   :  { %v8104_v61 = vpop.eup %8103 }
 0x5e5   :  { %v974_v16 = vsub.f32 1.0, %v8104_v61  ;;  %v982_v19 = vmul.f32 %v8104_v61, %v980_v17 }
 0x63b   :  { %v965_v62 = vpop.permute.xlu1 %964 }
 0x63c   :  { %v967_v63 = vmul.f32 %v8104_v61, %v965_v62 }
 0x63e   :  { %969 = vrot.lane.b32.xlu1 %v967_v63, %s8725_s20 }
 0x646   :  { %v864_v2 = vpop.permute.xlu0 %863 }
 0x647   :  { %v866_v3 = vadd.f32 %v864_v2, %v9209_v51 }
 0x649   :  { %8105 = vtanh.f32 %v866_v3 }
 0x653   :  { %v8106_v4 = vpop.eup %8105 }
 0x654   :  { %870 = vrot.lane.b32.xlu0 %v8106_v4, %s8726_s15 }
 0x6b0   :  { %v970_v5 = vpop.permute.xlu1 %969 }
 0x6b1   :  { %v972_v7 = vadd.f32 %v970_v5, %v9219_v6 }
 0x6b3   :  { %8107 = vtanh.f32 %v972_v7 }
 0x6bd   :  { %v8108_v8 = vpop.eup %8107 }
 0x6be   :  { %976 = vrot.lane.b32.xlu1 %v8108_v8, %s8726_s15 }
 0x6c6   :  { %v871_v11 = vpop.permute.xlu0 %870 }
 0x6c7   :  { %v873_v12 = vmul.f32 %v871_v11, %v868_v9 }
 0x6c9   :  { %v9262_v14 = vadd.f32 %v876_v13, %v873_v12 }
 0x6cb   :  { %v985_v15 = vrot.slane %v9262_v14, 2  ;;  %v1086_v3 = vrot.slane %v9262_v14, 6  ;;  %v2246_v9 = vsel %vm2245_vm3, %v9227_v25, %v9262_v14 }
 0x6cd   :  { %986 = vrot.lane.b32.xlu0 %v985_v15, %s8726_s15 }
 0x730   :  { %v977_v18 = vpop.permute.xlu1 %976 }
 0x731   :  { %v979_v20 = vmul.f32 %v977_v18, %v974_v16 }
 0x733   :  { %v9267_v21 = vadd.f32 %v982_v19, %v979_v20 }
 0x735   :  { %v1091_v22 = vrot.slane %v9267_v21, 4  ;;  %v1192_v13 = vrot.slane %v9267_v21, 2 }
 0x737   :  { %1092 = vrot.lane.b32.xlu1 %v1091_v22, %s8726_s15 }
 0x73f   :  { %v987_v24 = vpop.permute.xlu0 %986 }
 0x740   :  { %7043 = vmatmul.mubr.msk.f32.vlgmr.msra.gmra.mrb[6].mxu0 %vm382_vm2, %v987_v24 }
 0x741   :  { %7718 = vmatpush3.bf16.msra.mxu0 %v9132_v23  ;;  %7064 = vmatprep.mubr.msk.f32.mxu0 %vm8723_vm0, %v8724_v1 }
 0x742   :  { %7719 = vmatprep.subr.bf16.mxu0 %v8722_v0 }
 0x745   :  { %7721 = vmatpush3.bf16.msra.mxu0 %v9143_v26 }
 0x746   :  { %7728 = vmatprep.subr.bf16.mxu0 %v8722_v0 }
 0x7a9   :  { %v1093_v27 = vpop.permute.xlu1 %1092 }
 0x7aa   :  { %7054 = vmatmul.mubr.msk.f32.vlgmr.msra.gmra.mrb[8].mxu1 %vm382_vm2, %v1093_v27 }
 0x7ab   :  { %7724 = vmatpush3.bf16.msra.mxu1 %v9180_v41  ;;  %7075 = vmatprep.mubr.msk.f32.mxu1 %vm8723_vm0, %v8724_v1 }
 0x7ac   :  { %7725 = vmatprep.subr.bf16.mxu1 %v8722_v0 }
 0x7af   :  { %7727 = vmatpush3.bf16.msra.mxu1 %v9193_v46 }
 0x7b0   :  { %7734 = vmatprep.subr.bf16.mxu1 %v8722_v0 }
 0x813   :  { %v1056_v28 = vpop.f32.mrb[6].mxu0 }
 0x814   :  { %v1057_v29 = vadd.f32 %v9178_v39, %v1056_v28  ;;  %v7044_v30 = vpop.f32.mrb[7].mxu0 }
 0x816   :  { %v1061_v32 = vrot.slane %v1057_v29, 4 }
 0x818   :  { %1070 = vrot.lane.b32.xlu0 %v1061_v32, %s8725_s20  ;;  %v1063_v33 = vadd.f32 %v1061_v32, %v9209_v51 }
 0x81a   :  { %v6499_v34 = vmul.f32 -1.442695, %v1063_v33 }
 0x81c   :  { %8109 = vpow2.f32 %v6499_v34 }
 0x826   :  { %v8110_v35 = vpop.eup %8109 }
 0x827   :  { %v1067_v36 = vadd.f32 1.0, %v8110_v35 }
 0x829   :  { %8111 = vrcp.f32 %v1067_v36 }
 0x833   :  { %v8112_v43 = vpop.eup %8111 }
 0x834   :  { %v1080_v2 = vsub.f32 1.0, %v8112_v43  ;;  %v1088_v5 = vmul.f32 %v8112_v43, %v1086_v3 }
 0x87d   :  { %v1162_v37 = vpop.f32.mrb[8].mxu1 }
 0x87e   :  { %v1163_v38 = vadd.f32 %v9214_v58, %v1162_v37  ;;  %v7055_v40 = vpop.f32.mrb[9].mxu1 }
 0x880   :  { %v1167_v42 = vrot.slane %v1163_v38, 6 }
 0x882   :  { %1176 = vrot.lane.b32.xlu1 %v1167_v42, %s8725_s20  ;;  %v1169_v47 = vadd.f32 %v1167_v42, %v9219_v6 }
 0x884   :  { %v6501_v48 = vmul.f32 -1.442695, %v1169_v47 }
 0x886   :  { %8113 = vpow2.f32 %v6501_v48 }
 0x88a   :  { %v1071_v44 = vpop.permute.xlu0 %1070 }
 0x88b   :  { %v1073_v45 = vmul.f32 %v8112_v43, %v1071_v44 }
 0x88d   :  { %1075 = vrot.lane.b32.xlu0 %v1073_v45, %s8725_s20 }
 0x890   :  { %v8114_v50 = vpop.eup %8113 }
 0x891   :  { %v1173_v52 = vadd.f32 1.0, %v8114_v50 }
 0x893   :  { %8115 = vrcp.f32 %v1173_v52 }
 0x89d   :  { %v8116_v53 = vpop.eup %8115 }
 0x89e   :  { %v1186_v12 = vsub.f32 1.0, %v8116_v53  ;;  %v1194_v16 = vmul.f32 %v8116_v53, %v1192_v13 }
 0x8f4   :  { %v1177_v54 = vpop.permute.xlu1 %1176 }
 0x8f5   :  { %v1179_v55 = vmul.f32 %v8116_v53, %v1177_v54 }
 0x8f7   :  { %1181 = vrot.lane.b32.xlu1 %v1179_v55, %s8725_s20 }
 0x8ff   :  { %v1076_v56 = vpop.permute.xlu0 %1075 }
 0x900   :  { %v1078_v59 = vadd.f32 %v1076_v56, %v9209_v51 }
 0x902   :  { %8117 = vtanh.f32 %v1078_v59 }
 0x90c   :  { %v8118_v60 = vpop.eup %8117 }
 0x90d   :  { %1082 = vrot.lane.b32.xlu0 %v8118_v60, %s8726_s15 }
 0x969   :  { %v1182_v61 = vpop.permute.xlu1 %1181 }
 0x96a   :  { %v1184_v62 = vadd.f32 %v1182_v61, %v9219_v6 }
 0x96c   :  { %8119 = vtanh.f32 %v1184_v62 }
 0x976   :  { %v8120_v63 = vpop.eup %8119 }
 0x977   :  { %1188 = vrot.lane.b32.xlu1 %v8120_v63, %s8726_s15 }
 0x97f   :  { %v1083_v4 = vpop.permute.xlu0 %1082 }
 0x980   :  { %v1085_v7 = vmul.f32 %v1083_v4, %v1080_v2 }
 0x982   :  { %v9298_v8 = vadd.f32 %v1088_v5, %v1085_v7 }
 0x984   :  { %v1197_v10 = vrot.slane %v9298_v8, 4  ;;  %v9306_v11 = vsel %vm2247_vm4, %v2246_v9, %v9298_v8  ;;  %v1298_v60 = vrot.slane %v9298_v8, 6 }
 0x986   :  { %1198 = vrot.lane.b32.xlu0 %v1197_v10, %s8726_s15 }
 0x9e9   :  { %v1189_v15 = vpop.permute.xlu1 %1188 }
 0x9ea   :  { %v1191_v17 = vmul.f32 %v1189_v15, %v1186_v12 }
 0x9ec   :  { %v9310_v18 = vadd.f32 %v1194_v16, %v1191_v17 }
 0x9ee   :  { %v1303_v19 = vrot.slane %v9310_v18, 2 }
 0x9f0   :  { %1304 = vrot.lane.b32.xlu1 %v1303_v19, %s8726_s15 }
 0x9f8   :  { %v1199_v25 = vpop.permute.xlu0 %1198 }
 0x9f9   :  { %7065 = vmatmul.mubr.msk.f32.vlgmr.msra.gmra.mrb[8].mxu0 %vm382_vm2, %v1199_v25 }
 0x9fa   :  { %7730 = vmatpush3.bf16.msra.mxu0 %v9132_v23  ;;  %7086 = vmatprep.mubr.msk.f32.mxu0 %vm8723_vm0, %v8724_v1 }
 0x9fb   :  { %7731 = vmatprep.subr.bf16.mxu0 %v8722_v0 }
 0x9fe   :  { %7733 = vmatpush3.bf16.msra.mxu0 %v9143_v26 }
 0x9ff   :  { %7740 = vmatprep.subr.bf16.mxu0 %v8722_v0 }
 0xa62   :  { %v1305_v14 = vpop.permute.xlu1 %1304 }
 0xa63   :  { %7076 = vmatmul.mubr.msk.f32.vlgmr.msra.gmra.mrb[10].mxu1 %vm382_vm2, %v1305_v14 }
 0xa64   :  { %7736 = vmatpush3.bf16.msra.mxu1 %v9180_v41  ;;  %7097 = vmatprep.mubr.msk.f32.mxu1 %vm8723_vm0, %v8724_v1 }
 0xa65   :  { %7737 = vmatprep.subr.bf16.mxu1 %v8722_v0 }
 0xa68   :  { %7739 = vmatpush3.bf16.msra.mxu1 %v9193_v46 }
 0xa69   :  { %7746 = vmatprep.subr.bf16.mxu1 %v8722_v0 }
 0xacc   :  { %v1268_v20 = vpop.f32.mrb[8].mxu0 }
 0xacd   :  { %v1269_v22 = vadd.f32 %v9178_v39, %v1268_v20  ;;  %v7066_v24 = vpop.f32.mrb[9].mxu0 }
 0xacf   :  { %v1273_v27 = vrot.slane %v1269_v22, 2 }
 0xad1   :  { %1282 = vrot.lane.b32.xlu0 %v1273_v27, %s8725_s20  ;;  %v1275_v28 = vadd.f32 %v1273_v27, %v9209_v51 }
 0xad3   :  { %v6503_v29 = vmul.f32 -1.442695, %v1275_v28 }
 0xad5   :  { %8121 = vpow2.f32 %v6503_v29 }
 0xadf   :  { %v8122_v30 = vpop.eup %8121 }
 0xae0   :  { %v1279_v32 = vadd.f32 1.0, %v8122_v30 }
 0xae2   :  { %8123 = vrcp.f32 %v1279_v32 }
 0xaec   :  { %v8124_v36 = vpop.eup %8123 }
 0xaed   :  { %v1292_v59 = vsub.f32 1.0, %v8124_v36  ;;  %v1300_v62 = vmul.f32 %v8124_v36, %v1298_v60 }
 0xb36   :  { %v1374_v33 = vpop.f32.mrb[10].mxu1 }
 0xb37   :  { %v1375_v34 = vadd.f32 %v9214_v58, %v1374_v33  ;;  %v7077_v35 = vpop.f32.mrb[11].mxu1 }
 0xb39   :  { %1386 = vrot.lane.b32.xlu1 %v1375_v34, %s8725_s20  ;;  %v1378_v40 = vadd.f32 %v1375_v34, %v9219_v6 }
 0xb3b   :  { %v6505_v42 = vmul.f32 -1.442695, %v1378_v40 }
 0xb3d   :  { %8125 = vpow2.f32 %v6505_v42 }
 0xb43   :  { %v1283_v37 = vpop.permute.xlu0 %1282 }
 0xb44   :  { %v1285_v38 = vmul.f32 %v8124_v36, %v1283_v37 }
 0xb46   :  { %1287 = vrot.lane.b32.xlu0 %v1285_v38, %s8725_s20 }
 0xb47   :  { %v8126_v43 = vpop.eup %8125 }
 0xb48   :  { %v1382_v44 = vadd.f32 1.0, %v8126_v43 }
 0xb4a   :  { %8127 = vrcp.f32 %v1382_v44 }
 0xb54   :  { %v8128_v45 = vpop.eup %8127 }
 0xb55   :  { %v1403_v5 = vmul.f32 %v8128_v45, %v1303_v19 }
 0xbab   :  { %v1387_v47 = vpop.permute.xlu1 %1386 }
 0xbac   :  { %v1389_v48 = vmul.f32 %v8128_v45, %v1387_v47 }
 0xbae   :  { %1391 = vrot.lane.b32.xlu1 %v1389_v48, %s8725_s20 }
 0xbb8   :  { %v1288_v50 = vpop.permute.xlu0 %1287 }
 0xbb9   :  { %v1290_v52 = vadd.f32 %v1288_v50, %v9209_v51 }
 0xbbb   :  { %8129 = vtanh.f32 %v1290_v52 }
 0xbc5   :  { %v8130_v53 = vpop.eup %8129 }
 0xbc6   :  { %1294 = vrot.lane.b32.xlu0 %v8130_v53, %s8726_s15 }
 0xc20   :  { %v1392_v54 = vpop.permute.xlu1 %1391 }
 0xc21   :  { %v1394_v55 = vadd.f32 %v1392_v54, %v9219_v6  ;;  %v1396_v6 = vsub.f32 1.0, %v8128_v45 }
 0xc23   :  { %8131 = vtanh.f32 %v1394_v55 }
 0xc2d   :  { %v8132_v56 = vpop.eup %8131 }
 0xc2e   :  { %1398 = vrot.lane.b32.xlu1 %v8132_v56, %s8726_s15 }
 0xc38   :  { %v1295_v61 = vpop.permute.xlu0 %1294 }
 0xc39   :  { %v1297_v63 = vmul.f32 %v1295_v61, %v1292_v59 }
 0xc3b   :  { %v9343_v2 = vadd.f32 %v1300_v62, %v1297_v63 }
 0xc3d   :  { %v1406_v51 = vrot.slane %v9343_v2, 6  ;;  %v9349_v3 = vsel %vm2249_vm5, %v9306_v11, %v9343_v2 }
 0xc3f   :  { %1407 = vrot.lane.b32.xlu0 %v1406_v51, %s8726_s15 }
 0xca0   :  { %v1399_v4 = vpop.permute.xlu1 %1398 }
 0xca1   :  { %v1401_v7 = vmul.f32 %v1399_v4, %v1396_v6 }
 0xca3   :  { %v9356_v8 = vadd.f32 %v1403_v5, %v1401_v7 }
 0xca5   :  { %1509 = vrot.lane.b32.xlu1 %v9356_v8, %s8726_s15  ;;  %v1609_v54 = vrot.slane %v9356_v8, 2 }
 0xcb1   :  { %v1408_v9 = vpop.permute.xlu0 %1407 }
 0xcb2   :  { %7087 = vmatmul.mubr.msk.f32.vlgmr.msra.gmra.mrb[10].mxu0 %vm382_vm2, %v1408_v9 }
 0xcb3   :  { %7742 = vmatpush3.bf16.msra.mxu0 %v9132_v23  ;;  %7108 = vmatprep.mubr.msk.f32.mxu0 %vm8723_vm0, %v8724_v1 }
 0xcb4   :  { %7743 = vmatprep.subr.bf16.mxu0 %v8722_v0 }
 0xcb7   :  { %7745 = vmatpush3.bf16.msra.mxu0 %v9143_v26 }
 0xcb8   :  { %7752 = vmatprep.subr.bf16.mxu0 %v8722_v0 }
 0xd17   :  { %v1510_v10 = vpop.permute.xlu1 %1509 }
 0xd18   :  { %7098 = vmatmul.mubr.msk.f32.vlgmr.msra.gmra.mrb[12].mxu1 %vm382_vm2, %v1510_v10 }
 0xd19   :  { %7748 = vmatpush3.bf16.msra.mxu1 %v9180_v41  ;;  %7119 = vmatprep.mubr.msk.f32.mxu1 %vm8723_vm0, %v8724_v1 }
 0xd1a   :  { %7749 = vmatprep.subr.bf16.mxu1 %v8722_v0 }
 0xd1d   :  { %7751 = vmatpush3.bf16.msra.mxu1 %v9193_v46 }
 0xd1e   :  { %7758 = vmatprep.subr.bf16.mxu1 %v8722_v0 }
 0xd85   :  { %v1477_v11 = vpop.f32.mrb[10].mxu0 }
 0xd86   :  { %v1478_v12 = vadd.f32 %v9178_v39, %v1477_v11  ;;  %v7088_v13 = vpop.f32.mrb[11].mxu0 }
 0xd88   :  { %1489 = vrot.lane.b32.xlu0 %v1478_v12, %s8725_s20  ;;  %v1481_v15 = vadd.f32 %v1478_v12, %v9207_v49 }
 0xd8a   :  { %v6507_v16 = vmul.f32 -1.442695, %v1481_v15 }
 0xd8c   :  { %8133 = vpow2.f32 %v6507_v16 }
 0xd96   :  { %v8134_v17 = vpop.eup %8133 }
 0xd97   :  { %v1485_v25 = vadd.f32 1.0, %v8134_v17 }
 0xd99   :  { %8135 = vrcp.f32 %v1485_v25 }
 0xda3   :  { %v8136_v24 = vpop.eup %8135 }
 0xda4   :  { %v1499_v45 = vsub.f32 1.0, %v8136_v24  ;;  %v1506_v48 = vmul.f32 %v8136_v24, %v1406_v51 }
 0xdeb   :  { %v1579_v19 = vpop.f32.mrb[12].mxu1 }
 0xdec   :  { %v1580_v14 = vadd.f32 %v9214_v58, %v1579_v19  ;;  %v7099_v20 = vpop.f32.mrb[13].mxu1 }
 0xdee   :  { %v1584_v22 = vrot.slane %v1580_v14, 2 }
 0xdf0   :  { %1593 = vrot.lane.b32.xlu1 %v1584_v22, %s8725_s20  ;;  %v1586_v29 = vadd.f32 %v1584_v22, %v9212_v57 }
 0xdf2   :  { %v6509_v30 = vmul.f32 -1.442695, %v1586_v29 }
 0xdf4   :  { %8137 = vpow2.f32 %v6509_v30 }
 0xdfa   :  { %v1490_v27 = vpop.permute.xlu0 %1489 }
 0xdfb   :  { %v1492_v28 = vmul.f32 %v8136_v24, %v1490_v27 }
 0xdfd   :  { %1494 = vrot.lane.b32.xlu0 %v1492_v28, %s8725_s20 }
 0xdfe   :  { %v8138_v32 = vpop.eup %8137 }
 0xdff   :  { %v1590_v33 = vadd.f32 1.0, %v8138_v32 }
 0xe01   :  { %8139 = vrcp.f32 %v1590_v33 }
 0xe0b   :  { %v8140_v34 = vpop.eup %8139 }
 0xe0c   :  { %v1603_v53 = vsub.f32 1.0, %v8140_v34  ;;  %v1611_v56 = vmul.f32 %v8140_v34, %v1609_v54 }
 0xe62   :  { %v1594_v35 = vpop.permute.xlu1 %1593 }
 0xe63   :  { %v1596_v36 = vmul.f32 %v8140_v34, %v1594_v35 }
 0xe65   :  { %1598 = vrot.lane.b32.xlu1 %v1596_v36, %s8725_s20 }
 0xe6f   :  { %v1495_v37 = vpop.permute.xlu0 %1494 }
 0xe70   :  { %v1497_v38 = vadd.f32 %v1495_v37, %v9207_v49 }
 0xe72   :  { %8141 = vtanh.f32 %v1497_v38 }
 0xe7c   :  { %v8142_v40 = vpop.eup %8141 }
 0xe7d   :  { %1501 = vrot.lane.b32.xlu0 %v8142_v40, %s8726_s15 }
 0xed7   :  { %v1599_v42 = vpop.permute.xlu1 %1598 }
 0xed8   :  { %v1601_v43 = vadd.f32 %v1599_v42, %v9212_v57 }
 0xeda   :  { %8143 = vtanh.f32 %v1601_v43 }
 0xee4   :  { %v8144_v44 = vpop.eup %8143 }
 0xee5   :  { %1605 = vrot.lane.b32.xlu1 %v8144_v44, %s8726_s15 }
 0xeef   :  { %v1502_v47 = vpop.permute.xlu0 %1501 }
 0xef0   :  { %v1504_v50 = vmul.f32 %v1502_v47, %v1499_v45 }
 0xef2   :  { %v9388_v52 = vadd.f32 %v1506_v48, %v1504_v50 }
 0xef4   :  { %1614 = vrot.lane.b32.xlu0 %v9388_v52, %s8726_s15  ;;  %v1714_v37 = vrot.slane %v9388_v52, 6 }
 0xf57   :  { %v1606_v55 = vpop.permute.xlu1 %1605 }
 0xf58   :  { %v1608_v59 = vmul.f32 %v1606_v55, %v1603_v53 }
 0xf5a   :  { %v9393_v60 = vadd.f32 %v1611_v56, %v1608_v59 }
 0xf5c   :  { %v1719_v61 = vrot.slane %v9393_v60, 6  ;;  %v1820_v47 = vrot.slane %v9393_v60, 2 }
 0xf5e   :  { %1720 = vrot.lane.b32.xlu1 %v1719_v61, %s8726_s15 }
 0xf66   :  { %v1615_v62 = vpop.permute.xlu0 %1614 }
 0xf67   :  { %7109 = vmatmul.mubr.msk.f32.vlgmr.msra.gmra.mrb[12].mxu0 %vm382_vm2, %v1615_v62 }
 0xf68   :  { %7754 = vmatpush3.bf16.msra.mxu0 %v9132_v23  ;;  %7130 = vmatprep.mubr.msk.f32.mxu0 %vm8723_vm0, %v8724_v1 }
 0xf69   :  { %7755 = vmatprep.subr.bf16.mxu0 %v8722_v0 }
 0xf6c   :  { %7757 = vmatpush3.bf16.msra.mxu0 %v9143_v26 }
 0xf6d   :  { %7764 = vmatprep.subr.bf16.mxu0 %v8722_v0 }
 0xfd0   :  { %v1721_v63 = vpop.permute.xlu1 %1720 }
 0xfd1   :  { %7120 = vmatmul.mubr.msk.f32.vlgmr.msra.gmra.mrb[14].mxu1 %vm382_vm2, %v1721_v63 }
 0xfd2   :  { %7760 = vmatpush3.bf16.msra.mxu1 %v9180_v41  ;;  %7141 = vmatprep.mubr.msk.f32.mxu1 %vm8723_vm0, %v8724_v1 }
 0xfd3   :  { %7761 = vmatprep.subr.bf16.mxu1 %v8722_v0 }
 0xfd6   :  { %7763 = vmatpush3.bf16.msra.mxu1 %v9193_v46 }
 0xfd7   :  { %7770 = vmatprep.subr.bf16.mxu1 %v8722_v0 }
0x103a   :  { %v1684_v2 = vpop.f32.mrb[12].mxu0 }
0x103b   :  { %v1685_v51 = vadd.f32 %v9178_v39, %v1684_v2  ;;  %v7110_v6 = vpop.f32.mrb[13].mxu0 }
0x103d   :  { %v1689_v4 = vrot.slane %v1685_v51, 6 }
0x103f   :  { %1698 = vrot.lane.b32.xlu0 %v1689_v4, %s8725_s20  ;;  %v1691_v5 = vadd.f32 %v1689_v4, %v9207_v49 }
0x1041   :  { %v6511_v7 = vmul.f32 -1.442695, %v1691_v5 }
0x1043   :  { %8145 = vpow2.f32 %v6511_v7 }
0x104d   :  { %v8146_v9 = vpop.eup %8145 }
0x104e   :  { %v1695_v10 = vadd.f32 1.0, %v8146_v9 }
0x1050   :  { %8147 = vrcp.f32 %v1695_v10 }
0x105a   :  { %v8148_v16 = vpop.eup %8147 }
0x105b   :  { %v1708_v36 = vsub.f32 1.0, %v8148_v16  ;;  %v1716_v40 = vmul.f32 %v8148_v16, %v1714_v37 }
0x10a4   :  { %v1790_v11 = vpop.f32.mrb[14].mxu1 }
0x10a5   :  { %v1791_v12 = vadd.f32 %v9214_v58, %v1790_v11  ;;  %v7121_v13 = vpop.f32.mrb[15].mxu1 }
0x10a7   :  { %v1795_v15 = vrot.slane %v1791_v12, 4 }
0x10a9   :  { %1804 = vrot.lane.b32.xlu1 %v1795_v15, %s8725_s20  ;;  %v1797_v25 = vadd.f32 %v1795_v15, %v9212_v57 }
0x10ab   :  { %v6513_v14 = vmul.f32 -1.442695, %v1797_v25 }
0x10ad   :  { %8149 = vpow2.f32 %v6513_v14 }
0x10b1   :  { %v1699_v17 = vpop.permute.xlu0 %1698 }
0x10b2   :  { %v1701_v19 = vmul.f32 %v8148_v16, %v1699_v17 }
0x10b4   :  { %1703 = vrot.lane.b32.xlu0 %v1701_v19, %s8725_s20 }
0x10b7   :  { %v8150_v20 = vpop.eup %8149 }
0x10b8   :  { %v1801_v22 = vadd.f32 1.0, %v8150_v20 }
0x10ba   :  { %8151 = vrcp.f32 %v1801_v22 }
0x10c4   :  { %v8152_v24 = vpop.eup %8151 }
0x10c5   :  { %v1814_v45 = vsub.f32 1.0, %v8152_v24  ;;  %v1822_v50 = vmul.f32 %v8152_v24, %v1820_v47 }
0x111b   :  { %v1805_v27 = vpop.permute.xlu1 %1804 }
0x111c   :  { %v1807_v28 = vmul.f32 %v8152_v24, %v1805_v27 }
0x111e   :  { %1809 = vrot.lane.b32.xlu1 %v1807_v28, %s8725_s20 }
0x1126   :  { %v1704_v29 = vpop.permute.xlu0 %1703 }
0x1127   :  { %v1706_v30 = vadd.f32 %v1704_v29, %v9207_v49 }
0x1129   :  { %8153 = vtanh.f32 %v1706_v30 }
0x1133   :  { %v8154_v32 = vpop.eup %8153 }
0x1134   :  { %1710 = vrot.lane.b32.xlu0 %v8154_v32, %s8726_s15 }
0x1190   :  { %v1810_v33 = vpop.permute.xlu1 %1809 }
0x1191   :  { %v1812_v34 = vadd.f32 %v1810_v33, %v9212_v57 }
0x1193   :  { %8155 = vtanh.f32 %v1812_v34 }
0x119d   :  { %v8156_v35 = vpop.eup %8155 }
0x119e   :  { %1816 = vrot.lane.b32.xlu1 %v8156_v35, %s8726_s15 }
0x11a6   :  { %v1711_v38 = vpop.permute.xlu0 %1710 }
0x11a7   :  { %v1713_v42 = vmul.f32 %v1711_v38, %v1708_v36 }
0x11a9   :  { %v9424_v43 = vadd.f32 %v1716_v40, %v1713_v42 }
0x11ab   :  { %v1825_v44 = vrot.slane %v9424_v43, 2  ;;  %v1926_v29 = vrot.slane %v9424_v43, 6  ;;  %v2251_v35 = vsel %vm2245_vm3, %v9388_v52, %v9424_v43 }
0x11ad   :  { %1826 = vrot.lane.b32.xlu0 %v1825_v44, %s8726_s15 }
0x1210   :  { %v1817_v48 = vpop.permute.xlu1 %1816 }
0x1211   :  { %v1819_v53 = vmul.f32 %v1817_v48, %v1814_v45 }
0x1213   :  { %v9429_v54 = vadd.f32 %v1822_v50, %v1819_v53 }
0x1215   :  { %v1931_v55 = vrot.slane %v9429_v54, 4  ;;  %v2032_v40 = vrot.slane %v9429_v54, 2 }
0x1217   :  { %1932 = vrot.lane.b32.xlu1 %v1931_v55, %s8726_s15 }
0x121f   :  { %v1827_v56 = vpop.permute.xlu0 %1826 }
0x1220   :  { %7131 = vmatmul.mubr.msk.f32.vlgmr.msra.gmra.mrb[14].mxu0 %vm382_vm2, %v1827_v56 }
0x1221   :  { %7766 = vmatpush3.bf16.msra.mxu0 %v9132_v23  ;;  %7152 = vmatprep.mubr.msk.f32.mxu0 %vm8723_vm0, %v8724_v1 }
0x1222   :  { %7767 = vmatprep.subr.bf16.mxu0 %v8722_v0 }
0x1225   :  { %7769 = vmatpush3.bf16.msra.mxu0 %v9143_v26 }
0x1289   :  { %v1933_v59 = vpop.permute.xlu1 %1932 }
0x128a   :  { %7142 = vmatmul.mubr.msk.f32.vlgmr.msra.gmra.mrb[16].mxu1 %vm382_vm2, %v1933_v59 }
0x128b   :  { %7772 = vmatpush3.bf16.msra.mxu1 %v9180_v41  ;;  %7163 = vmatprep.mubr.msk.f32.mxu1 %vm8723_vm0, %v8724_v1 }
0x128c   :  { %7773 = vmatprep.subr.bf16.mxu1 %v8722_v0 }
0x128f   :  { %7775 = vmatpush3.bf16.msra.mxu1 %v9193_v46 }
0x12f3   :  { %v1896_v23 = vpop.f32.mrb[14].mxu0 }
0x12f4   :  { %v1897_v61 = vadd.f32 %v9178_v39, %v1896_v23  ;;  %v7132_v62 = vpop.f32.mrb[15].mxu0 }
0x12f6   :  { %v1901_v63 = vrot.slane %v1897_v61, 4 }
0x12f8   :  { %1910 = vrot.lane.b32.xlu0 %v1901_v63, %s8725_s20  ;;  %v1903_v26 = vadd.f32 %v1901_v63, %v9207_v49 }
0x12fa   :  { %v6515_v2 = vmul.f32 -1.442695, %v1903_v26 }
0x12fc   :  { %8157 = vpow2.f32 %v6515_v2 }
0x1306   :  { %v8158_v51 = vpop.eup %8157 }
0x1307   :  { %v1907_v41 = vadd.f32 1.0, %v8158_v51 }
0x1309   :  { %8159 = vrcp.f32 %v1907_v41 }
0x1313   :  { %v8160_v46 = vpop.eup %8159 }
0x1314   :  { %v1920_v28 = vsub.f32 1.0, %v8160_v46  ;;  %v1928_v32 = vmul.f32 %v8160_v46, %v1926_v29  ;;  %v2275_v29 = vld [vmem:[%s10353_s27 + $0x28] sm:$0xff] }
0x135d   :  { %v2002_v6 = vpop.f32.mrb[16].mxu1 }
0x135e   :  { %v2003_v4 = vadd.f32 %v9214_v58, %v2002_v6  ;;  %v7143_v5 = vpop.f32.mrb[17].mxu1 }
0x1360   :  { %v2007_v7 = vrot.slane %v2003_v4, 6 }
0x1362   :  { %2016 = vrot.lane.b32.xlu1 %v2007_v7, %s8725_s20  ;;  %v2009_v11 = vadd.f32 %v2007_v7, %v9212_v57 }
0x1364   :  { %v6517_v12 = vmul.f32 -1.442695, %v2009_v11 }
0x1366   :  { %8161 = vpow2.f32 %v6517_v12 }
0x136a   :  { %v1911_v9 = vpop.permute.xlu0 %1910 }
0x136b   :  { %v1913_v10 = vmul.f32 %v8160_v46, %v1911_v9 }
0x136d   :  { %1915 = vrot.lane.b32.xlu0 %v1913_v10, %s8725_s20 }
0x1370   :  { %v8162_v13 = vpop.eup %8161 }
0x1371   :  { %v2013_v15 = vadd.f32 1.0, %v8162_v13  ;;  %v2270_v13 = vld [vmem:[%s10353_s27] sm:$0xff] }
0x1373   :  { %8163 = vrcp.f32 %v2013_v15  ;;  %v2271_v15 = vld [vmem:[%s10353_s27 + $0x8] sm:$0xff] }
0x137d   :  { %v8164_v16 = vpop.eup %8163 }
0x137e   :  { %v2026_v38 = vsub.f32 1.0, %v8164_v16  ;;  %v2034_v44 = vmul.f32 %v8164_v16, %v2032_v40  ;;  %v6531_v40 = vld [vmem:[%s10353_s27 + $0x70] sm:$0xff] }
0x13d4   :  { %v2017_v17 = vpop.permute.xlu1 %2016 }
0x13d5   :  { %v2019_v19 = vmul.f32 %v8164_v16, %v2017_v17  ;;  %v6525_v16 = vld [vmem:[%s10353_s27 + $0x40] sm:$0xff]  ;;  %v7776_v17 = vpack.c.bf16 %v2271_v15, %v2270_v13  ;;  %v6533_v13 = vld [vmem:[#allocation7 + $0x1] ss:$0 sm:$0xff] }
0x13d7   :  { %2021 = vrot.lane.b32.xlu1 %v2019_v19, %s8725_s20  ;;  %v6526_v19 = vld [vmem:[%s10353_s27 + $0x48] sm:$0xff]  ;;  %7777 = vmatprep.subr.bf16.mxu0 %v7776_v17 }
0x13df   :  { %v1916_v25 = vpop.permute.xlu0 %1915 }
0x13e0   :  { %v1918_v14 = vadd.f32 %v1916_v25, %v9207_v49  ;;  %v7792_v25 = vpack.c.bf16 %v6526_v19, %v6525_v16 }
0x13e2   :  { %8165 = vtanh.f32 %v1918_v14  ;;  %7793 = vmatprep.subr.bf16.mxu1 %v7792_v25  ;;  %v2272_v14 = vld [vmem:[%s10353_s27 + $0x10] sm:$0xff] }
0x13ec   :  { %v8166_v20 = vpop.eup %8165 }
0x13ed   :  { %1922 = vrot.lane.b32.xlu0 %v8166_v20, %s8726_s15  ;;  %v2273_v20 = vld [vmem:[%s10353_s27 + $0x18] sm:$0xff] }
0x1449   :  { %v2022_v22 = vpop.permute.xlu1 %2021 }
0x144a   :  { %v2024_v24 = vadd.f32 %v2022_v22, %v9212_v57  ;;  %v6527_v22 = vld [vmem:[%s10353_s27 + $0x50] sm:$0xff] }
0x144c   :  { %8167 = vtanh.f32 %v2024_v24  ;;  %v7780_v24 = vpack.c.bf16 %v2273_v20, %v2272_v14  ;;  %v9647_v14 = vld [vmem:[#allocation9 + $0x1] ss:$0 sm:$0xff] }
0x1456   :  { %v8168_v27 = vpop.eup %8167 }
0x1457   :  { %2028 = vrot.lane.b32.xlu1 %v8168_v27, %s8726_s15 }
0x145f   :  { %v1923_v30 = vpop.permute.xlu0 %1922 }
0x1460   :  { %v1925_v33 = vmul.f32 %v1923_v30, %v1920_v28  ;;  %v2274_v28 = vld [vmem:[%s10353_s27 + $0x20] sm:$0xff] }
0x1461   :  { %v6529_v30 = vld [vmem:[%s10353_s27 + $0x60] sm:$0xff] }
0x1462   :  { %v9458_v34 = vadd.f32 %v1928_v32, %v1925_v33  ;;  %v7784_v32 = vpack.c.bf16 %v2275_v29, %v2274_v28  ;;  %v6530_v33 = vld [vmem:[%s10353_s27 + $0x68] sm:$0xff] }
0x1464   :  { %v2037_v36 = vrot.slane %v9458_v34, 4  ;;  %v9466_v37 = vsel %vm2247_vm4, %v2251_v35, %v9458_v34  ;;  %v7800_v35 = vpack.c.bf16 %v6530_v33, %v6529_v30 }
0x1466   :  { %2038 = vrot.lane.b32.xlu0 %v2037_v36, %s8726_s15  ;;  %v2276_v36 = vld [vmem:[%s10353_s27 + $0x30] sm:$0xff] }
0x14c9   :  { %v2029_v42 = vpop.permute.xlu1 %2028 }
0x14ca   :  { %v2031_v45 = vmul.f32 %v2029_v42, %v2026_v38  ;;  %v2277_v38 = vld [vmem:[%s10353_s27 + $0x38] sm:$0xff] }
0x14cb   :  { %v7788_v42 = vpack.c.bf16 %v2277_v38, %v2276_v36 }
0x14cc   :  { %v9470_v47 = vadd.f32 %v2034_v44, %v2031_v45  ;;  %v6532_v44 = vld [vmem:[%s10353_s27 + $0x78] sm:$0xff] }
0x14cd   :  { %v7804_v45 = vpack.c.bf16 %v6532_v44, %v6531_v40 }
0x14ce   :  { %v2143_v48 = vrot.slane %v9470_v47, 2 }
0x14d0   :  { %2144 = vrot.lane.b32.xlu1 %v2143_v48, %s8726_s15 }
0x14d8   :  { %v2039_v52 = vpop.permute.xlu0 %2038 }
0x14d9   :  { %7153 = vmatmul.mubr.msk.f32.vlgmr.msra.gmra.mrb[16].mxu0 %vm382_vm2, %v2039_v52 }
0x14da   :  { %7779 = vmatpush3.bf16.msra.mxu0 %v7776_v17 }
0x14db   :  { %7781 = vmatprep.subr.bf16.mxu0 %v7780_v24 }
0x14de   :  { %7783 = vmatpush3.bf16.msra.mxu0 %v7780_v24 }
0x14df   :  { %7785 = vmatprep.subr.bf16.mxu0 %v7784_v32 }
0x14e2   :  { %7787 = vmatpush3.bf16.msra.mxu0 %v7784_v32 }
0x14e3   :  { %7789 = vmatprep.subr.bf16.mxu0 %v7788_v42 }
0x14e6   :  { %7791 = vmatpush3.bf16.msra.mxu0 %v7788_v42 }
0x14e7   :  { %7808 = vmatprep.subr.bf16.mxu0 %v8722_v0 }
0x1542   :  { %v2145_v43 = vpop.permute.xlu1 %2144 }
0x1543   :  { %7164 = vmatmul.mubr.msk.f32.vlgmr.msra.gmra.mrb[18].mxu1 %vm382_vm2, %v2145_v43 }
0x1544   :  { %7795 = vmatpush3.bf16.msra.mxu1 %v7792_v25  ;;  %v9645_v25 = vld [vmem:[#allocation9] ss:$0 sm:$0xff] }
0x15ac   :  { %v2108_v50 = vpop.f32.mrb[16].mxu0 }
0x15ad   :  { %v2109_v53 = vadd.f32 %v9178_v39, %v2108_v50  ;;  %v7154_v55 = vpop.f32.mrb[17].mxu0  ;;  %v2138_v50 = vrot.slane %v9458_v34, 6 }
0x15af   :  { %v2113_v56 = vrot.slane %v2109_v53, 2 }
0x15b1   :  { %2122 = vrot.lane.b32.xlu0 %v2113_v56, %s8725_s20  ;;  %v2115_v59 = vadd.f32 %v2113_v56, %v9207_v49 }
0x15b3   :  { %v6519_v23 = vmul.f32 -1.442695, %v2115_v59 }
0x15b5   :  { %8169 = vpow2.f32 %v6519_v23 }
0x15bf   :  { %v8170_v61 = vpop.eup %8169 }
0x15c0   :  { %v2119_v62 = vadd.f32 1.0, %v8170_v61 }
0x15c2   :  { %8171 = vrcp.f32 %v2119_v62 }
0x15cc   :  { %v9483_v51 = vpop.eup %8171 }
0x15cd   :  { %v2132_v43 = vsub.f32 1.0, %v9483_v51  ;;  %v2140_v55 = vmul.f32 %v9483_v51, %v2138_v50 }
0x1616   :  { %v2214_v63 = vpop.f32.mrb[18].mxu1 }
0x1617   :  { %v2215_v26 = vadd.f32 %v9214_v58, %v2214_v63  ;;  %v7165_v2 = vpop.f32.mrb[19].mxu1 }
0x1619   :  { %2226 = vrot.lane.b32.xlu1 %v2215_v26, %s8725_s20  ;;  %v2218_v6 = vadd.f32 %v2215_v26, %v9212_v57 }
0x161b   :  { %v6521_v4 = vmul.f32 -1.442695, %v2218_v6  ;;  %v6537_v6 = vld [vmem:[%s10354_s3 + $0x28] sm:$0xff] }
0x161d   :  { %8173 = vpow2.f32 %v6521_v4 }
0x1623   :  { %v2123_v39 = vpop.permute.xlu0 %2122 }
0x1624   :  { %v2125_v41 = vmul.f32 %v9483_v51, %v2123_v39 }
0x1626   :  { %2127 = vrot.lane.b32.xlu0 %v2125_v41, %s8725_s20 }
0x1627   :  { %v8174_v5 = vpop.eup %8173 }
0x1628   :  { %v2222_v7 = vadd.f32 1.0, %v8174_v5  ;;  %v2460_v5 = vld [vmem:[%s10354_s3 + $0x10] sm:$0xff] }
0x162a   :  { %8175 = vrcp.f32 %v2222_v7 }
0x1634   :  { %v9488_v46 = vpop.eup %8175 }
0x1635   :  { %v2236_v61 = vsub.f32 1.0, %v9488_v46  ;;  %v2243_v63 = vmul.f32 %v9488_v46, %v2143_v48  ;;  %v2257_v48 = vsel %vm2245_vm3, %v9356_v8, %v9310_v18 }
0x1636   :  { %v2258_v4 = vsel %vm2247_vm4, %v2257_v48, %v9267_v21  ;;  %v6538_v21 = vld [vmem:[%s10354_s3 + $0x30] sm:$0xff] }
0x1637   :  { %v2259_v7 = vsel %vm2249_vm5, %v2258_v4, %v9231_v31 }
0x168b   :  { %v2227_v58 = vpop.permute.xlu1 %2226 }
0x168c   :  { %v2229_v9 = vmul.f32 %v9488_v46, %v2227_v58  ;;  %v2461_v58 = vld [vmem:[%s10354_s3 + $0x18] sm:$0xff] }
0x168d   :  { %v9613_v31 = vpack.c.bf16 %v2461_v58, %v2460_v5 }
0x168e   :  { %2231 = vrot.lane.b32.xlu1 %v2229_v9, %s8725_s20  ;;  %v6539_v9 = vld [vmem:[%s10354_s3 + $0x38] sm:$0xff] }
0x1698   :  { %v2128_v10 = vpop.permute.xlu0 %2127 }
0x1699   :  { %v2130_v11 = vadd.f32 %v2128_v10, %v9207_v49 }
0x169b   :  { %8177 = vtanh.f32 %v2130_v11  ;;  %v9615_v11 = vpack.c.bf16 %v6539_v9, %v6538_v21 }
0x16a5   :  { %v8178_v12 = vpop.eup %8177 }
0x16a6   :  { %2134 = vrot.lane.b32.xlu0 %v8178_v12, %s8726_s15  ;;  %v6522_v12 = vld [vmem:[#allocation7] ss:$0 sm:$0xff] }
0x16aa   :  { %2262 = vrot.lane.b32.xlu0 %v9349_v3, %s8726_s15 }
0x1700   :  { %v2232_v49 = vpop.permute.xlu1 %2231 }
0x1701   :  { %v2234_v3 = vadd.f32 %v2232_v49, %v9212_v57  ;;  %v6528_v57 = vld [vmem:[%s10353_s27 + $0x58] sm:$0xff] }
0x1702   :  { %v7796_v27 = vpack.c.bf16 %v6528_v57, %v6527_v22 }
0x1703   :  { %8179 = vtanh.f32 %v2234_v3 }
0x1704   :  { %7797 = vmatprep.subr.bf16.mxu1 %v7796_v27 }
0x1705   :  { %7799 = vmatpush3.bf16.msra.mxu1 %v7796_v27 }
0x1706   :  { %7801 = vmatprep.subr.bf16.mxu1 %v7800_v35 }
0x1709   :  { %7803 = vmatpush3.bf16.msra.mxu1 %v7800_v35 }
0x170a   :  { %7805 = vmatprep.subr.bf16.mxu1 %v7804_v45 }
0x170d   :  { %v8180_v52 = vpop.eup %8179  ;;  %7807 = vmatpush3.bf16.msra.mxu1 %v7804_v45 }
0x170e   :  { %2238 = vrot.lane.b32.xlu1 %v8180_v52, %s8726_s15  ;;  %7814 = vmatprep.subr.bf16.mxu1 %v8722_v0 }
0x1718   :  { %v2135_v53 = vpop.permute.xlu0 %2134 }
0x1719   :  { %v2137_v56 = vmul.f32 %v2135_v53, %v2132_v43 }
0x171b   :  { %v9551_v59 = vadd.f32 %v2140_v55, %v2137_v56 }
0x171d   :  { %v2253_v23 = vsel %vm2249_vm5, %v9466_v37, %v9551_v59  ;;  %v2263_v37 = vpop.permute.xlu0 %2262 }
0x171e   :  { %2264 = vrot.lane.b32.xlu1 %v2253_v23, %s8726_s15 }
0x1780   :  { %v2239_v62 = vpop.permute.xlu1 %2238 }
0x1781   :  { %v2241_v34 = vmul.f32 %v2239_v62, %v2236_v61 }
0x1783   :  { %v9561_v26 = vadd.f32 %v2243_v63, %v2241_v34 }
0x1785   :  { %v2254_v2 = vsel %vm2245_vm3, %v9561_v26, %v9470_v47  ;;  %v2458_v47 = vld [vmem:[%s10354_s3] sm:$0xff] }
0x1786   :  { %v2255_v51 = vsel %vm2247_vm4, %v2254_v2, %v9429_v54  ;;  %v2459_v54 = vld [vmem:[%s10354_s3 + $0x8] sm:$0xff] }
0x1787   :  { %v2256_v39 = vsel %vm2249_vm5, %v2255_v51, %v9393_v60  ;;  %v6536_v60 = vld [vmem:[%s10354_s3 + $0x20] sm:$0xff]  ;;  %v9590_v18 = vpack.c.bf16 %v2459_v54, %v2458_v47 }
0x1788   :  { %v2268_v41 = vsel %vm382_vm2, %v2263_v37, %v2256_v39  ;;  %v9592_v8 = vpack.c.bf16 %v6537_v6, %v6536_v60 }
0x1789   :  { %7182 = vmatprep.mubr.msk.f32.mxu0 %vm296_vm1, %v2268_v41  ;;  %7201 = vmatprep.mubr.msk.f32.mxu1 %vm296_vm1, %v2268_v41 }
0x1790   :  { %v2265_v46 = vpop.permute.xlu1 %2264 }
0x1791   :  { %v2269_v10 = vsel %vm382_vm2, %v2265_v46, %v2259_v7 }
0x1792   :  { %7183 = vmatmul.mubr.msk.f32.vlgmr.msra.gmra.mrb[18].mxu0 %vm296_vm1, %v2269_v10  ;;  %7202 = vmatmul.mubr.msk.f32.vlgmr.msra.gmra.mrb[20].mxu1 %vm296_vm1, %v2269_v10 }
0x1793   :  { %7810 = vmatpush3.bf16.msra.mxu0 %v9590_v18  ;;  %7816 = vmatpush3.bf16.msra.mxu1 %v9592_v8 }
0x1794   :  { %7811 = vmatprep.subr.bf16.mxu0 %v8722_v0  ;;  %7817 = vmatprep.subr.bf16.mxu1 %v8722_v0 }
0x1795   :  { %7212 = vmatprep.mubr.msk.f32.mxu0 %vm8723_vm0, %v8724_v1  ;;  %7223 = vmatprep.mubr.msk.f32.mxu1 %vm8723_vm0, %v8724_v1 }
0x1797   :  { %7813 = vmatpush3.bf16.msra.mxu0 %v9613_v31  ;;  %7819 = vmatpush3.bf16.msra.mxu1 %v9615_v11 }
0x1798   :  { %7820 = vmatprep.subr.bf16.mxu0 %v8722_v0  ;;  %7826 = vmatprep.subr.bf16.mxu1 %v8722_v0 }
0x179a   :  { %7213 = vmatmul.mubr.f32.vlgmr.msra.gmra.mrb[20].mxu0 %v8724_v1  ;;  %7224 = vmatmul.mubr.f32.vlgmr.msra.gmra.mrb[22].mxu1 %v8724_v1 }
0x179b   :  { %7822 = vmatpush3.bf16.msra.mxu0 %v9590_v18  ;;  %7828 = vmatpush3.bf16.msra.mxu1 %v9592_v8 }
0x179c   :  { %7823 = vmatprep.subr.bf16.mxu0 %v8722_v0  ;;  %7234 = vmatprep.mubr.msk.f32.mxu0 %vm8723_vm0, %v8724_v1 }
0x179d   :  { %7829 = vmatprep.subr.bf16.mxu1 %v8722_v0  ;;  %7245 = vmatprep.mubr.msk.f32.mxu1 %vm8723_vm0, %v8724_v1 }
0x179f   :  { %7825 = vmatpush3.bf16.msra.mxu0 %v9613_v31  ;;  %7831 = vmatpush3.bf16.msra.mxu1 %v9615_v11 }
0x17a0   :  { %7832 = vmatprep.subr.bf16.mxu0 %v8722_v0  ;;  %7838 = vmatprep.subr.bf16.mxu1 %v8722_v0 }
0x1865   :  { %v7184_v15 = vpop.f32.mrb[18].mxu0  ;;  %v7203_v16 = vpop.f32.mrb[20].mxu1 }
0x1866   :  { %v9641_v49 = vadd.f32 %v7184_v15, %v6522_v12  ;;  %v2357_v17 = vpop.f32.mrb[19].mxu0  ;;  %v2449_v19 = vpop.f32.mrb[21].mxu1  ;;  %v9655_v32 = vadd.f32 %v7203_v16, %v6533_v13 }
0x1867   :  { %v9643_v3 = vadd.f32 %v6533_v13, %v2449_v19  ;;  %v9653_v30 = vadd.f32 %v6522_v12, %v2357_v17 }
0x186d   :  { %v2542_v20 = vpop.f32.mrb[20].mxu0  ;;  %v2644_v22 = vpop.f32.mrb[22].mxu1 }
0x186e   :  { %v2543_v24 = vadd.f32 %v9645_v25, %v2542_v20  ;;  %v2645_v57 = vadd.f32 %v9647_v14, %v2644_v22  ;;  %v7225_v27 = vpop.f32.mrb[23].mxu1  ;;  %v7214_v28 = vpop.f32.mrb[21].mxu0 }
0x1870   :  { %v2649_v29 = vrot.slane %v2645_v57, 2  ;;  %2554 = vrot.lane.b32.xlu0 %v2543_v24, %s8725_s20  ;;  %v2546_v33 = vadd.f32 %v2543_v24, %v9653_v30 }
0x1872   :  { %2658 = vrot.lane.b32.xlu1 %v2649_v29, %s8725_s20  ;;  %v2651_v35 = vadd.f32 %v2649_v29, %v9655_v32  ;;  %v6541_v36 = vmul.f32 -1.442695, %v2546_v33 }
0x1874   :  { %v6543_v38 = vmul.f32 -1.442695, %v2651_v35  ;;  %8181 = vpow2.f32 %v6541_v36 }
0x1876   :  { %8183 = vpow2.f32 %v6543_v38 }
0x187e   :  { %v8182_v40 = vpop.eup %8181 }
0x187f   :  { %v2550_v44 = vadd.f32 1.0, %v8182_v40 }
0x1880   :  { %v8184_v42 = vpop.eup %8183 }
0x1881   :  { %v2655_v45 = vadd.f32 1.0, %v8184_v42  ;;  %8185 = vrcp.f32 %v2550_v44 }
0x1883   :  { %8187 = vrcp.f32 %v2655_v45 }
0x188b   :  { %v8186_v52 = vpop.eup %8185 }
0x188c   :  { %v2564_v51 = vsub.f32 1.0, %v8186_v52  ;;  %v2570_v39 = vmul.f32 0.0, %v8186_v52 }
0x188d   :  { %v8188_v53 = vpop.eup %8187 }
0x188e   :  { %v2668_v48 = vsub.f32 1.0, %v8188_v53  ;;  %v2674_v60 = vmul.f32 0.0, %v8188_v53 }
0x18e2   :  { %v2555_v43 = vpop.permute.xlu0 %2554 }
0x18e3   :  { %v2557_v50 = vmul.f32 %v8186_v52, %v2555_v43 }
0x18e4   :  { %v2659_v55 = vpop.permute.xlu1 %2658 }
0x18e5   :  { %v2661_v56 = vmul.f32 %v8188_v53, %v2659_v55  ;;  %2559 = vrot.lane.b32.xlu0 %v2557_v50, %s8725_s20 }
0x18e7   :  { %2663 = vrot.lane.b32.xlu1 %v2661_v56, %s8725_s20 }
0x1957   :  { %v2560_v23 = vpop.permute.xlu0 %2559 }
0x1958   :  { %v2562_v61 = vadd.f32 %v2560_v23, %v9653_v30 }
0x1959   :  { %v2664_v62 = vpop.permute.xlu1 %2663 }
0x195a   :  { %8189 = vtanh.f32 %v2562_v61  ;;  %v2666_v63 = vadd.f32 %v2664_v62, %v9655_v32 }
0x195c   :  { %8191 = vtanh.f32 %v2666_v63 }
0x1964   :  { %v8190_v34 = vpop.eup %8189 }
0x1965   :  { %2566 = vrot.lane.b32.xlu0 %v8190_v34, %s8726_s15 }
0x1966   :  { %v8192_v2 = vpop.eup %8191 }
0x1967   :  { %2670 = vrot.lane.b32.xlu1 %v8192_v2, %s8726_s15 }
0x19d7   :  { %v2567_v37 = vpop.permute.xlu0 %2566 }
0x19d8   :  { %v2569_v41 = vmul.f32 %v2567_v37, %v2564_v51 }
0x19d9   :  { %v2671_v47 = vpop.permute.xlu1 %2670 }
0x19da   :  { %v9665_v54 = vadd.f32 %v2570_v39, %v2569_v41  ;;  %v2673_v6 = vmul.f32 %v2671_v47, %v2668_v48 }
0x19dc   :  { %v9667_v4 = vadd.f32 %v2674_v60, %v2673_v6  ;;  %2677 = vrot.lane.b32.xlu0 %v9665_v54, %s8726_s15  ;;  %v2777_v53 = vrot.slane %v9665_v54, 6 }
0x19de   :  { %v2782_v5 = vrot.slane %v9667_v4, 6  ;;  %v2883_v62 = vrot.slane %v9667_v4, 2 }
0x19e0   :  { %2783 = vrot.lane.b32.xlu1 %v2782_v5, %s8726_s15 }
0x1a4e   :  { %v2678_v7 = vpop.permute.xlu0 %2677 }
0x1a4f   :  { %7235 = vmatmul.mubr.msk.f32.vlgmr.msra.gmra.mrb[22].mxu0 %vm382_vm2, %v2678_v7 }
0x1a50   :  { %7834 = vmatpush3.bf16.msra.mxu0 %v9590_v18  ;;  %7256 = vmatprep.mubr.msk.f32.mxu0 %vm8723_vm0, %v8724_v1 }
0x1a51   :  { %7835 = vmatprep.subr.bf16.mxu0 %v8722_v0 }
0x1a52   :  { %v2784_v46 = vpop.permute.xlu1 %2783 }
0x1a53   :  { %7246 = vmatmul.mubr.msk.f32.vlgmr.msra.gmra.mrb[24].mxu1 %vm382_vm2, %v2784_v46 }
0x1a54   :  { %7837 = vmatpush3.bf16.msra.mxu0 %v9613_v31  ;;  %7840 = vmatpush3.bf16.msra.mxu1 %v9592_v8 }
0x1a55   :  { %7841 = vmatprep.subr.bf16.mxu1 %v8722_v0  ;;  %7267 = vmatprep.mubr.msk.f32.mxu1 %vm8723_vm0, %v8724_v1 }
0x1a56   :  { %7844 = vmatprep.subr.bf16.mxu0 %v8722_v0 }
0x1a58   :  { %7843 = vmatpush3.bf16.msra.mxu1 %v9615_v11 }
0x1a59   :  { %7850 = vmatprep.subr.bf16.mxu1 %v8722_v0 }
0x1b22   :  { %v2747_v58 = vpop.f32.mrb[22].mxu0 }
0x1b23   :  { %v2748_v21 = vadd.f32 %v9645_v25, %v2747_v58  ;;  %v7236_v9 = vpop.f32.mrb[23].mxu0 }
0x1b25   :  { %v2752_v10 = vrot.slane %v2748_v21, 6 }
0x1b26   :  { %v2853_v12 = vpop.f32.mrb[24].mxu1 }
0x1b27   :  { %v2854_v13 = vadd.f32 %v9647_v14, %v2853_v12  ;;  %2761 = vrot.lane.b32.xlu0 %v2752_v10, %s8725_s20  ;;  %v7247_v15 = vpop.f32.mrb[25].mxu1  ;;  %v2754_v17 = vadd.f32 %v2752_v10, %v9653_v30 }
0x1b29   :  { %v2858_v16 = vrot.slane %v2854_v13, 4  ;;  %v6545_v19 = vmul.f32 -1.442695, %v2754_v17 }
0x1b2b   :  { %2867 = vrot.lane.b32.xlu1 %v2858_v16, %s8725_s20  ;;  %v2860_v20 = vadd.f32 %v2858_v16, %v9655_v32  ;;  %8193 = vpow2.f32 %v6545_v19 }
0x1b2d   :  { %v6547_v22 = vmul.f32 -1.442695, %v2860_v20 }
0x1b2f   :  { %8195 = vpow2.f32 %v6547_v22 }
0x1b35   :  { %v8194_v24 = vpop.eup %8193 }
0x1b36   :  { %v2758_v57 = vadd.f32 1.0, %v8194_v24 }
0x1b38   :  { %8197 = vrcp.f32 %v2758_v57 }
0x1b39   :  { %v8196_v27 = vpop.eup %8195 }
0x1b3a   :  { %v2864_v28 = vadd.f32 1.0, %v8196_v27 }
0x1b3c   :  { %8199 = vrcp.f32 %v2864_v28 }
0x1b42   :  { %v8198_v29 = vpop.eup %8197 }
0x1b43   :  { %v2771_v55 = vsub.f32 1.0, %v8198_v29  ;;  %v2779_v61 = vmul.f32 %v8198_v29, %v2777_v53 }
0x1b46   :  { %v8200_v36 = vpop.eup %8199 }
0x1b47   :  { %v2877_v34 = vsub.f32 1.0, %v8200_v36  ;;  %v2885_v51 = vmul.f32 %v8200_v36, %v2883_v62 }
0x1b99   :  { %v2762_v33 = vpop.permute.xlu0 %2761 }
0x1b9a   :  { %v2764_v35 = vmul.f32 %v8198_v29, %v2762_v33 }
0x1b9c   :  { %2766 = vrot.lane.b32.xlu0 %v2764_v35, %s8725_s20 }
0x1b9d   :  { %v2868_v38 = vpop.permute.xlu1 %2867 }
0x1b9e   :  { %v2870_v40 = vmul.f32 %v8200_v36, %v2868_v38 }
0x1ba0   :  { %2872 = vrot.lane.b32.xlu1 %v2870_v40, %s8725_s20 }
0x1c0e   :  { %v2767_v42 = vpop.permute.xlu0 %2766 }
0x1c0f   :  { %v2769_v44 = vadd.f32 %v2767_v42, %v9653_v30 }
0x1c11   :  { %8201 = vtanh.f32 %v2769_v44 }
0x1c12   :  { %v2873_v45 = vpop.permute.xlu1 %2872 }
0x1c13   :  { %v2875_v52 = vadd.f32 %v2873_v45, %v9655_v32 }
0x1c15   :  { %8203 = vtanh.f32 %v2875_v52 }
0x1c1b   :  { %v8202_v43 = vpop.eup %8201 }
0x1c1c   :  { %2773 = vrot.lane.b32.xlu0 %v8202_v43, %s8726_s15 }
0x1c1f   :  { %v8204_v50 = vpop.eup %8203 }
0x1c20   :  { %2879 = vrot.lane.b32.xlu1 %v8204_v50, %s8726_s15 }
0x1c8e   :  { %v2774_v56 = vpop.permute.xlu0 %2773 }
0x1c8f   :  { %v2776_v23 = vmul.f32 %v2774_v56, %v2771_v55 }
0x1c91   :  { %v9701_v63 = vadd.f32 %v2779_v61, %v2776_v23 }
0x1c92   :  { %v2880_v2 = vpop.permute.xlu1 %2879 }
0x1c93   :  { %v2882_v37 = vmul.f32 %v2880_v2, %v2877_v34  ;;  %v2888_v39 = vrot.slane %v9701_v63, 2  ;;  %v2989_v42 = vrot.slane %v9701_v63, 6 }
0x1c95   :  { %v9704_v41 = vadd.f32 %v2885_v51, %v2882_v37  ;;  %2889 = vrot.lane.b32.xlu0 %v2888_v39, %s8726_s15 }
0x1c97   :  { %v2994_v48 = vrot.slane %v9704_v41, 4  ;;  %v3095_v50 = vrot.slane %v9704_v41, 2 }
0x1c99   :  { %2995 = vrot.lane.b32.xlu1 %v2994_v48, %s8726_s15 }
0x1d07   :  { %v2890_v47 = vpop.permute.xlu0 %2889 }
0x1d08   :  { %7257 = vmatmul.mubr.msk.f32.vlgmr.msra.gmra.mrb[24].mxu0 %vm382_vm2, %v2890_v47 }
0x1d09   :  { %7846 = vmatpush3.bf16.msra.mxu0 %v9590_v18  ;;  %7278 = vmatprep.mubr.msk.f32.mxu0 %vm8723_vm0, %v8724_v1 }
0x1d0a   :  { %7847 = vmatprep.subr.bf16.mxu0 %v8722_v0 }
0x1d0b   :  { %v2996_v54 = vpop.permute.xlu1 %2995 }
0x1d0c   :  { %7268 = vmatmul.mubr.msk.f32.vlgmr.msra.gmra.mrb[26].mxu1 %vm382_vm2, %v2996_v54 }
0x1d0d   :  { %7849 = vmatpush3.bf16.msra.mxu0 %v9613_v31  ;;  %7852 = vmatpush3.bf16.msra.mxu1 %v9592_v8 }
0x1d0e   :  { %7853 = vmatprep.subr.bf16.mxu1 %v8722_v0  ;;  %7289 = vmatprep.mubr.msk.f32.mxu1 %vm8723_vm0, %v8724_v1 }
0x1d0f   :  { %7856 = vmatprep.subr.bf16.mxu0 %v8722_v0 }
0x1d11   :  { %7855 = vmatpush3.bf16.msra.mxu1 %v9615_v11 }
0x1d12   :  { %7862 = vmatprep.subr.bf16.mxu1 %v8722_v0 }
0x1ddb   :  { %v2959_v60 = vpop.f32.mrb[24].mxu0 }
0x1ddc   :  { %v2960_v6 = vadd.f32 %v9645_v25, %v2959_v60  ;;  %v7258_v4 = vpop.f32.mrb[25].mxu0 }
0x1dde   :  { %v2964_v5 = vrot.slane %v2960_v6, 4 }
0x1ddf   :  { %v3065_v7 = vpop.f32.mrb[26].mxu1 }
0x1de0   :  { %v3066_v46 = vadd.f32 %v9647_v14, %v3065_v7  ;;  %2973 = vrot.lane.b32.xlu0 %v2964_v5, %s8725_s20  ;;  %v7269_v58 = vpop.f32.mrb[27].mxu1  ;;  %v2966_v9 = vadd.f32 %v2964_v5, %v9653_v30 }
0x1de2   :  { %v3070_v21 = vrot.slane %v3066_v46, 6  ;;  %v6549_v10 = vmul.f32 -1.442695, %v2966_v9 }
0x1de4   :  { %3079 = vrot.lane.b32.xlu1 %v3070_v21, %s8725_s20  ;;  %v3072_v12 = vadd.f32 %v3070_v21, %v9655_v32  ;;  %8205 = vpow2.f32 %v6549_v10 }
0x1de6   :  { %v6551_v13 = vmul.f32 -1.442695, %v3072_v12 }
0x1de8   :  { %8207 = vpow2.f32 %v6551_v13 }
0x1dee   :  { %v8206_v15 = vpop.eup %8205 }
0x1def   :  { %v2970_v16 = vadd.f32 1.0, %v8206_v15 }
0x1df1   :  { %8209 = vrcp.f32 %v2970_v16 }
0x1df2   :  { %v8208_v17 = vpop.eup %8207 }
0x1df3   :  { %v3076_v19 = vadd.f32 1.0, %v8208_v17 }
0x1df5   :  { %8211 = vrcp.f32 %v3076_v19 }
0x1dfb   :  { %v8210_v20 = vpop.eup %8209 }
0x1dfc   :  { %v2983_v44 = vsub.f32 1.0, %v8210_v20  ;;  %v2991_v52 = vmul.f32 %v8210_v20, %v2989_v42 }
0x1dff   :  { %v8212_v57 = vpop.eup %8211 }
0x1e00   :  { %v3089_v55 = vsub.f32 1.0, %v8212_v57  ;;  %v3097_v23 = vmul.f32 %v8212_v57, %v3095_v50 }
0x1e52   :  { %v2974_v22 = vpop.permute.xlu0 %2973 }
0x1e53   :  { %v2976_v24 = vmul.f32 %v8210_v20, %v2974_v22 }
0x1e55   :  { %2978 = vrot.lane.b32.xlu0 %v2976_v24, %s8725_s20 }
0x1e56   :  { %v3080_v27 = vpop.permute.xlu1 %3079 }
0x1e57   :  { %v3082_v28 = vmul.f32 %v8212_v57, %v3080_v27 }
0x1e59   :  { %3084 = vrot.lane.b32.xlu1 %v3082_v28, %s8725_s20 }
0x1ec7   :  { %v2979_v29 = vpop.permute.xlu0 %2978 }
0x1ec8   :  { %v2981_v33 = vadd.f32 %v2979_v29, %v9653_v30 }
0x1eca   :  { %8213 = vtanh.f32 %v2981_v33 }
0x1ecb   :  { %v3085_v35 = vpop.permute.xlu1 %3084 }
0x1ecc   :  { %v3087_v36 = vadd.f32 %v3085_v35, %v9655_v32 }
0x1ece   :  { %8215 = vtanh.f32 %v3087_v36 }
0x1ed4   :  { %v8214_v38 = vpop.eup %8213 }
0x1ed5   :  { %2985 = vrot.lane.b32.xlu0 %v8214_v38, %s8726_s15 }
0x1ed8   :  { %v8216_v40 = vpop.eup %8215 }
0x1ed9   :  { %3091 = vrot.lane.b32.xlu1 %v8216_v40, %s8726_s15 }
0x1f47   :  { %v2986_v45 = vpop.permute.xlu0 %2985 }
0x1f48   :  { %v2988_v43 = vmul.f32 %v2986_v45, %v2983_v44 }
0x1f4a   :  { %v9737_v53 = vadd.f32 %v2991_v52, %v2988_v43 }
0x1f4b   :  { %v3092_v56 = vpop.permute.xlu1 %3091 }
0x1f4c   :  { %v3094_v61 = vmul.f32 %v3092_v56, %v3089_v55  ;;  %v3100_v62 = vrot.slane %v9737_v53, 4  ;;  %v3201_v28 = vrot.slane %v9737_v53, 6 }
0x1f4e   :  { %v9740_v34 = vadd.f32 %v3097_v23, %v3094_v61  ;;  %3101 = vrot.lane.b32.xlu0 %v3100_v62, %s8726_s15 }
0x1f50   :  { %v3206_v63 = vrot.slane %v9740_v34, 2 }
0x1f52   :  { %3207 = vrot.lane.b32.xlu1 %v3206_v63, %s8726_s15 }
0x1fc0   :  { %v3102_v2 = vpop.permute.xlu0 %3101 }
0x1fc1   :  { %7279 = vmatmul.mubr.msk.f32.vlgmr.msra.gmra.mrb[26].mxu0 %vm382_vm2, %v3102_v2 }
0x1fc2   :  { %7858 = vmatpush3.bf16.msra.mxu0 %v9590_v18  ;;  %7300 = vmatprep.mubr.msk.f32.mxu0 %vm8723_vm0, %v8724_v1 }
0x1fc3   :  { %7859 = vmatprep.subr.bf16.mxu0 %v8722_v0 }
0x1fc4   :  { %v3208_v51 = vpop.permute.xlu1 %3207 }
0x1fc5   :  { %7290 = vmatmul.mubr.msk.f32.vlgmr.msra.gmra.mrb[28].mxu1 %vm382_vm2, %v3208_v51 }
0x1fc6   :  { %7864 = vmatpush3.bf16.msra.mxu1 %v9592_v8  ;;  %7861 = vmatpush3.bf16.msra.mxu0 %v9613_v31 }
0x1fc7   :  { %7865 = vmatprep.subr.bf16.mxu1 %v8722_v0  ;;  %7311 = vmatprep.mubr.msk.f32.mxu1 %vm8723_vm0, %v8724_v1 }
0x1fc8   :  { %7868 = vmatprep.subr.bf16.mxu0 %v8722_v0 }
0x1fca   :  { %7867 = vmatpush3.bf16.msra.mxu1 %v9615_v11 }
0x1fcb   :  { %7874 = vmatprep.subr.bf16.mxu1 %v8722_v0 }
0x2094   :  { %v3171_v37 = vpop.f32.mrb[26].mxu0 }
0x2095   :  { %v3172_v39 = vadd.f32 %v9645_v25, %v3171_v37  ;;  %v7280_v41 = vpop.f32.mrb[27].mxu0 }
0x2097   :  { %v3176_v48 = vrot.slane %v3172_v39, 2 }
0x2098   :  { %v3277_v47 = vpop.f32.mrb[28].mxu1 }
0x2099   :  { %v3278_v54 = vadd.f32 %v9647_v14, %v3277_v47  ;;  %3185 = vrot.lane.b32.xlu0 %v3176_v48, %s8725_s20  ;;  %v7291_v60 = vpop.f32.mrb[29].mxu1  ;;  %v3178_v6 = vadd.f32 %v3176_v48, %v9653_v30 }
0x209b   :  { %3289 = vrot.lane.b32.xlu1 %v3278_v54, %s8725_s20  ;;  %v3281_v4 = vadd.f32 %v3278_v54, %v9655_v32  ;;  %v6553_v5 = vmul.f32 -1.442695, %v3178_v6 }
0x209d   :  { %v6555_v7 = vmul.f32 -1.442695, %v3281_v4  ;;  %8217 = vpow2.f32 %v6553_v5 }
0x209f   :  { %8219 = vpow2.f32 %v6555_v7 }
0x20a7   :  { %v8218_v46 = vpop.eup %8217 }
0x20a8   :  { %v3182_v21 = vadd.f32 1.0, %v8218_v46 }
0x20a9   :  { %v8220_v58 = vpop.eup %8219 }
0x20aa   :  { %v3285_v9 = vadd.f32 1.0, %v8220_v58  ;;  %8221 = vrcp.f32 %v3182_v21 }
0x20ac   :  { %8223 = vrcp.f32 %v3285_v9 }
0x20b4   :  { %v8222_v10 = vpop.eup %8221 }
0x20b5   :  { %v3195_v29 = vsub.f32 1.0, %v8222_v10  ;;  %v3203_v35 = vmul.f32 %v8222_v10, %v3201_v28 }
0x20b6   :  { %v8224_v15 = vpop.eup %8223 }
0x20b7   :  { %v3299_v38 = vsub.f32 1.0, %v8224_v15 }
0x210b   :  { %v3186_v12 = vpop.permute.xlu0 %3185 }
0x210c   :  { %v3188_v13 = vmul.f32 %v8222_v10, %v3186_v12 }
0x210d   :  { %v3290_v16 = vpop.permute.xlu1 %3289 }
0x210e   :  { %v3292_v17 = vmul.f32 %v8224_v15, %v3290_v16  ;;  %3190 = vrot.lane.b32.xlu0 %v3188_v13, %s8725_s20 }
0x2110   :  { %3294 = vrot.lane.b32.xlu1 %v3292_v17, %s8725_s20 }
0x2180   :  { %v3191_v19 = vpop.permute.xlu0 %3190 }
0x2181   :  { %v3193_v20 = vadd.f32 %v3191_v19, %v9653_v30 }
0x2182   :  { %v3295_v22 = vpop.permute.xlu1 %3294 }
0x2183   :  { %8225 = vtanh.f32 %v3193_v20  ;;  %v3297_v24 = vadd.f32 %v3295_v22, %v9655_v32  ;;  %v3306_v32 = vmul.f32 %v8224_v15, %v3206_v63 }
0x2185   :  { %8227 = vtanh.f32 %v3297_v24 }
0x218d   :  { %v8226_v57 = vpop.eup %8225 }
0x218e   :  { %3197 = vrot.lane.b32.xlu0 %v8226_v57, %s8726_s15 }
0x218f   :  { %v8228_v27 = vpop.eup %8227 }
0x2190   :  { %3301 = vrot.lane.b32.xlu1 %v8228_v27, %s8726_s15 }
0x2200   :  { %v3198_v33 = vpop.permute.xlu0 %3197 }
0x2201   :  { %v3200_v36 = vmul.f32 %v3198_v33, %v3195_v29 }
0x2202   :  { %v3302_v40 = vpop.permute.xlu1 %3301 }
0x2203   :  { %v9774_v30 = vadd.f32 %v3203_v35, %v3200_v36  ;;  %v3304_v42 = vmul.f32 %v3302_v40, %v3299_v38 }
0x2205   :  { %v3309_v44 = vrot.slane %v9774_v30, 6  ;;  %v9779_v45 = vadd.f32 %v3306_v32, %v3304_v42 }
0x2207   :  { %3310 = vrot.lane.b32.xlu1 %v3309_v44, %s8726_s15  ;;  %3412 = vrot.lane.b32.xlu0 %v9779_v45, %s8726_s15  ;;  %v3512_v15 = vrot.slane %v9779_v45, 2 }
0x2279   :  { %v3413_v52 = vpop.permute.xlu0 %3412  ;;  %v3311_v43 = vpop.permute.xlu1 %3310 }
0x227a   :  { %7301 = vmatmul.mubr.msk.f32.vlgmr.msra.gmra.mrb[28].mxu0 %vm382_vm2, %v3311_v43  ;;  %7312 = vmatmul.mubr.msk.f32.vlgmr.msra.gmra.mrb[30].mxu1 %vm382_vm2, %v3413_v52 }
0x227b   :  { %7870 = vmatpush3.bf16.msra.mxu0 %v9590_v18  ;;  %7876 = vmatpush3.bf16.msra.mxu1 %v9592_v8 }
0x227c   :  { %7871 = vmatprep.subr.bf16.mxu0 %v8722_v0  ;;  %7322 = vmatprep.mubr.msk.f32.mxu0 %vm8723_vm0, %v8724_v1 }
0x227d   :  { %7877 = vmatprep.subr.bf16.mxu1 %v8722_v0  ;;  %7333 = vmatprep.mubr.msk.f32.mxu1 %vm8723_vm0, %v8724_v1 }
0x227f   :  { %7873 = vmatpush3.bf16.msra.mxu0 %v9613_v31  ;;  %7879 = vmatpush3.bf16.msra.mxu1 %v9615_v11 }
0x2280   :  { %7880 = vmatprep.subr.bf16.mxu0 %v8722_v0  ;;  %7886 = vmatprep.subr.bf16.mxu1 %v8722_v0 }
0x234d   :  { %v3380_v50 = vpop.f32.mrb[28].mxu0  ;;  %v3482_v53 = vpop.f32.mrb[30].mxu1 }
0x234e   :  { %v3381_v55 = vadd.f32 %v9645_v25, %v3380_v50  ;;  %v3483_v56 = vadd.f32 %v9647_v14, %v3482_v53  ;;  %v7302_v23 = vpop.f32.mrb[29].mxu0  ;;  %v7313_v61 = vpop.f32.mrb[31].mxu1 }
0x2350   :  { %v3487_v62 = vrot.slane %v3483_v56, 2  ;;  %3392 = vrot.lane.b32.xlu0 %v3381_v55, %s8725_s20  ;;  %v3384_v34 = vadd.f32 %v3381_v55, %v9641_v49 }
0x2352   :  { %3496 = vrot.lane.b32.xlu1 %v3487_v62, %s8725_s20  ;;  %v3489_v63 = vadd.f32 %v3487_v62, %v9643_v3  ;;  %v6557_v2 = vmul.f32 -1.442695, %v3384_v34 }
0x2354   :  { %v6559_v51 = vmul.f32 -1.442695, %v3489_v63  ;;  %8229 = vpow2.f32 %v6557_v2 }
0x2356   :  { %8231 = vpow2.f32 %v6559_v51 }
0x235e   :  { %v8230_v37 = vpop.eup %8229 }
0x235f   :  { %v3388_v41 = vadd.f32 1.0, %v8230_v37 }
0x2360   :  { %v8232_v39 = vpop.eup %8231 }
0x2361   :  { %v3493_v48 = vadd.f32 1.0, %v8232_v39  ;;  %8233 = vrcp.f32 %v3388_v41 }
0x2363   :  { %8235 = vrcp.f32 %v3493_v48 }
0x236b   :  { %v8234_v47 = vpop.eup %8233 }
0x236c   :  { %v3402_v12 = vsub.f32 1.0, %v8234_v47  ;;  %v3409_v16 = vmul.f32 %v8234_v47, %v3309_v44 }
0x236d   :  { %v8236_v6 = vpop.eup %8235 }
0x236e   :  { %v3506_v19 = vsub.f32 1.0, %v8236_v6  ;;  %v3514_v24 = vmul.f32 %v8236_v6, %v3512_v15 }
0x23c2   :  { %v3393_v54 = vpop.permute.xlu0 %3392 }
0x23c3   :  { %v3395_v60 = vmul.f32 %v8234_v47, %v3393_v54 }
0x23c4   :  { %v3497_v4 = vpop.permute.xlu1 %3496 }
0x23c5   :  { %v3499_v5 = vmul.f32 %v8236_v6, %v3497_v4  ;;  %3397 = vrot.lane.b32.xlu0 %v3395_v60, %s8725_s20 }
0x23c7   :  { %3501 = vrot.lane.b32.xlu1 %v3499_v5, %s8725_s20 }
0x2437   :  { %v3398_v7 = vpop.permute.xlu0 %3397 }
0x2438   :  { %v3400_v46 = vadd.f32 %v3398_v7, %v9641_v49 }
0x2439   :  { %v3502_v58 = vpop.permute.xlu1 %3501 }
0x243a   :  { %8237 = vtanh.f32 %v3400_v46  ;;  %v3504_v21 = vadd.f32 %v3502_v58, %v9643_v3 }
0x243c   :  { %8239 = vtanh.f32 %v3504_v21 }
0x2444   :  { %v8238_v9 = vpop.eup %8237 }
0x2445   :  { %3404 = vrot.lane.b32.xlu0 %v8238_v9, %s8726_s15 }
0x2446   :  { %v8240_v10 = vpop.eup %8239 }
0x2447   :  { %3508 = vrot.lane.b32.xlu1 %v8240_v10, %s8726_s15 }
0x24b7   :  { %v3405_v13 = vpop.permute.xlu0 %3404 }
0x24b8   :  { %v3407_v17 = vmul.f32 %v3405_v13, %v3402_v12 }
0x24b9   :  { %v3509_v20 = vpop.permute.xlu1 %3508 }
0x24ba   :  { %v9811_v22 = vadd.f32 %v3409_v16, %v3407_v17  ;;  %v3511_v57 = vmul.f32 %v3509_v20, %v3506_v19 }
0x24bc   :  { %v9813_v27 = vadd.f32 %v3514_v24, %v3511_v57  ;;  %3517 = vrot.lane.b32.xlu0 %v9811_v22, %s8726_s15  ;;  %v3617_v60 = vrot.slane %v9811_v22, 6 }
0x24be   :  { %v3622_v28 = vrot.slane %v9813_v27, 6  ;;  %v3723_v46 = vrot.slane %v9813_v27, 2 }
0x24c0   :  { %3623 = vrot.lane.b32.xlu1 %v3622_v28, %s8726_s15 }
0x252e   :  { %v3518_v29 = vpop.permute.xlu0 %3517 }
0x252f   :  { %7323 = vmatmul.mubr.msk.f32.vlgmr.msra.gmra.mrb[30].mxu0 %vm382_vm2, %v3518_v29 }
0x2530   :  { %7882 = vmatpush3.bf16.msra.mxu0 %v9590_v18  ;;  %7344 = vmatprep.mubr.msk.f32.mxu0 %vm8723_vm0, %v8724_v1 }
0x2531   :  { %7883 = vmatprep.subr.bf16.mxu0 %v8722_v0 }
0x2532   :  { %v3624_v33 = vpop.permute.xlu1 %3623 }
0x2533   :  { %7334 = vmatmul.mubr.msk.f32.vlgmr.msra.gmra.mrb[32].mxu1 %vm382_vm2, %v3624_v33 }
0x2534   :  { %7885 = vmatpush3.bf16.msra.mxu0 %v9613_v31  ;;  %7888 = vmatpush3.bf16.msra.mxu1 %v9592_v8 }
0x2535   :  { %7889 = vmatprep.subr.bf16.mxu1 %v8722_v0  ;;  %7355 = vmatprep.mubr.msk.f32.mxu1 %vm8723_vm0, %v8724_v1 }
0x2536   :  { %7892 = vmatprep.subr.bf16.mxu0 %v8722_v0 }
0x2538   :  { %7891 = vmatpush3.bf16.msra.mxu1 %v9615_v11 }
0x2539   :  { %7898 = vmatprep.subr.bf16.mxu1 %v8722_v0 }
0x2602   :  { %v3587_v35 = vpop.f32.mrb[30].mxu0 }
0x2603   :  { %v3588_v36 = vadd.f32 %v9645_v25, %v3587_v35  ;;  %v7324_v38 = vpop.f32.mrb[31].mxu0 }
0x2605   :  { %v3592_v40 = vrot.slane %v3588_v36, 6 }
0x2606   :  { %v3693_v30 = vpop.f32.mrb[32].mxu1 }
0x2607   :  { %v3694_v32 = vadd.f32 %v9647_v14, %v3693_v30  ;;  %3601 = vrot.lane.b32.xlu0 %v3592_v40, %s8725_s20  ;;  %v7335_v42 = vpop.f32.mrb[33].mxu1  ;;  %v3594_v45 = vadd.f32 %v3592_v40, %v9641_v49 }
0x2609   :  { %v3698_v44 = vrot.slane %v3694_v32, 4  ;;  %v6561_v52 = vmul.f32 -1.442695, %v3594_v45 }
0x260b   :  { %3707 = vrot.lane.b32.xlu1 %v3698_v44, %s8725_s20  ;;  %v3700_v43 = vadd.f32 %v3698_v44, %v9643_v3  ;;  %8241 = vpow2.f32 %v6561_v52 }
0x260d   :  { %v6563_v50 = vmul.f32 -1.442695, %v3700_v43 }
0x260f   :  { %8243 = vpow2.f32 %v6563_v50 }
0x2615   :  { %v8242_v53 = vpop.eup %8241 }
0x2616   :  { %v3598_v55 = vadd.f32 1.0, %v8242_v53 }
0x2618   :  { %8245 = vrcp.f32 %v3598_v55 }
0x2619   :  { %v8244_v56 = vpop.eup %8243 }
0x261a   :  { %v3704_v23 = vadd.f32 1.0, %v8244_v56 }
0x261c   :  { %8247 = vrcp.f32 %v3704_v23 }
0x2622   :  { %v8246_v61 = vpop.eup %8245 }
0x2623   :  { %v3611_v6 = vsub.f32 1.0, %v8246_v61  ;;  %v3619_v5 = vmul.f32 %v8246_v61, %v3617_v60 }
0x2626   :  { %v8248_v63 = vpop.eup %8247 }
0x2627   :  { %v3717_v21 = vsub.f32 1.0, %v8248_v63  ;;  %v3725_v12 = vmul.f32 %v8248_v63, %v3723_v46 }
0x2679   :  { %v3602_v62 = vpop.permute.xlu0 %3601 }
0x267a   :  { %v3604_v34 = vmul.f32 %v8246_v61, %v3602_v62 }
0x267c   :  { %3606 = vrot.lane.b32.xlu0 %v3604_v34, %s8725_s20 }
0x267d   :  { %v3708_v2 = vpop.permute.xlu1 %3707 }
0x267e   :  { %v3710_v51 = vmul.f32 %v8248_v63, %v3708_v2 }
0x2680   :  { %3712 = vrot.lane.b32.xlu1 %v3710_v51, %s8725_s20 }
0x26ee   :  { %v3607_v37 = vpop.permute.xlu0 %3606 }
0x26ef   :  { %v3609_v39 = vadd.f32 %v3607_v37, %v9641_v49 }
0x26f1   :  { %8249 = vtanh.f32 %v3609_v39 }
0x26f2   :  { %v3713_v41 = vpop.permute.xlu1 %3712 }
0x26f3   :  { %v3715_v48 = vadd.f32 %v3713_v41, %v9643_v3 }
0x26f5   :  { %8251 = vtanh.f32 %v3715_v48 }
0x26fb   :  { %v8250_v47 = vpop.eup %8249 }
0x26fc   :  { %3613 = vrot.lane.b32.xlu0 %v8250_v47, %s8726_s15 }
0x26ff   :  { %v8252_v54 = vpop.eup %8251 }
0x2700   :  { %3719 = vrot.lane.b32.xlu1 %v8252_v54, %s8726_s15 }
0x276e   :  { %v3614_v4 = vpop.permute.xlu0 %3613 }
0x276f   :  { %v3616_v7 = vmul.f32 %v3614_v4, %v3611_v6 }
0x2771   :  { %v9847_v58 = vadd.f32 %v3619_v5, %v3616_v7 }
0x2772   :  { %v3720_v9 = vpop.permute.xlu1 %3719 }
0x2773   :  { %v3728_v10 = vrot.slane %v9847_v58, 2  ;;  %v3722_v13 = vmul.f32 %v3720_v9, %v3717_v21  ;;  %v3829_v61 = vrot.slane %v9847_v58, 6 }
0x2775   :  { %v9850_v15 = vadd.f32 %v3725_v12, %v3722_v13  ;;  %3729 = vrot.lane.b32.xlu0 %v3728_v10, %s8726_s15 }
0x2777   :  { %v3834_v16 = vrot.slane %v9850_v15, 4  ;;  %v3935_v51 = vrot.slane %v9850_v15, 2 }
0x2779   :  { %3835 = vrot.lane.b32.xlu1 %v3834_v16, %s8726_s15 }
0x27e7   :  { %v3730_v17 = vpop.permute.xlu0 %3729 }
0x27e8   :  { %7345 = vmatmul.mubr.msk.f32.vlgmr.msra.gmra.mrb[32].mxu0 %vm382_vm2, %v3730_v17 }
0x27e9   :  { %7894 = vmatpush3.bf16.msra.mxu0 %v9590_v18  ;;  %7366 = vmatprep.mubr.msk.f32.mxu0 %vm8723_vm0, %v8724_v1 }
0x27ea   :  { %7895 = vmatprep.subr.bf16.mxu0 %v8722_v0 }
0x27eb   :  { %v3836_v19 = vpop.permute.xlu1 %3835 }
0x27ec   :  { %7356 = vmatmul.mubr.msk.f32.vlgmr.msra.gmra.mrb[34].mxu1 %vm382_vm2, %v3836_v19 }
0x27ed   :  { %7897 = vmatpush3.bf16.msra.mxu0 %v9613_v31  ;;  %7900 = vmatpush3.bf16.msra.mxu1 %v9592_v8 }
0x27ee   :  { %7901 = vmatprep.subr.bf16.mxu1 %v8722_v0  ;;  %7377 = vmatprep.mubr.msk.f32.mxu1 %vm8723_vm0, %v8724_v1 }
0x27ef   :  { %7904 = vmatprep.subr.bf16.mxu0 %v8722_v0 }
0x27f1   :  { %7903 = vmatpush3.bf16.msra.mxu1 %v9615_v11 }
0x27f2   :  { %7916 = vmatprep.subr.bf16.mxu1 %v8722_v0 }
0x28bb   :  { %v3799_v18 = vpop.f32.mrb[32].mxu0 }
0x28bc   :  { %v3800_v20 = vadd.f32 %v9645_v25, %v3799_v18  ;;  %v7346_v22 = vpop.f32.mrb[33].mxu0 }
0x28be   :  { %v3804_v24 = vrot.slane %v3800_v20, 4 }
0x28bf   :  { %v3905_v57 = vpop.f32.mrb[34].mxu1 }
0x28c0   :  { %v3906_v31 = vadd.f32 %v9647_v14, %v3905_v57  ;;  %3813 = vrot.lane.b32.xlu0 %v3804_v24, %s8725_s20  ;;  %v7357_v8 = vpop.f32.mrb[35].mxu1  ;;  %v3806_v28 = vadd.f32 %v3804_v24, %v9641_v49 }
0x28c2   :  { %v3910_v27 = vrot.slane %v3906_v31, 6  ;;  %v6565_v29 = vmul.f32 -1.442695, %v3806_v28  ;;  %v4166_v28 = vld [vmem:[#allocation10 + $0x8] sm:$0xff] }
0x28c4   :  { %3919 = vrot.lane.b32.xlu1 %v3910_v27, %s8725_s20  ;;  %v3912_v11 = vadd.f32 %v3910_v27, %v9643_v3  ;;  %8253 = vpow2.f32 %v6565_v29  ;;  %v4165_v27 = vld [vmem:[#allocation10] sm:$0xff]  ;;  %v4167_v29 = vld [vmem:[#allocation10 + $0x10] sm:$0xff] }
0x28c6   :  { %v6567_v33 = vmul.f32 -1.442695, %v3912_v11  ;;  %v7905_v11 = vpack.c.bf16 %v4166_v28, %v4165_v27 }
0x28c8   :  { %8255 = vpow2.f32 %v6567_v33  ;;  %v4168_v33 = vld [vmem:[#allocation10 + $0x18] sm:$0xff] }
0x28ce   :  { %v8254_v35 = vpop.eup %8253 }
0x28cf   :  { %v3810_v36 = vadd.f32 1.0, %v8254_v35  ;;  %v7908_v35 = vpack.c.bf16 %v4168_v33, %v4167_v29  ;;  %v4490_v29 = vld [vmem:[#allocation15 + $0x20] sm:$0xff] }
0x28d1   :  { %8257 = vrcp.f32 %v3810_v36 }
0x28d2   :  { %v8256_v38 = vpop.eup %8255 }
0x28d3   :  { %v3916_v40 = vadd.f32 1.0, %v8256_v38 }
0x28d5   :  { %8259 = vrcp.f32 %v3916_v40  ;;  %v4169_v40 = vld [vmem:[#allocation10 + $0x20] sm:$0xff] }
0x28db   :  { %v8258_v30 = vpop.eup %8257 }
0x28dc   :  { %v3823_v62 = vsub.f32 1.0, %v8258_v30  ;;  %v3831_v63 = vmul.f32 %v8258_v30, %v3829_v61 }
0x28df   :  { %v8260_v44 = vpop.eup %8259 }
0x28e0   :  { %v3929_v39 = vsub.f32 1.0, %v8260_v44  ;;  %v3937_v47 = vmul.f32 %v8260_v44, %v3935_v51 }
0x2932   :  { %v3814_v32 = vpop.permute.xlu0 %3813 }
0x2933   :  { %v3816_v42 = vmul.f32 %v8258_v30, %v3814_v32  ;;  %v4170_v30 = vld [vmem:[#allocation10 + $0x28] sm:$0xff] }
0x2935   :  { %3818 = vrot.lane.b32.xlu0 %v3816_v42, %s8725_s20  ;;  %v7911_v42 = vpack.c.bf16 %v4170_v30, %v4169_v40  ;;  %v4493_v40 = vld [vmem:[#allocation15 + $0x38] sm:$0xff] }
0x2936   :  { %v3920_v45 = vpop.permute.xlu1 %3919 }
0x2937   :  { %v3922_v52 = vmul.f32 %v8260_v44, %v3920_v45  ;;  %v4171_v45 = vld [vmem:[#allocation10 + $0x30] sm:$0xff] }
0x2939   :  { %3924 = vrot.lane.b32.xlu1 %v3922_v52, %s8725_s20  ;;  %v4172_v52 = vld [vmem:[#allocation10 + $0x38] sm:$0xff] }
0x29a7   :  { %v3819_v43 = vpop.permute.xlu0 %3818 }
0x29a8   :  { %v3821_v50 = vadd.f32 %v3819_v43, %v9641_v49  ;;  %v7914_v43 = vpack.c.bf16 %v4172_v52, %v4171_v45 }
0x29aa   :  { %8261 = vtanh.f32 %v3821_v50 }
0x29ab   :  { %v3925_v53 = vpop.permute.xlu1 %3924 }
0x29ac   :  { %v3927_v55 = vadd.f32 %v3925_v53, %v9643_v3 }
0x29ae   :  { %8263 = vtanh.f32 %v3927_v55 }
0x29b4   :  { %v8262_v56 = vpop.eup %8261 }
0x29b5   :  { %3825 = vrot.lane.b32.xlu0 %v8262_v56, %s8726_s15 }
0x29b8   :  { %v8264_v23 = vpop.eup %8263 }
0x29b9   :  { %3931 = vrot.lane.b32.xlu1 %v8264_v23, %s8726_s15 }
0x2a27   :  { %v3826_v34 = vpop.permute.xlu0 %3825 }
0x2a28   :  { %v3828_v2 = vmul.f32 %v3826_v34, %v3823_v62 }
0x2a2a   :  { %v9883_v37 = vadd.f32 %v3831_v63, %v3828_v2 }
0x2a2b   :  { %v3932_v41 = vpop.permute.xlu1 %3931 }
0x2a2c   :  { %v3940_v48 = vrot.slane %v9883_v37, 4  ;;  %v3934_v54 = vmul.f32 %v3932_v41, %v3929_v39  ;;  %v4041_v53 = vrot.slane %v9883_v37, 6 }
0x2a2e   :  { %v9886_v60 = vadd.f32 %v3937_v47, %v3934_v54  ;;  %3941 = vrot.lane.b32.xlu0 %v3940_v48, %s8726_s15 }
0x2a30   :  { %v4046_v6 = vrot.slane %v9886_v60, 2  ;;  %v4478_v60 = vld [vmem:[#allocation15 + $0x8] sm:$0xff] }
0x2a32   :  { %4047 = vrot.lane.b32.xlu1 %v4046_v6, %s8726_s15 }
0x2aa0   :  { %v3942_v4 = vpop.permute.xlu0 %3941 }
0x2aa1   :  { %7367 = vmatmul.mubr.msk.f32.vlgmr.msra.gmra.mrb[34].mxu0 %vm382_vm2, %v3942_v4  ;;  %v4477_v4 = vld [vmem:[#allocation15] sm:$0xff] }
0x2aa2   :  { %7396 = vmatprep.mubr.msk.f32.mxu0 %vm8723_vm0, %v8724_v1  ;;  %7906 = vmatpush3.bf16.msra.mxu0 %v7905_v11  ;;  %v4491_v11 = vld [vmem:[#allocation15 + $0x28] sm:$0xff] }
0x2aa3   :  { %7907 = vmatprep.subr.bf16.mxu0 %v8722_v0 }
0x2aa4   :  { %v4048_v5 = vpop.permute.xlu1 %4047 }
0x2aa5   :  { %7378 = vmatmul.mubr.msk.f32.vlgmr.msra.gmra.mrb[36].mxu1 %vm382_vm2, %v4048_v5  ;;  %v9932_v5 = vpack.c.bf16 %v4478_v60, %v4477_v4  ;;  %v9999_v60 = vld [vmem:[#allocation18 + $0x1] ss:$0 sm:$0xff] }
0x2aa6   :  { %7407 = vmatprep.mubr.msk.f32.mxu1 %vm8723_vm0, %v8724_v1  ;;  %7909 = vmatpush3.bf16.msra.mxu0 %v7908_v35  ;;  %v9962_v35 = vpack.c.bf16 %v4491_v11, %v4490_v29 }
0x2aa7   :  { %7910 = vmatprep.subr.bf16.mxu0 %v8722_v0 }
0x2aaa   :  { %7912 = vmatpush3.bf16.msra.mxu0 %v7911_v42  ;;  %v4394_v42 = vld [vmem:[#allocation13 + $0x8] sm:$0xff] }
0x2aab   :  { %7913 = vmatprep.subr.bf16.mxu0 %v8722_v0 }
0x2aae   :  { %7915 = vmatpush3.bf16.msra.mxu0 %v7914_v43 }
0x2aaf   :  { %7928 = vmatprep.subr.bf16.mxu0 %v8722_v0 }
0x2b74   :  { %v4011_v7 = vpop.f32.mrb[34].mxu0 }
0x2b75   :  { %v4012_v46 = vadd.f32 %v9645_v25, %v4011_v7  ;;  %v7368_v58 = vpop.f32.mrb[35].mxu0  ;;  %v4480_v7 = vld [vmem:[#allocation15 + $0x18] sm:$0xff] }
0x2b76   :  { %v6572_v58 = vld [vmem:[#allocation12] ss:$0 sm:$0xff] }
0x2b77   :  { %v4016_v21 = vrot.slane %v4012_v46, 2 }
0x2b78   :  { %v4117_v9 = vpop.f32.mrb[36].mxu1 }
0x2b79   :  { %v4118_v10 = vadd.f32 %v9647_v14, %v4117_v9  ;;  %4025 = vrot.lane.b32.xlu0 %v4016_v21, %s8725_s20  ;;  %v7379_v12 = vpop.f32.mrb[37].mxu1  ;;  %v4018_v13 = vadd.f32 %v4016_v21, %v9641_v49 }
0x2b7b   :  { %4129 = vrot.lane.b32.xlu1 %v4118_v10, %s8725_s20  ;;  %v4121_v15 = vadd.f32 %v4118_v10, %v9643_v3  ;;  %v6569_v16 = vmul.f32 -1.442695, %v4018_v13 }
0x2b7d   :  { %v6571_v17 = vmul.f32 -1.442695, %v4121_v15  ;;  %8265 = vpow2.f32 %v6569_v16 }
0x2b7f   :  { %8267 = vpow2.f32 %v6571_v17 }
0x2b87   :  { %v8266_v19 = vpop.eup %8265 }
0x2b88   :  { %v4022_v18 = vadd.f32 1.0, %v8266_v19  ;;  %v4278_v19 = vld [vmem:[%s10314_s24] sm:$0xff] }
0x2b89   :  { %v8268_v25 = vpop.eup %8267 }
0x2b8a   :  { %v4125_v20 = vadd.f32 1.0, %v8268_v25  ;;  %8269 = vrcp.f32 %v4022_v18  ;;  %v4279_v25 = vld [vmem:[%s10314_s24 + $0x8] sm:$0xff] }
0x2b8b   :  { %v7917_v18 = vpack.c.bf16 %v4279_v25, %v4278_v19 }
0x2b8c   :  { %8271 = vrcp.f32 %v4125_v20  ;;  %v4280_v20 = vld [vmem:[%s10314_s24 + $0x10] sm:$0xff] }
0x2b8d   :  { %7918 = vmatpush3.bf16.msra.mxu1 %v7917_v18 }
0x2b8e   :  { %7919 = vmatprep.subr.bf16.mxu1 %v8722_v0 }
0x2b94   :  { %v8270_v14 = vpop.eup %8269 }
0x2b95   :  { %v4035_v55 = vsub.f32 1.0, %v8270_v14  ;;  %v4043_v23 = vmul.f32 %v8270_v14, %v4041_v53  ;;  %v9989_v53 = vld [vmem:[#allocation18] ss:$0 sm:$0xff] }
0x2b96   :  { %v8272_v57 = vpop.eup %8271 }
0x2b97   :  { %v4139_v62 = vsub.f32 1.0, %v8272_v57 }
0x2beb   :  { %v4026_v22 = vpop.permute.xlu0 %4025 }
0x2bec   :  { %v4028_v24 = vmul.f32 %v8270_v14, %v4026_v22  ;;  %v4281_v14 = vld [vmem:[%s10314_s24 + $0x18] sm:$0xff] }
0x2bed   :  { %v4130_v31 = vpop.permute.xlu1 %4129  ;;  %v7920_v22 = vpack.c.bf16 %v4281_v14, %v4280_v20 }
0x2bee   :  { %v4132_v8 = vmul.f32 %v8272_v57, %v4130_v31  ;;  %4030 = vrot.lane.b32.xlu0 %v4028_v24, %s8725_s20 }
0x2bef   :  { %7921 = vmatpush3.bf16.msra.mxu1 %v7920_v22 }
0x2bf0   :  { %4134 = vrot.lane.b32.xlu1 %v4132_v8, %s8725_s20  ;;  %7922 = vmatprep.subr.bf16.mxu1 %v8722_v0 }
0x2c60   :  { %v4031_v36 = vpop.permute.xlu0 %4030 }
0x2c61   :  { %v4033_v38 = vadd.f32 %v4031_v36, %v9641_v49 }
0x2c62   :  { %v4135_v32 = vpop.permute.xlu1 %4134 }
0x2c63   :  { %8273 = vtanh.f32 %v4033_v38  ;;  %v4137_v44 = vadd.f32 %v4135_v32, %v9643_v3  ;;  %v4262_v3 = vld [vmem:[%s10355_s22] sm:$0xf]  ;;  %v4492_v38 = vld [vmem:[#allocation15 + $0x30] sm:$0xff]  ;;  %v4393_v32 = vld [vmem:[#allocation13] sm:$0xff] }
0x2c64   :  { %v7923_v52 = vpack.c.bf16 %v4394_v42, %v4393_v32 }
0x2c65   :  { %8275 = vtanh.f32 %v4137_v44  ;;  %v9969_v44 = vpack.c.bf16 %v4493_v40, %v4492_v38 }
0x2c6d   :  { %v8274_v50 = vpop.eup %8273 }
0x2c6e   :  { %4037 = vrot.lane.b32.xlu0 %v8274_v50, %s8726_s15  ;;  %v4395_v50 = vld [vmem:[#allocation13 + $0x10] sm:$0xff] }
0x2c6f   :  { %v8276_v49 = vpop.eup %8275 }
0x2c70   :  { %4141 = vrot.lane.b32.xlu1 %v8276_v49, %s8726_s15  ;;  %v4396_v49 = vld [vmem:[#allocation13 + $0x18] sm:$0xff] }
0x2c72   :  { %4149 = vrot.lane.b32.xlu0 %v9551_v59, %s8726_s15  ;;  %v4146_v59 = vmul.f32 %v8272_v57, %v4046_v6  ;;  %v4479_v6 = vld [vmem:[#allocation15 + $0x10] sm:$0xff] }
0x2c73   :  { %v9935_v46 = vpack.c.bf16 %v4480_v7, %v4479_v6 }
0x2c74   :  { %4154 = vrot.lane.b32.xlu1 %v9561_v26, %s8726_s15 }
0x2c76   :  { %4264 = vrot.lane.b32.xlu0 %v4262_v3, %s8727_s8  ;;  %v7926_v3 = vpack.c.bf16 %v4396_v49, %v4395_v50 }
0x2ce0   :  { %v4038_v56 = vpop.permute.xlu0 %4037 }
0x2ce1   :  { %v4040_v61 = vmul.f32 %v4038_v56, %v4035_v55 }
0x2ce2   :  { %v4142_v34 = vpop.permute.xlu1 %4141 }
0x2ce3   :  { %v4044_v63 = vadd.f32 %v4043_v23, %v4040_v61  ;;  %v4144_v2 = vmul.f32 %v4142_v34, %v4139_v62 }
0x2ce4   :  { %v4150_v51 = vpop.permute.xlu0 %4149 }
0x2ce5   :  { %v4147_v39 = vadd.f32 %v4146_v59, %v4144_v2  ;;  %v4152_v26 = vsel %vm382_vm2, %v4150_v51, %v4044_v63  ;;  %v6577_v51 = vld [vmem:[#allocation16] ss:$0 sm:$0xff] }
0x2ce6   :  { %v4155_v41 = vpop.permute.xlu1 %4154  ;;  %v4159_v47 = vrot.slane %v4152_v26, 6 }
0x2ce7   :  { %v4157_v48 = vsel %vm382_vm2, %v4155_v41, %v4147_v39 }
0x2ce8   :  { %v4162_v37 = vrot.slane %v4157_v48, 6  ;;  %v4265_v8 = vpop.permute.xlu0 %4264 }
0x2cea   :  { %v4164_v54 = vsel %vm2245_vm3, %v4159_v47, %v4162_v37 }
0x2ceb   :  { %7397 = vmatmul.mubr.msk.f32.vlgmr.msra.gmra.mrb[36].mxu0 %vm296_vm1, %v4164_v54 }
0x2cec   :  { %7429 = vmatprep.mubr.msk.f32.mxu0 %vm8723_vm0, %v8724_v1  ;;  %7930 = vmatpush3.bf16.msra.mxu0 %v9932_v5 }
0x2ced   :  { %7931 = vmatprep.subr.bf16.mxu0 %v8722_v0 }
0x2cf0   :  { %7933 = vmatpush3.bf16.msra.mxu0 %v9935_v46 }
0x2cf1   :  { %7940 = vmatprep.subr.bf16.mxu0 %v8722_v0 }
0x2dbe   :  { %v4249_v21 = vpop.f32.mrb[36].mxu0 }
0x2dbf   :  { %v9940_v9 = vadd.f32 %v6572_v58, %v4249_v21  ;;  %v7398_v10 = vpop.f32.mrb[37].mxu0  ;;  %v4483_v21 = vld [vmem:[#allocation13 + $0x20] sm:$0xff] }
0x2dc0   :  { %v4484_v10 = vld [vmem:[#allocation13 + $0x28] sm:$0xff] }
0x2dc1   :  { %v4254_v12 = vand.u32 2147483647, %v9940_v9  ;;  %v4253_v57 = vmax.f32 %v9940_v9, 0.0 }
0x2dc3   :  { %v4255_v13 = vsub.f32 0.0, %v4254_v12  ;;  %v4485_v12 = vld [vmem:[#allocation13 + $0x30] sm:$0xff] }
0x2dc5   :  { %v4256_v15 = vmul.f32 1.442695, %v4255_v13  ;;  %v10005_v13 = vpack.c.bf16 %v4484_v10, %v4483_v21 }
0x2dc7   :  { %8277 = vpow2.f32 %v4256_v15  ;;  %v4486_v15 = vld [vmem:[#allocation13 + $0x38] sm:$0xff] }
0x2dd1   :  { %v8278_v16 = vpop.eup %8277 }
0x2dd2   :  { %v4258_v17 = vadd.f32 1.0, %v8278_v16  ;;  %v10008_v16 = vpack.c.bf16 %v4486_v15, %v4485_v12 }
0x2dd4   :  { %8279 = vlog2.f32 %v4258_v17 }
0x2dde   :  { %v8280_v24 = vpop.eup %8279 }
0x2ddf   :  { %v4260_v31 = vmul.f32 0.6931472, %v8280_v24 }
0x2de1   :  { %v9958_v27 = vadd.f32 %v4260_v31, %v4253_v57  ;;  %v10036_v57 = vld [vmem:[#allocation16 + $0x1] ss:$0 sm:$0xff] }
0x2de3   :  { %v4267_v28 = vmul.f32 %v4265_v8, %v9958_v27 }
0x2de5   :  { %4269 = vrot.lane.b32.xlu1 %v4267_v28, %s8726_s15 }
0x2e57   :  { %v4270_v33 = vpop.permute.xlu1 %4269 }
0x2e58   :  { %v4272_v36 = vadd.f32 %v4270_v33, %v9940_v9 }
0x2e5a   :  { %v9965_v30 = vrot.slane %v4272_v36, 2  ;;  %7430 = vmatmul.mubr.msk.f32.vlgmr.msra.gmra.mrb[38].mxu0 %vm382_vm2, %v4272_v36 }
0x2e5b   :  { %7942 = vmatpush3.bf16.msra.mxu0 %v9962_v35  ;;  %7451 = vmatprep.mubr.msk.f32.mxu0 %vm8723_vm0, %v8724_v1 }
0x2e5c   :  { %v4276_v45 = vadd.f32 %v9965_v30, %v4272_v36  ;;  %7943 = vmatprep.subr.bf16.mxu0 %v8722_v0 }
0x2e5e   :  { %v4277_v43 = vmul.f32 0.5, %v4276_v45 }
0x2e5f   :  { %7945 = vmatpush3.bf16.msra.mxu0 %v9969_v44 }
0x2e60   :  { %7408 = vmatmul.mubr.msk.f32.vlgmr.msra.gmra.mrb[38].mxu1 %vm382_vm2, %v4277_v43  ;;  %7952 = vmatprep.subr.bf16.mxu0 %v8722_v0 }
0x2e61   :  { %7924 = vmatpush3.bf16.msra.mxu1 %v7923_v52  ;;  %7418 = vmatprep.mubr.msk.f32.mxu1 %vm8723_vm0, %v8724_v1 }
0x2e62   :  { %7452 = vmatmul.mubr.msk.f32.vlgmr.msra.gmra.mrb[40].mxu0 %vm382_vm2, %v9965_v30  ;;  %7925 = vmatprep.subr.bf16.mxu1 %v8722_v0 }
0x2e63   :  { %7473 = vmatprep.mubr.msk.f32.mxu0 %vm8723_vm0, %v8724_v1  ;;  %7954 = vmatpush3.bf16.msra.mxu0 %v10005_v13 }
0x2e64   :  { %7955 = vmatprep.subr.bf16.mxu0 %v8722_v0 }
0x2e65   :  { %7927 = vmatpush3.bf16.msra.mxu1 %v7926_v3 }
0x2e66   :  { %7934 = vmatprep.subr.bf16.mxu1 %v8722_v0 }
0x2e67   :  { %7957 = vmatpush3.bf16.msra.mxu0 %v10008_v16 }
0x2e68   :  { %7419 = vmatmul.mubr.msk.f32.vlgmr.msra.gmra.mrb[40].mxu1 %vm382_vm2, %v4276_v45  ;;  %7964 = vmatprep.subr.bf16.mxu0 %v8722_v0 }
0x2e69   :  { %7440 = vmatprep.mubr.msk.f32.mxu1 %vm8723_vm0, %v8724_v1  ;;  %7936 = vmatpush3.bf16.msra.mxu1 %v10005_v13 }
0x2e6a   :  { %7937 = vmatprep.subr.bf16.mxu1 %v8722_v0 }
0x2e6d   :  { %7939 = vmatpush3.bf16.msra.mxu1 %v10008_v16 }
0x2e6e   :  { %7946 = vmatprep.subr.bf16.mxu1 %v8722_v0 }
0x2f2d   :  { %v4570_v55 = vpop.f32.mrb[38].mxu0 }
0x2f2e   :  { %v4571_v56 = vadd.f32 %v9989_v53, %v4570_v55  ;;  %v7431_v23 = vpop.f32.mrb[39].mxu0 }
0x2f30   :  { %4582 = vrot.lane.b32.xlu0 %v4571_v56, %s8725_s20 }
0x2f33   :  { %v9993_v61 = vpop.f32.mrb[38].mxu1 }
0x2f34   :  { %v7409_v62 = vpop.f32.mrb[39].mxu1 }
0x2f35   :  { %v4758_v34 = vpop.f32.mrb[40].mxu0 }
0x2f36   :  { %v7453_v63 = vpop.f32.mrb[41].mxu0  ;;  %v4759_v6 = vadd.f32 %v9999_v60, %v4758_v34 }
0x2f3b   :  { %v4473_v59 = vpop.f32.mrb[40].mxu1 }
0x2f3c   :  { %v7420_v2 = vpop.f32.mrb[41].mxu1  ;;  %v9995_v39 = vadd.f32 %v6577_v51, %v4473_v59 }
0x2f3e   :  { %v4574_v26 = vadd.f32 %v4571_v56, %v9995_v39 }
0x2f40   :  { %v6581_v41 = vmul.f32 -1.442695, %v4574_v26 }
0x2f42   :  { %8281 = vpow2.f32 %v6581_v41 }
0x2f4c   :  { %v8282_v48 = vpop.eup %8281 }
0x2f4d   :  { %v4578_v47 = vadd.f32 1.0, %v8282_v48 }
0x2f4f   :  { %8283 = vrcp.f32 %v4578_v47 }
0x2f59   :  { %v8284_v37 = vpop.eup %8283 }
0x2f5a   :  { %v4592_v25 = vsub.f32 1.0, %v8284_v37 }
0x2fa2   :  { %v4583_v54 = vpop.permute.xlu0 %4582 }
0x2fa3   :  { %v4585_v4 = vmul.f32 %v8284_v37, %v4583_v54 }
0x2fa5   :  { %4587 = vrot.lane.b32.xlu1 %v4585_v4, %s8725_s20 }
0x2fa9   :  { %4598 = vrot.lane.b32.xlu1 %v4272_v36, %s8727_s8 }
0x2fad   :  { %4770 = vrot.lane.b32.xlu1 %v4759_v6, %s8725_s20 }
0x3017   :  { %v4588_v7 = vpop.permute.xlu1 %4587 }
0x3018   :  { %v4590_v58 = vadd.f32 %v4588_v7, %v9995_v39 }
0x301a   :  { %8285 = vtanh.f32 %v4590_v58 }
0x301b   :  { %v4599_v19 = vpop.permute.xlu1 %4598 }
0x301c   :  { %v4601_v20 = vmul.f32 %v8284_v37, %v4599_v19 }
0x301f   :  { %v4771_v45 = vpop.permute.xlu1 %4770 }
0x3024   :  { %v8286_v17 = vpop.eup %8285 }
0x3025   :  { %4594 = vrot.lane.b32.xlu0 %v8286_v17, %s8726_s15 }
0x3097   :  { %v4595_v18 = vpop.permute.xlu0 %4594 }
0x3098   :  { %v4597_v14 = vmul.f32 %v4595_v18, %v4592_v25 }
0x309a   :  { %v10018_v22 = vadd.f32 %v4601_v20, %v4597_v14 }
0x309c   :  { %4610 = vrot.lane.b32.xlu0 %v10018_v22, %s8726_s15 }
0x310e   :  { %v4611_v24 = vpop.permute.xlu0 %4610 }
0x310f   :  { %7441 = vmatmul.mubr.msk.f32.vlgmr.msra.gmra.mrb[42].mxu1 %vm382_vm2, %v4611_v24 }
0x3110   :  { %7948 = vmatpush3.bf16.msra.mxu1 %v9932_v5  ;;  %7462 = vmatprep.mubr.msk.f32.mxu1 %vm8723_vm0, %v8724_v1 }
0x3111   :  { %7949 = vmatprep.subr.bf16.mxu1 %v8722_v0 }
0x3114   :  { %7951 = vmatpush3.bf16.msra.mxu1 %v9935_v46 }
0x3115   :  { %7958 = vmatprep.subr.bf16.mxu1 %v8722_v0 }
0x3117   :  { %7463 = vmatmul.mubr.msk.f32.vlgmr.msra.gmra.mrb[44].mxu1 %vm382_vm2, %v4611_v24 }
0x3118   :  { %7960 = vmatpush3.bf16.msra.mxu1 %v9962_v35  ;;  %7484 = vmatprep.mubr.msk.f32.mxu1 %vm8723_vm0, %v8724_v1 }
0x3119   :  { %7961 = vmatprep.subr.bf16.mxu1 %v8722_v0 }
0x311c   :  { %7963 = vmatpush3.bf16.msra.mxu1 %v9969_v44 }
0x311d   :  { %7970 = vmatprep.subr.bf16.mxu1 %v8722_v0 }
0x31e2   :  { %v4680_v31 = vpop.f32.mrb[42].mxu1 }
0x31e3   :  { %v4681_v8 = vadd.f32 %v10036_v57, %v4680_v31  ;;  %v7442_v28 = vpop.f32.mrb[43].mxu1 }
0x31e5   :  { %v4762_v29 = vadd.f32 %v4759_v6, %v4681_v8 }
0x31e7   :  { %v6586_v11 = vmul.f32 -1.442695, %v4762_v29 }
0x31e9   :  { %8287 = vpow2.f32 %v6586_v11 }
0x31ea   :  { %v4857_v33 = vpop.f32.mrb[44].mxu1 }
0x31eb   :  { %v4858_v36 = vadd.f32 %v9989_v53, %v4857_v33  ;;  %v7464_v38 = vpop.f32.mrb[45].mxu1 }
0x31ed   :  { %4869 = vrot.lane.b32.xlu0 %v4858_v36, %s8725_s20  ;;  %v4861_v43 = vadd.f32 %v4858_v36, %v9995_v39 }
0x31ef   :  { %v6588_v50 = vmul.f32 -1.442695, %v4861_v43 }
0x31f3   :  { %v8288_v40 = vpop.eup %8287 }
0x31f4   :  { %v4766_v32 = vadd.f32 1.0, %v8288_v40 }
0x31f6   :  { %8289 = vrcp.f32 %v4766_v32 }
0x31f7   :  { %8291 = vpow2.f32 %v6588_v50 }
0x3200   :  { %v8290_v42 = vpop.eup %8289 }
0x3201   :  { %v4773_v52 = vmul.f32 %v8290_v42, %v4771_v45  ;;  %v8292_v49 = vpop.eup %8291  ;;  %v4780_v41 = vsub.f32 1.0, %v8290_v42 }
0x3202   :  { %v4865_v3 = vadd.f32 1.0, %v8292_v49 }
0x3203   :  { %4775 = vrot.lane.b32.xlu1 %v4773_v52, %s8725_s20 }
0x3204   :  { %8293 = vrcp.f32 %v4865_v3 }
0x320e   :  { %v8294_v55 = vpop.eup %8293 }
0x320f   :  { %v4885_v6 = vmul.f32 %v8294_v55, %v10018_v22 }
0x325f   :  { %v4870_v56 = vpop.permute.xlu0 %4869 }
0x3260   :  { %v4872_v23 = vmul.f32 %v8294_v55, %v4870_v56 }
0x3262   :  { %4874 = vrot.lane.b32.xlu0 %v4872_v23, %s8725_s20 }
0x3266   :  { %4786 = vrot.lane.b32.xlu0 %v9965_v30, %s8727_s8  ;;  %v4879_v30 = vsub.f32 1.0, %v8294_v55 }
0x3275   :  { %v4776_v62 = vpop.permute.xlu1 %4775 }
0x3276   :  { %v4778_v34 = vadd.f32 %v4776_v62, %v4681_v8 }
0x3278   :  { %8295 = vtanh.f32 %v4778_v34 }
0x3282   :  { %v8296_v63 = vpop.eup %8295 }
0x3283   :  { %4782 = vrot.lane.b32.xlu1 %v8296_v63, %s8726_s15 }
0x32d4   :  { %v4875_v59 = vpop.permute.xlu0 %4874 }
0x32d5   :  { %v4877_v2 = vadd.f32 %v4875_v59, %v9995_v39 }
0x32d7   :  { %8297 = vtanh.f32 %v4877_v2 }
0x32d8   :  { %v4787_v26 = vpop.permute.xlu0 %4786 }
0x32d9   :  { %v4789_v47 = vmul.f32 %v8290_v42, %v4787_v26 }
0x32e1   :  { %v8298_v51 = vpop.eup %8297 }
0x32e2   :  { %4881 = vrot.lane.b32.xlu1 %v8298_v51, %s8726_s15 }
0x32f5   :  { %v4783_v48 = vpop.permute.xlu1 %4782 }
0x32f6   :  { %v4785_v37 = vmul.f32 %v4783_v48, %v4780_v41 }
0x32f8   :  { %v10049_v54 = vadd.f32 %v4789_v47, %v4785_v37 }
0x32fa   :  { %4963 = vrot.lane.b32.xlu0 %v10049_v54, %s8726_s15 }
0x3354   :  { %v4882_v4 = vpop.permute.xlu1 %4881 }
0x3355   :  { %v4884_v7 = vmul.f32 %v4882_v4, %v4879_v30 }
0x3357   :  { %v10054_v58 = vadd.f32 %v4885_v6, %v4884_v7 }
0x3359   :  { %4888 = vrot.lane.b32.xlu1 %v10054_v58, %s8726_s15 }
0x336c   :  { %v4964_v21 = vpop.permute.xlu0 %4963 }
0x336d   :  { %7485 = vmatmul.mubr.msk.f32.vlgmr.msra.gmra.mrb[46].mxu1 %vm382_vm2, %v4964_v21 }
0x336e   :  { %7972 = vmatpush3.bf16.msra.mxu1 %v10005_v13  ;;  %7506 = vmatprep.mubr.msk.f32.mxu1 %vm8723_vm0, %v8724_v1 }
0x336f   :  { %7973 = vmatprep.subr.bf16.mxu1 %v8722_v0 }
0x3372   :  { %7975 = vmatpush3.bf16.msra.mxu1 %v10008_v16 }
0x3373   :  { %7982 = vmatprep.subr.bf16.mxu1 %v8722_v0 }
0x33cb   :  { %v4889_v10 = vpop.permute.xlu1 %4888 }
0x33cc   :  { %7474 = vmatmul.mubr.msk.f32.vlgmr.msra.gmra.mrb[42].mxu0 %vm382_vm2, %v4889_v10 }
0x33cd   :  { %7966 = vmatpush3.bf16.msra.mxu0 %v9932_v5  ;;  %7495 = vmatprep.mubr.msk.f32.mxu0 %vm8723_vm0, %v8724_v1 }
0x33ce   :  { %7967 = vmatprep.subr.bf16.mxu0 %v8722_v0 }
0x33d1   :  { %7969 = vmatpush3.bf16.msra.mxu0 %v9935_v46 }
0x33d2   :  { %7976 = vmatprep.subr.bf16.mxu0 %v8722_v0 }
0x33d4   :  { %7496 = vmatmul.mubr.msk.f32.vlgmr.msra.gmra.mrb[44].mxu0 %vm382_vm2, %v4889_v10 }
0x33d5   :  { %7978 = vmatpush3.bf16.msra.mxu0 %v9962_v35  ;;  %7517 = vmatprep.mubr.msk.f32.mxu0 %vm8723_vm0, %v8724_v1 }
0x33d6   :  { %7979 = vmatprep.subr.bf16.mxu0 %v8722_v0 }
0x33d9   :  { %7981 = vmatpush3.bf16.msra.mxu0 %v9969_v44 }
0x33da   :  { %7988 = vmatprep.subr.bf16.mxu0 %v8722_v0 }
0x3440   :  { %v5033_v12 = vpop.f32.mrb[46].mxu1 }
0x3441   :  { %v5034_v15 = vadd.f32 %v9999_v60, %v5033_v12  ;;  %v7486_v17 = vpop.f32.mrb[47].mxu1 }
0x3443   :  { %5045 = vrot.lane.b32.xlu0 %v5034_v15, %s8725_s20 }
0x349f   :  { %v4958_v19 = vpop.f32.mrb[42].mxu0 }
0x34a0   :  { %v4959_v25 = vadd.f32 %v10036_v57, %v4958_v19  ;;  %v7475_v18 = vpop.f32.mrb[43].mxu0 }
0x34a2   :  { %v5037_v20 = vadd.f32 %v5034_v15, %v4959_v25 }
0x34a4   :  { %v6591_v14 = vmul.f32 -1.442695, %v5037_v20 }
0x34a6   :  { %8299 = vpow2.f32 %v6591_v14 }
0x34a7   :  { %v5129_v22 = vpop.f32.mrb[44].mxu0 }
0x34a8   :  { %v5130_v24 = vadd.f32 %v9989_v53, %v5129_v22  ;;  %v7497_v31 = vpop.f32.mrb[45].mxu0 }
0x34aa   :  { %5141 = vrot.lane.b32.xlu1 %v5130_v24, %s8725_s20  ;;  %v5133_v36 = vadd.f32 %v5130_v24, %v9995_v39 }
0x34ac   :  { %v6593_v38 = vmul.f32 -1.442695, %v5133_v36 }
0x34b0   :  { %v8300_v8 = vpop.eup %8299 }
0x34b1   :  { %v5041_v28 = vadd.f32 1.0, %v8300_v8 }
0x34b3   :  { %8301 = vrcp.f32 %v5041_v28 }
0x34b4   :  { %8303 = vpow2.f32 %v6593_v38 }
0x34b5   :  { %v5046_v11 = vpop.permute.xlu0 %5045 }
0x34bd   :  { %v8302_v29 = vpop.eup %8301 }
0x34be   :  { %v5048_v33 = vmul.f32 %v8302_v29, %v5046_v11  ;;  %v8304_v40 = vpop.eup %8303  ;;  %v5055_v23 = vsub.f32 1.0, %v8302_v29  ;;  %v5061_v34 = vmul.f32 %v8302_v29, %v10049_v54 }
0x34bf   :  { %v5137_v32 = vadd.f32 1.0, %v8304_v40 }
0x34c0   :  { %5050 = vrot.lane.b32.xlu0 %v5048_v33, %s8725_s20 }
0x34c1   :  { %8305 = vrcp.f32 %v5137_v32 }
0x34cb   :  { %v8306_v42 = vpop.eup %8305 }
0x34cc   :  { %v5151_v2 = vsub.f32 1.0, %v8306_v42  ;;  %v5157_v26 = vmul.f32 %v8306_v42, %v10054_v58 }
0x351c   :  { %v5142_v45 = vpop.permute.xlu1 %5141 }
0x351d   :  { %v5144_v52 = vmul.f32 %v8306_v42, %v5142_v45 }
0x351f   :  { %5146 = vrot.lane.b32.xlu1 %v5144_v52, %s8725_s20 }
0x3532   :  { %v5051_v43 = vpop.permute.xlu0 %5050 }
0x3533   :  { %v5053_v50 = vadd.f32 %v5051_v43, %v4959_v25 }
0x3535   :  { %8307 = vtanh.f32 %v5053_v50 }
0x353f   :  { %v8308_v49 = vpop.eup %8307 }
0x3540   :  { %5057 = vrot.lane.b32.xlu0 %v8308_v49, %s8726_s15 }
0x3591   :  { %v5147_v3 = vpop.permute.xlu1 %5146 }
0x3592   :  { %v5149_v55 = vadd.f32 %v5147_v3, %v9995_v39 }
0x3594   :  { %8309 = vtanh.f32 %v5149_v55 }
0x359e   :  { %v8310_v56 = vpop.eup %8309 }
0x359f   :  { %5153 = vrot.lane.b32.xlu1 %v8310_v56, %s8726_s15 }
0x35b2   :  { %v5058_v62 = vpop.permute.xlu0 %5057 }
0x35b3   :  { %v5060_v63 = vmul.f32 %v5058_v62, %v5055_v23 }
0x35b5   :  { %v10091_v59 = vadd.f32 %v5061_v34, %v5060_v63 }
0x35b7   :  { %5235 = vrot.lane.b32.xlu0 %v10091_v59, %s8726_s15 }
0x3611   :  { %v5154_v51 = vpop.permute.xlu1 %5153 }
0x3612   :  { %v5156_v41 = vmul.f32 %v5154_v51, %v5151_v2 }
0x3614   :  { %v10096_v48 = vadd.f32 %v5157_v26, %v5156_v41 }
0x3616   :  { %5160 = vrot.lane.b32.xlu1 %v10096_v48, %s8726_s15 }
0x3629   :  { %v5236_v47 = vpop.permute.xlu0 %5235 }
0x362a   :  { %7518 = vmatmul.mubr.msk.f32.vlgmr.msra.gmra.mrb[46].mxu0 %vm382_vm2, %v5236_v47 }
0x362b   :  { %7990 = vmatpush3.bf16.msra.mxu0 %v10005_v13  ;;  %7539 = vmatprep.mubr.msk.f32.mxu0 %vm8723_vm0, %v8724_v1 }
0x362c   :  { %7991 = vmatprep.subr.bf16.mxu0 %v8722_v0 }
0x362f   :  { %7993 = vmatpush3.bf16.msra.mxu0 %v10008_v16 }
0x3630   :  { %8000 = vmatprep.subr.bf16.mxu0 %v8722_v0 }
0x3688   :  { %v5161_v37 = vpop.permute.xlu1 %5160 }
0x3689   :  { %7507 = vmatmul.mubr.msk.f32.vlgmr.msra.gmra.mrb[48].mxu1 %vm382_vm2, %v5161_v37 }
0x368a   :  { %7984 = vmatpush3.bf16.msra.mxu1 %v9932_v5  ;;  %7528 = vmatprep.mubr.msk.f32.mxu1 %vm8723_vm0, %v8724_v1 }
0x368b   :  { %7985 = vmatprep.subr.bf16.mxu1 %v8722_v0 }
0x368e   :  { %7987 = vmatpush3.bf16.msra.mxu1 %v9935_v46 }
0x368f   :  { %7994 = vmatprep.subr.bf16.mxu1 %v8722_v0 }
0x3691   :  { %7529 = vmatmul.mubr.msk.f32.vlgmr.msra.gmra.mrb[50].mxu1 %vm382_vm2, %v5161_v37 }
0x3692   :  { %7996 = vmatpush3.bf16.msra.mxu1 %v9962_v35  ;;  %7550 = vmatprep.mubr.msk.f32.mxu1 %vm8723_vm0, %v8724_v1 }
0x3693   :  { %7997 = vmatprep.subr.bf16.mxu1 %v8722_v0 }
0x3696   :  { %7999 = vmatpush3.bf16.msra.mxu1 %v9969_v44 }
0x3697   :  { %8006 = vmatprep.subr.bf16.mxu1 %v8722_v0 }
0x36fd   :  { %v5305_v30 = vpop.f32.mrb[46].mxu0 }
0x36fe   :  { %v5306_v4 = vadd.f32 %v9999_v60, %v5305_v30  ;;  %v7519_v6 = vpop.f32.mrb[47].mxu0 }
0x3700   :  { %5317 = vrot.lane.b32.xlu0 %v5306_v4, %s8725_s20 }
0x375c   :  { %v5230_v7 = vpop.f32.mrb[48].mxu1 }
0x375d   :  { %v5231_v58 = vadd.f32 %v10036_v57, %v5230_v7  ;;  %v7508_v21 = vpop.f32.mrb[49].mxu1 }
0x375f   :  { %v5309_v10 = vadd.f32 %v5306_v4, %v5231_v58 }
0x3761   :  { %v6596_v12 = vmul.f32 -1.442695, %v5309_v10 }
0x3763   :  { %8311 = vpow2.f32 %v6596_v12 }
0x3764   :  { %v5401_v15 = vpop.f32.mrb[50].mxu1 }
0x3765   :  { %v5402_v17 = vadd.f32 %v9989_v53, %v5401_v15  ;;  %v7530_v19 = vpop.f32.mrb[51].mxu1 }
0x3767   :  { %5413 = vrot.lane.b32.xlu1 %v5402_v17, %s8725_s20  ;;  %v5405_v24 = vadd.f32 %v5402_v17, %v9995_v39 }
0x3769   :  { %v6598_v31 = vmul.f32 -1.442695, %v5405_v24 }
0x376d   :  { %v8312_v25 = vpop.eup %8311 }
0x376e   :  { %v5313_v18 = vadd.f32 1.0, %v8312_v25 }
0x3770   :  { %8313 = vrcp.f32 %v5313_v18 }
0x3771   :  { %8315 = vpow2.f32 %v6598_v31 }
0x3772   :  { %v5318_v14 = vpop.permute.xlu0 %5317 }
0x377a   :  { %v8314_v20 = vpop.eup %8313 }
0x377b   :  { %v5320_v22 = vmul.f32 %v8314_v20, %v5318_v14  ;;  %v8316_v8 = vpop.eup %8315  ;;  %v5327_v52 = vsub.f32 1.0, %v8314_v20  ;;  %v5333_v50 = vmul.f32 %v8314_v20, %v10091_v59 }
0x377c   :  { %v5409_v28 = vadd.f32 1.0, %v8316_v8 }
0x377d   :  { %5322 = vrot.lane.b32.xlu0 %v5320_v22, %s8725_s20 }
0x377e   :  { %8317 = vrcp.f32 %v5409_v28 }
0x3788   :  { %v8318_v29 = vpop.eup %8317 }
0x3789   :  { %v5423_v55 = vsub.f32 1.0, %v8318_v29  ;;  %v5429_v23 = vmul.f32 %v8318_v29, %v10096_v48 }
0x37d9   :  { %v5414_v11 = vpop.permute.xlu1 %5413 }
0x37da   :  { %v5416_v33 = vmul.f32 %v8318_v29, %v5414_v11 }
0x37dc   :  { %5418 = vrot.lane.b32.xlu1 %v5416_v33, %s8725_s20 }
0x37ef   :  { %v5323_v36 = vpop.permute.xlu0 %5322 }
0x37f0   :  { %v5325_v38 = vadd.f32 %v5323_v36, %v5231_v58 }
0x37f2   :  { %8319 = vtanh.f32 %v5325_v38 }
0x37fc   :  { %v8320_v40 = vpop.eup %8319 }
0x37fd   :  { %5329 = vrot.lane.b32.xlu0 %v8320_v40, %s8726_s15 }
0x384e   :  { %v5419_v32 = vpop.permute.xlu1 %5418 }
0x384f   :  { %v5421_v42 = vadd.f32 %v5419_v32, %v9995_v39 }
0x3851   :  { %8321 = vtanh.f32 %v5421_v42 }
0x385b   :  { %v8322_v45 = vpop.eup %8321 }
0x385c   :  { %5425 = vrot.lane.b32.xlu1 %v8322_v45, %s8726_s15 }
0x386f   :  { %v5330_v43 = vpop.permute.xlu0 %5329 }
0x3870   :  { %v5332_v49 = vmul.f32 %v5330_v43, %v5327_v52 }
0x3872   :  { %v10133_v3 = vadd.f32 %v5333_v50, %v5332_v49 }
0x3874   :  { %5507 = vrot.lane.b32.xlu0 %v10133_v3, %s8726_s15 }
0x38ce   :  { %v5426_v56 = vpop.permute.xlu1 %5425 }
0x38cf   :  { %v5428_v62 = vmul.f32 %v5426_v56, %v5423_v55 }
0x38d1   :  { %v10138_v34 = vadd.f32 %v5429_v23, %v5428_v62 }
0x38d3   :  { %5432 = vrot.lane.b32.xlu1 %v10138_v34, %s8726_s15 }
0x38e6   :  { %v5508_v63 = vpop.permute.xlu0 %5507 }
0x38e7   :  { %7551 = vmatmul.mubr.msk.f32.vlgmr.msra.gmra.mrb[52].mxu1 %vm382_vm2, %v5508_v63 }
0x38e8   :  { %8008 = vmatpush3.bf16.msra.mxu1 %v10005_v13  ;;  %7572 = vmatprep.mubr.msk.f32.mxu1 %vm8723_vm0, %v8724_v1 }
0x38e9   :  { %8009 = vmatprep.subr.bf16.mxu1 %v8722_v0 }
0x38ec   :  { %8011 = vmatpush3.bf16.msra.mxu1 %v10008_v16 }
0x38ed   :  { %8018 = vmatprep.subr.bf16.mxu1 %v8722_v0 }
0x3945   :  { %v5433_v2 = vpop.permute.xlu1 %5432 }
0x3946   :  { %7540 = vmatmul.mubr.msk.f32.vlgmr.msra.gmra.mrb[48].mxu0 %vm382_vm2, %v5433_v2 }
0x3947   :  { %8002 = vmatpush3.bf16.msra.mxu0 %v9932_v5  ;;  %7561 = vmatprep.mubr.msk.f32.mxu0 %vm8723_vm0, %v8724_v1 }
0x3948   :  { %8003 = vmatprep.subr.bf16.mxu0 %v8722_v0 }
0x394b   :  { %8005 = vmatpush3.bf16.msra.mxu0 %v9935_v46 }
0x394c   :  { %8012 = vmatprep.subr.bf16.mxu0 %v8722_v0 }
0x394e   :  { %7562 = vmatmul.mubr.msk.f32.vlgmr.msra.gmra.mrb[50].mxu0 %vm382_vm2, %v5433_v2 }
0x394f   :  { %8014 = vmatpush3.bf16.msra.mxu0 %v9962_v35  ;;  %7583 = vmatprep.mubr.msk.f32.mxu0 %vm8723_vm0, %v8724_v1 }
0x3950   :  { %8015 = vmatprep.subr.bf16.mxu0 %v8722_v0 }
0x3953   :  { %8017 = vmatpush3.bf16.msra.mxu0 %v9969_v44 }
0x3954   :  { %8024 = vmatprep.subr.bf16.mxu0 %v8722_v0 }
0x39ba   :  { %v5577_v51 = vpop.f32.mrb[52].mxu1 }
0x39bb   :  { %v5578_v26 = vadd.f32 %v9999_v60, %v5577_v51  ;;  %v7552_v41 = vpop.f32.mrb[53].mxu1 }
0x39bd   :  { %5589 = vrot.lane.b32.xlu0 %v5578_v26, %s8725_s20 }
0x3a19   :  { %v5502_v48 = vpop.f32.mrb[48].mxu0 }
0x3a1a   :  { %v5503_v47 = vadd.f32 %v10036_v57, %v5502_v48  ;;  %v7541_v37 = vpop.f32.mrb[49].mxu0 }
0x3a1c   :  { %v5581_v30 = vadd.f32 %v5578_v26, %v5503_v47 }
0x3a1e   :  { %v6601_v4 = vmul.f32 -1.442695, %v5581_v30 }
0x3a20   :  { %8323 = vpow2.f32 %v6601_v4 }
0x3a21   :  { %v5673_v6 = vpop.f32.mrb[50].mxu0 }
0x3a22   :  { %v5674_v7 = vadd.f32 %v9989_v53, %v5673_v6  ;;  %v7563_v58 = vpop.f32.mrb[51].mxu0 }
0x3a24   :  { %5685 = vrot.lane.b32.xlu1 %v5674_v7, %s8725_s20  ;;  %v5677_v19 = vadd.f32 %v5674_v7, %v9995_v39 }
0x3a26   :  { %v6603_v25 = vmul.f32 -1.442695, %v5677_v19 }
0x3a2a   :  { %v8324_v21 = vpop.eup %8323 }
0x3a2b   :  { %v5585_v10 = vadd.f32 1.0, %v8324_v21 }
0x3a2d   :  { %8325 = vrcp.f32 %v5585_v10 }
0x3a2e   :  { %8327 = vpow2.f32 %v6603_v25 }
0x3a2f   :  { %v5590_v15 = vpop.permute.xlu0 %5589 }
0x3a37   :  { %v8326_v12 = vpop.eup %8325 }
0x3a38   :  { %v5592_v17 = vmul.f32 %v8326_v12, %v5590_v15  ;;  %v8328_v18 = vpop.eup %8327  ;;  %v5599_v36 = vsub.f32 1.0, %v8326_v12  ;;  %v5605_v40 = vmul.f32 %v8326_v12, %v10133_v3 }
0x3a39   :  { %v5681_v20 = vadd.f32 1.0, %v8328_v18 }
0x3a3a   :  { %5594 = vrot.lane.b32.xlu0 %v5592_v17, %s8725_s20 }
0x3a3b   :  { %8329 = vrcp.f32 %v5681_v20 }
0x3a45   :  { %v8330_v14 = vpop.eup %8329 }
0x3a46   :  { %v5695_v45 = vsub.f32 1.0, %v8330_v14  ;;  %v5701_v43 = vmul.f32 %v8330_v14, %v10138_v34 }
0x3a96   :  { %v5686_v22 = vpop.permute.xlu1 %5685 }
0x3a97   :  { %v5688_v24 = vmul.f32 %v8330_v14, %v5686_v22 }
0x3a99   :  { %5690 = vrot.lane.b32.xlu1 %v5688_v24, %s8725_s20 }
0x3aac   :  { %v5595_v31 = vpop.permute.xlu0 %5594 }
0x3aad   :  { %v5597_v8 = vadd.f32 %v5595_v31, %v5503_v47 }
0x3aaf   :  { %8331 = vtanh.f32 %v5597_v8 }
0x3ab9   :  { %v8332_v28 = vpop.eup %8331 }
0x3aba   :  { %5601 = vrot.lane.b32.xlu0 %v8332_v28, %s8726_s15 }
0x3b0b   :  { %v5691_v29 = vpop.permute.xlu1 %5690 }
0x3b0c   :  { %v5693_v11 = vadd.f32 %v5691_v29, %v9995_v39 }
0x3b0e   :  { %8333 = vtanh.f32 %v5693_v11 }
0x3b18   :  { %v8334_v33 = vpop.eup %8333 }
0x3b19   :  { %5697 = vrot.lane.b32.xlu1 %v8334_v33, %s8726_s15 }
0x3b2c   :  { %v5602_v38 = vpop.permute.xlu0 %5601 }
0x3b2d   :  { %v5604_v32 = vmul.f32 %v5602_v38, %v5599_v36 }
0x3b2f   :  { %v10175_v42 = vadd.f32 %v5605_v40, %v5604_v32 }
0x3b31   :  { %5779 = vrot.lane.b32.xlu0 %v10175_v42, %s8726_s15 }
0x3b8b   :  { %v5698_v52 = vpop.permute.xlu1 %5697 }
0x3b8c   :  { %v5700_v50 = vmul.f32 %v5698_v52, %v5695_v45 }
0x3b8e   :  { %v10180_v49 = vadd.f32 %v5701_v43, %v5700_v50 }
0x3b90   :  { %5704 = vrot.lane.b32.xlu1 %v10180_v49, %s8726_s15 }
0x3ba3   :  { %v5780_v55 = vpop.permute.xlu0 %5779 }
0x3ba4   :  { %7584 = vmatmul.mubr.msk.f32.vlgmr.msra.gmra.mrb[52].mxu0 %vm382_vm2, %v5780_v55 }
0x3ba5   :  { %8026 = vmatpush3.bf16.msra.mxu0 %v10005_v13  ;;  %7605 = vmatprep.mubr.msk.f32.mxu0 %vm8723_vm0, %v8724_v1 }
0x3ba6   :  { %8027 = vmatprep.subr.bf16.mxu0 %v8722_v0 }
0x3ba9   :  { %8029 = vmatpush3.bf16.msra.mxu0 %v10008_v16 }
0x3c02   :  { %v5705_v56 = vpop.permute.xlu1 %5704 }
0x3c03   :  { %7573 = vmatmul.mubr.msk.f32.vlgmr.msra.gmra.mrb[54].mxu1 %vm382_vm2, %v5705_v56 }
0x3c04   :  { %8020 = vmatpush3.bf16.msra.mxu1 %v9932_v5  ;;  %7594 = vmatprep.mubr.msk.f32.mxu1 %vm8723_vm0, %v8724_v1 }
0x3c05   :  { %8021 = vmatprep.subr.bf16.mxu1 %v8722_v0 }
0x3c08   :  { %8023 = vmatpush3.bf16.msra.mxu1 %v9935_v46 }
0x3c09   :  { %8030 = vmatprep.subr.bf16.mxu1 %v8722_v0 }
0x3c0b   :  { %7595 = vmatmul.mubr.msk.f32.vlgmr.msra.gmra.mrb[56].mxu1 %vm382_vm2, %v5705_v56  ;;  %v6153_v56 = vrot.slane %v10133_v3, 4 }
0x3c0c   :  { %8032 = vmatpush3.bf16.msra.mxu1 %v9962_v35  ;;  %7616 = vmatprep.mubr.msk.f32.mxu1 %vm8723_vm0, %v8724_v1 }
0x3c0d   :  { %8033 = vmatprep.subr.bf16.mxu1 %v8722_v0 }
0x3c10   :  { %8035 = vmatpush3.bf16.msra.mxu1 %v9969_v44 }
0x3c77   :  { %v5849_v5 = vpop.f32.mrb[52].mxu0 }
0x3c78   :  { %v5850_v13 = vadd.f32 %v9999_v60, %v5849_v5  ;;  %v7585_v16 = vpop.f32.mrb[53].mxu0  ;;  %v6155_v5 = vrot.slane %v10175_v42, 2 }
0x3c7a   :  { %5861 = vrot.lane.b32.xlu0 %v5850_v13, %s8725_s20 }
0x3cd6   :  { %v5774_v46 = vpop.f32.mrb[54].mxu1 }
0x3cd7   :  { %v5775_v23 = vadd.f32 %v10036_v57, %v5774_v46  ;;  %v7574_v62 = vpop.f32.mrb[55].mxu1  ;;  %v4363_v46 = vrot.slane %v9940_v9, 2 }
0x3cd8   :  { %v6165_v62 = vld [vmem:[%s10308_s18 + $0x8] sm:$0xff] }
0x3cd9   :  { %v5853_v34 = vadd.f32 %v5850_v13, %v5775_v23 }
0x3cdb   :  { %v6606_v63 = vmul.f32 -1.442695, %v5853_v34  ;;  %v6166_v34 = vld [vmem:[%s10308_s18 + $0x10] sm:$0xff] }
0x3cdd   :  { %8335 = vpow2.f32 %v6606_v63 }
0x3cde   :  { %v5945_v35 = vpop.f32.mrb[56].mxu1 }
0x3cdf   :  { %v5946_v1 = vadd.f32 %v9989_v53, %v5945_v35  ;;  %v7596_v2 = vpop.f32.mrb[57].mxu1 }
0x3ce1   :  { %5957 = vrot.lane.b32.xlu1 %v5946_v1, %s8725_s20  ;;  %v5949_v48 = vadd.f32 %v5946_v1, %v9995_v39  ;;  %v6167_v1 = vld [vmem:[%s10308_s18 + $0x18] sm:$0xff] }
0x3ce2   :  { %v8040_v2 = vpack.c.bf16 %v6167_v1, %v6166_v34 }
0x3ce3   :  { %v6608_v47 = vmul.f32 -1.442695, %v5949_v48 }
0x3ce7   :  { %v8336_v0 = vpop.eup %8335 }
0x3ce8   :  { %v5857_v44 = vadd.f32 1.0, %v8336_v0 }
0x3cea   :  { %8337 = vrcp.f32 %v5857_v44 }
0x3ceb   :  { %8339 = vpow2.f32 %v6608_v47 }
0x3cec   :  { %v5862_v26 = vpop.permute.xlu0 %5861 }
0x3cf4   :  { %v8338_v51 = vpop.eup %8337 }
0x3cf5   :  { %v5864_v41 = vmul.f32 %v8338_v51, %v5862_v26  ;;  %v8340_v37 = vpop.eup %8339  ;;  %v5871_v17 = vsub.f32 1.0, %v8338_v51  ;;  %v5877_v25 = vmul.f32 %v8338_v51, %v10175_v42 }
0x3cf6   :  { %v5953_v30 = vadd.f32 1.0, %v8340_v37  ;;  %v6574_v37 = vld [vmem:[%s10315_s25] ss:$0 sm:$0xff] }
0x3cf7   :  { %5866 = vrot.lane.b32.xlu0 %v5864_v41, %s8725_s20 }
0x3cf8   :  { %8341 = vrcp.f32 %v5953_v30 }
0x3d02   :  { %v8342_v4 = vpop.eup %8341 }
0x3d03   :  { %v5967_v14 = vsub.f32 1.0, %v8342_v4  ;;  %v5973_v24 = vmul.f32 %v8342_v4, %v10180_v49  ;;  %v6151_v49 = vrot.slane %v10091_v59, 6  ;;  %v4371_v59 = vrot.slane %v9958_v27, 2 }
0x3d53   :  { %v5958_v53 = vpop.permute.xlu1 %5957 }
0x3d54   :  { %v5960_v6 = vmul.f32 %v8342_v4, %v5958_v53  ;;  %v4359_v53 = vadd.f32 %v6574_v37, %v9993_v61  ;;  %v6264_v61 = vld [vmem:[#allocation21 + $0x10] sm:$0xff] }
0x3d56   :  { %5962 = vrot.lane.b32.xlu1 %v5960_v6, %s8725_s20 }
0x3d69   :  { %v5867_v7 = vpop.permute.xlu0 %5866 }
0x3d6a   :  { %v5869_v58 = vadd.f32 %v5867_v7, %v5775_v23 }
0x3d6c   :  { %8343 = vtanh.f32 %v5869_v58 }
0x3d76   :  { %v8344_v21 = vpop.eup %8343 }
0x3d77   :  { %5873 = vrot.lane.b32.xlu0 %v8344_v21, %s8726_s15 }
0x3dc8   :  { %v5963_v10 = vpop.permute.xlu1 %5962 }
0x3dc9   :  { %v5965_v12 = vadd.f32 %v5963_v10, %v9995_v39 }
0x3dcb   :  { %8345 = vtanh.f32 %v5965_v12 }
0x3dd5   :  { %v8346_v15 = vpop.eup %8345 }
0x3dd6   :  { %5969 = vrot.lane.b32.xlu1 %v8346_v15, %s8726_s15  ;;  %v6262_v15 = vld [vmem:[#allocation21] sm:$0xff] }
0x3de9   :  { %v5874_v19 = vpop.permute.xlu0 %5873 }
0x3dea   :  { %v5876_v18 = vmul.f32 %v5874_v19, %v5871_v17  ;;  %v6263_v17 = vld [vmem:[#allocation21 + $0x8] sm:$0xff] }
0x3deb   :  { %v8044_v19 = vpack.c.bf16 %v6263_v17, %v6262_v15 }
0x3dec   :  { %v10215_v20 = vadd.f32 %v5877_v25, %v5876_v18  ;;  %v6265_v25 = vld [vmem:[#allocation21 + $0x18] sm:$0xff] }
0x3ded   :  { %v8048_v18 = vpack.c.bf16 %v6265_v25, %v6264_v61  ;;  %8045 = vmatprep.subr.bf16.mxu1 %v8044_v19 }
0x3dee   :  { %6051 = vrot.lane.b32.xlu0 %v10215_v20, %s8726_s15 }
0x3e48   :  { %v5970_v22 = vpop.permute.xlu1 %5969 }
0x3e49   :  { %v5972_v31 = vmul.f32 %v5970_v22, %v5967_v14  ;;  %v6612_v22 = vld [vmem:[#allocation19] ss:$0 sm:$0xff] }
0x3e4b   :  { %v5974_v39 = vadd.f32 %v5973_v24, %v5972_v31 }
0x3e4d   :  { %5976 = vrot.lane.b32.xlu1 %v5974_v39, %s8726_s15 }
0x3e60   :  { %v6052_v8 = vpop.permute.xlu0 %6051 }
0x3e61   :  { %7617 = vmatmul.mubr.msk.f32.vlgmr.msra.gmra.mrb[58].mxu1 %vm382_vm2, %v6052_v8 }
0x3e62   :  { %8047 = vmatpush3.bf16.msra.mxu1 %v8044_v19 }
0x3e63   :  { %8049 = vmatprep.subr.bf16.mxu1 %v8048_v18 }
0x3e66   :  { %8051 = vmatpush3.bf16.msra.mxu1 %v8048_v18 }
0x3ebf   :  { %v5977_v28 = vpop.permute.xlu1 %5976 }
0x3ec0   :  { %7606 = vmatmul.mubr.msk.f32.vlgmr.msra.gmra.mrb[54].mxu0 %vm382_vm2, %v5977_v28 }
0x3f34   :  { %v6121_v29 = vpop.f32.mrb[58].mxu1 }
0x3f35   :  { %v6122_v11 = vadd.f32 %v9999_v60, %v6121_v29  ;;  %v7618_v33 = vpop.f32.mrb[59].mxu1 }
0x3f36   :  { %v6357_v33 = vld [vmem:[#allocation24 + $0x18] sm:$0xff] }
0x3f37   :  { %6133 = vrot.lane.b32.xlu0 %v6122_v11, %s8725_s20 }
0x3f93   :  { %v6046_v36 = vpop.f32.mrb[54].mxu0 }
0x3f94   :  { %v6047_v38 = vadd.f32 %v10036_v57, %v6046_v36  ;;  %v7607_v40 = vpop.f32.mrb[55].mxu0  ;;  %v6160_v57 = vsel %vm2245_vm3, %v10049_v54, %v6151_v49  ;;  %v6164_v54 = vld [vmem:[%s10308_s18] sm:$0xff] }
0x3f95   :  { %v6161_v13 = vsel %vm2247_vm4, %v6160_v57, %v6153_v56  ;;  %v8036_v35 = vpack.c.bf16 %v6165_v62, %v6164_v54 }
0x3f96   :  { %v6125_v32 = vadd.f32 %v6122_v11, %v6047_v38  ;;  %v6162_v16 = vsel %vm2249_vm5, %v6161_v13, %v6155_v5  ;;  %v6356_v11 = vld [vmem:[#allocation24 + $0x10] sm:$0xff] }
0x3f97   :  { %8037 = vmatprep.subr.bf16.mxu0 %v8036_v35  ;;  %v8056_v36 = vpack.c.bf16 %v6357_v33, %v6356_v11 }
0x3f98   :  { %v6611_v45 = vmul.f32 -1.442695, %v6125_v32  ;;  %8039 = vmatpush3.bf16.msra.mxu0 %v8036_v35 }
0x3f99   :  { %8041 = vmatprep.subr.bf16.mxu0 %v8040_v2 }
0x3f9a   :  { %8347 = vpow2.f32 %v6611_v45 }
0x3f9c   :  { %8043 = vmatpush3.bf16.msra.mxu0 %v8040_v2 }
0x3fa4   :  { %v8348_v52 = vpop.eup %8347 }
0x3fa5   :  { %v6129_v43 = vadd.f32 1.0, %v8348_v52 }
0x3fa7   :  { %8349 = vrcp.f32 %v6129_v43  ;;  %v6618_v43 = vld [vmem:[%s10357_s29] ss:$0 sm:$0xff] }
0x3fa9   :  { %v6134_v55 = vpop.permute.xlu0 %6133 }
0x3fb1   :  { %v8350_v50 = vpop.eup %8349 }
0x3fb2   :  { %v6136_v60 = vmul.f32 %v8350_v50, %v6134_v55  ;;  %v6143_v0 = vsub.f32 1.0, %v8350_v50  ;;  %v6149_v51 = vmul.f32 %v8350_v50, %v10215_v20 }
0x3fb4   :  { %6138 = vrot.lane.b32.xlu1 %v6136_v60, %s8725_s20 }
0x3fb8   :  { %6177 = vrot.lane.b32.xlu1 %v6162_v16, %s8726_s15 }
0x3fbc   :  { %4364 = vrot.lane.b32.xlu1 %v4363_v46, %s8727_s8 }
0x3fc0   :  { %4372 = vrot.lane.b32.xlu1 %v4371_v59, %s8725_s20 }
0x4026   :  { %v6139_v3 = vpop.permute.xlu1 %6138 }
0x4027   :  { %v6141_v42 = vadd.f32 %v6139_v3, %v6047_v38  ;;  %v6615_v38 = vld [vmem:[#allocation22] ss:$0 sm:$0xff] }
0x4029   :  { %8351 = vtanh.f32 %v6141_v42 }
0x402a   :  { %v6178_v23 = vpop.permute.xlu1 %6177 }
0x402b   :  { %7627 = vmatprep.mubr.msk.f32.mxu0 %vm382_vm2, %v6178_v23 }
0x402e   :  { %v4365_v30 = vpop.permute.xlu1 %4364 }
0x402f   :  { %v4375_v6 = vsel %vm382_vm2, %v9940_v9, %v4365_v30  ;;  %v6354_v9 = vld [vmem:[#allocation24] sm:$0xff] }
0x4032   :  { %v4373_v58 = vpop.permute.xlu1 %4372 }
0x4033   :  { %v8352_v63 = vpop.eup %8351 }
0x4034   :  { %6145 = vrot.lane.b32.xlu0 %v8352_v63, %s8726_s15 }
0x40a6   :  { %v6146_v44 = vpop.permute.xlu0 %6145 }
0x40a7   :  { %v6148_v26 = vmul.f32 %v6146_v44, %v6143_v0 }
0x40a9   :  { %v6150_v41 = vadd.f32 %v6149_v51, %v6148_v26 }
0x40ab   :  { %v6158_v48 = vrot.slane %v6150_v41, 6 }
0x40ad   :  { %v6163_v47 = vsel %vm2245_vm3, %v10215_v20, %v6158_v48  ;;  %v6355_v20 = vld [vmem:[#allocation24 + $0x8] sm:$0xff] }
0x40ae   :  { %6179 = vrot.lane.b32.xlu0 %v6163_v47, %s8726_s15  ;;  %v8052_v14 = vpack.c.bf16 %v6355_v20, %v6354_v9 }
0x40b0   :  { %8053 = vmatprep.subr.bf16.mxu0 %v8052_v14 }
0x40b2   :  { %4368 = vrot.lane.b32.xlu0 %v9958_v27, %s8727_s8  ;;  %v4380_v27 = vsel %vm4379_vm6, %v4359_v53, 0.0 }
0x4120   :  { %v6180_v4 = vpop.permute.xlu0 %6179 }
0x4121   :  { %7628 = vmatmul.mubr.msk.f32.vlgmr.msra.gmra.mrb[56].mxu0 %vm382_vm2, %v6180_v4 }
0x4122   :  { %8055 = vmatpush3.bf16.msra.mxu0 %v8052_v14 }
0x4123   :  { %8057 = vmatprep.subr.bf16.mxu0 %v8056_v36 }
0x4124   :  { %v4369_v7 = vpop.permute.xlu0 %4368 }
0x4125   :  { %v4376_v21 = vsel %vm296_vm1, %v4375_v6, %v4369_v7 }
0x4126   :  { %v4378_v10 = vsel %vm4377_vm7, %v4376_v21, %v4373_v58  ;;  %8059 = vmatpush3.bf16.msra.mxu0 %v8056_v36 }
0x4127   :  { %v4383_v12 = vcombine.low %v4378_v10, %v4380_v27 }
0x4129   :  { %6576 = vst.sshfl [vmem:[%s10356_s5] sm:$0x33 pattern:$0x76325410] %v4383_v12 }
0x41f4   :  { %v7629_v24 = vpop.f32.mrb[56].mxu0 }
0x41f5   :  { %v6257_v31 = vadd.f32 %v7629_v24, %v6612_v22  ;;  %v6251_v39 = vpop.f32.mrb[57].mxu0 }
0x41f6   :  { %v6252_v8 = vadd.f32 %v6612_v22, %v6251_v39 }
0x41f8   :  { %8353 = vtanh.f32 %v6252_v8 }
0x41f9   :  { %8355 = vtanh.f32 %v6257_v31 }
0x4202   :  { %v8354_v28 = vpop.eup %8353 }
0x4203   :  { %v8356_v29 = vpop.eup %8355  ;;  %7638 = vmatprep.mubr.msk.f32.mxu1 %vm382_vm2, %v8354_v28 }
0x4204   :  { %7639 = vmatmul.mubr.msk.f32.vlgmr.msra.gmra.mrb[60].mxu1 %vm382_vm2, %v8356_v29 }
0x42d7   :  { %v7640_v40 = vpop.f32.mrb[60].mxu1 }
0x42d8   :  { %v6351_v32 = vadd.f32 %v7640_v40, %v6615_v38  ;;  %v6345_v45 = vpop.f32.mrb[61].mxu1 }
0x42d9   :  { %v6346_v52 = vadd.f32 %v6615_v38, %v6345_v45 }
0x42da   :  { %6448 = vrot.lane.b32.xlu1 %v6351_v32, %s8725_s20 }
0x42db   :  { %6446 = vrot.lane.b32.xlu0 %v6346_v52, %s8725_s20  ;;  %7649 = vmatprep.mubr.msk.f32.mxu0 %vm382_vm2, %v6346_v52 }
0x42dc   :  { %7650 = vmatmul.mubr.msk.f32.vlgmr.msra.gmra.mrb[58].mxu0 %vm382_vm2, %v6351_v32 }
0x434c   :  { %v6449_v56 = vpop.permute.xlu1 %6448 }
0x434d   :  { %v6447_v5 = vpop.permute.xlu0 %6446 }
0x43af   :  { %v7651_v50 = vpop.f32.mrb[58].mxu0 }
0x43b0   :  { %v6443_v49 = vadd.f32 %v7651_v50, %v6618_v43  ;;  %v6437_v55 = vpop.f32.mrb[59].mxu0 }
0x43b1   :  { %v6438_v60 = vadd.f32 %v6618_v43, %v6437_v55 }
0x43b2   :  { %v6453_v57 = vsel %vm296_vm1, %v6443_v49, %v6449_v56 }
0x43b3   :  { %v6455_v13 = vsel %vm4377_vm7, %v6453_v57, 0.0  ;;  %v6452_v16 = vsel %vm296_vm1, %v6438_v60, %v6447_v5 }
0x43b4   :  { %6457 = vst [vmem:[%s10358_s2 + $0x8] sm:$0xf] %v6455_v13  ;;  %v6454_v46 = vsel %vm4377_vm7, %v6452_v16, 0.0 }
0x43b5   :  { %6456 = vst [vmem:[%s10358_s2] sm:$0xff] %v6454_v46 }
0x43b6   :  { %6466 = vsyncpa [#allocation3], 1 }
0x43b7   :  { %6467 = vsyncpa [#allocation5], 1 }
0x43b8   :  { %6468 = vsyncpa [#allocation8], 1 }
0x43b9   :  { %6469 = vsyncpa [#allocation11], 1 }
0x43ba   :  { %6470 = vsyncpa [#allocation14], 1 }
0x43bb   :  { %6471 = vsyncpa [#allocation17], 1 }
0x43bc   :  { %6472 = vsyncpa [#allocation20], 1 }
0x43bd   :  { %6473 = vsyncpa [#allocation23], 1 }

</bundles_post_ra>
